<compile_context>
chip_gen: v6e
topology: v6e:2x2x1
jax: 0.10.0
libtpu: 0.0.40
codegen_flags: <defaults>
</compile_context>

<pallas_src>
import jax
import jax.numpy as jnp
from jax.experimental import pallas as pl
from jax.experimental.pallas import tpu as pltpu

LEAKY_SLOPE = 0.01   # torch.nn.LeakyReLU default
BN_EPS = 1e-5        # nn.BatchNorm1d default
LANE = 128
SUBLANE = 8
N_OUT = 100          # fc2 output features

_VMEM_SPEC = pl.BlockSpec(memory_space=pltpu.MemorySpace.VMEM)


def _round_up(n, m):
    return ((n + m - 1) // m) * m


def _pad2d(a, rows, cols):
    r, c = a.shape
    return jnp.pad(a, ((0, rows - r), (0, cols - c)))


def _leaky_relu(z):
    return jnp.where(z > 0, z, LEAKY_SLOPE * z)


def _fold_bn(gamma, beta, mean, var):
    scale = gamma / jnp.sqrt(var + BN_EPS)
    shift = beta - mean * scale
    return scale, shift


# ---------------------------------------------------------------------------
# Fused kernel: conv1..conv4 -> flatten -> fc1 -> fc2
#   x_ref    : [L*B_pad, 1]    input values, rows ordered (l, b)
#   w0_ref   : [1, 128]        conv1 weight row (single input channel), f32
#   cw_ref   : [3, 128, 128]   conv2..4 weights [in, out], bf16, zero-padded
#   cb/cs/ct : [4, 1, 128]     per-conv-layer bias / BN scale / BN shift, f32
#   w1_ref   : [L, 128, 128]   fc1 weights permuted to (l, c, out), bf16
#   w2_ref   : [128, 128]      fc2 weights [in, out], bf16, zero-padded
#   fb/fs/ft : [2, 1, 128]     fc bias / BN scale / BN shift, f32
#   o_ref    : [B_pad, 128]    output (first 100 lanes valid)
#   h_scr    : [L*B_pad, 128]  f32 VMEM scratch for the conv-stack output
# ---------------------------------------------------------------------------
def _generator_kernel(x_ref, w0_ref, cw_ref, cb_ref, cs_ref, ct_ref,
                      w1_ref, w2_ref, fb_ref, fs_ref, ft_ref,
                      o_ref, h_scr):
    # conv1: one valid input lane -> VPU broadcast outer product (no MXU pass).
    h = x_ref[...] * w0_ref[...] + cb_ref[0]
    h = _leaky_relu(h) * cs_ref[0] + ct_ref[0]

    # conv2..conv4: 128x128 bf16 MXU matmuls, f32 accumulation, f32 epilogue.
    for i in range(3):  # static unroll
        z = jnp.dot(h.astype(jnp.bfloat16), cw_ref[i],
                    preferred_element_type=jnp.float32) + cb_ref[i + 1]
        h = _leaky_relu(z) * cs_ref[i + 1] + ct_ref[i + 1]
    h_scr[...] = h

    # fc1: rows are ordered (l, b) so each position l is a contiguous
    # [B_pad, 128] block; the torch flatten order (c*L + l) is already folded
    # into w1_ref's row permutation -> pure accumulation, no relayout.
    L = w1_ref.shape[0]
    bp = o_ref.shape[0]
    acc = jnp.zeros((bp, LANE), jnp.float32)
    for l in range(L):  # static unroll, sublane-aligned 8-row slices
        blk = h_scr[l * bp:(l + 1) * bp, :].astype(jnp.bfloat16)
        acc = acc + jnp.dot(blk, w1_ref[l], preferred_element_type=jnp.float32)
    h2 = _leaky_relu(acc + fb_ref[0]) * fs_ref[0] + ft_ref[0]

    # fc2
    z = jnp.dot(h2.astype(jnp.bfloat16), w2_ref[...],
                preferred_element_type=jnp.float32) + fb_ref[1]
    o_ref[...] = (_leaky_relu(z) * fs_ref[1] + ft_ref[1]).astype(o_ref.dtype)


# ---------------------------------------------------------------------------
# One-time parameter preparation (hoisted out of the hot path)
# ---------------------------------------------------------------------------
def prepare_params(params):
    conv = params["conv"]
    (w0, b0, g0, be0, m0, v0) = conv[0]
    s0, t0 = _fold_bn(g0, be0, m0, v0)
    w0_row = _pad2d(w0.T.astype(jnp.float32), 1, LANE)        # [1,128] (in=1)

    cw = []
    cb = [_pad2d(b0[None, :], 1, LANE)]
    cs = [_pad2d(s0[None, :], 1, LANE)]
    ct = [_pad2d(t0[None, :], 1, LANE)]
    for (w, b, g, be, m, v) in conv[1:]:
        s, t = _fold_bn(g, be, m, v)
        cw.append(_pad2d(w.T, LANE, LANE).astype(jnp.bfloat16))  # [in,out]
        cb.append(_pad2d(b[None, :], 1, LANE))
        cs.append(_pad2d(s[None, :], 1, LANE))
        ct.append(_pad2d(t[None, :], 1, LANE))

    (w1, b1, g1, be1, m1, v1), (w2, b2, g2, be2, m2, v2) = params["fc"]
    s1, t1 = _fold_bn(g1, be1, m1, v1)
    s2, t2 = _fold_bn(g2, be2, m2, v2)
    n_out, n_in = w1.shape
    L = n_in // LANE                                           # torch: f = c*L + l
    # w1_perm[l, c, o] = w1[o, c*L + l]
    w1_perm = w1.T.reshape(LANE, L, n_out).transpose(1, 0, 2)  # [L,128,n_out]
    w1_perm = jnp.pad(w1_perm, ((0, 0), (0, 0), (0, LANE - n_out)))
    w2p = _pad2d(w2.T, LANE, LANE)

    return dict(
        w0=w0_row,
        cw=jnp.stack(cw),                                      # [3,128,128] bf16
        cb=jnp.stack(cb), cs=jnp.stack(cs), ct=jnp.stack(ct),  # [4,1,128] f32
        w1=w1_perm.astype(jnp.bfloat16),                       # [L,128,128] bf16
        w2=w2p.astype(jnp.bfloat16),                           # [128,128]  bf16
        fb=jnp.stack([_pad2d(b1[None, :], 1, LANE), _pad2d(b2[None, :], 1, LANE)]),
        fs=jnp.stack([_pad2d(s1[None, :], 1, LANE), _pad2d(s2[None, :], 1, LANE)]),
        ft=jnp.stack([_pad2d(t1[None, :], 1, LANE), _pad2d(t2[None, :], 1, LANE)]),
    )


@jax.jit
def generator_s2m_forward(x, prep):
    """Forward pass (inference-mode BN).  x: [B, 1, L] with L == 25 -> [B, 100]."""
    x = x.astype(jnp.float32)
    B, cin, L = x.shape
    assert cin == 1 and L == prep["w1"].shape[0] and LANE * L == 3200, (cin, L)

    bp = _round_up(B, SUBLANE)
    R = L * bp
    # Rows ordered (l, b): row = l*bp + b, so fc1 reads contiguous blocks.
    xr = jnp.pad(x[:, 0, :], ((0, bp - B), (0, 0)))            # [bp, L]
    xr = xr.T.reshape(R, 1)                                    # [L*bp, 1]

    out = pl.pallas_call(
        _generator_kernel,
        out_shape=jax.ShapeDtypeStruct((bp, LANE), jnp.float32),
        in_specs=[_VMEM_SPEC] * 11,
        out_specs=_VMEM_SPEC,
        scratch_shapes=[pltpu.VMEM((R, LANE), jnp.float32)],
    )(xr, prep["w0"], prep["cw"], prep["cb"], prep["cs"], prep["ct"],
      prep["w1"], prep["w2"], prep["fb"], prep["fs"], prep["ft"])
    return out[:B, :N_OUT]


# ---------------------------------------------------------------------------
# Deterministic synthetic parameters + pure-JAX (f32) reference
# ---------------------------------------------------------------------------
def init_params(key):
    conv_dims = [(1, 64), (64, 64), (64, 128), (128, 128)]
    fc_dims = [(3200, 100), (100, 100)]
    params = {"conv": [], "fc": []}

    def make_layer(k, fan_in, w_shape, cout):
        ks = jax.random.split(k, 6)
        bound = 1.0 / (fan_in ** 0.5)
        w = jax.random.uniform(ks[0], w_shape, jnp.float32, -bound, bound)
        b = jax.random.uniform(ks[1], (cout,), jnp.float32, -bound, bound)
        gamma = jax.random.uniform(ks[2], (cout,), jnp.float32, 0.5, 1.5)
        beta = 0.1 * jax.random.normal(ks[3], (cout,), jnp.float32)
        mean = 0.1 * jax.random.normal(ks[4], (cout,), jnp.float32)
        var = jax.random.uniform(ks[5], (cout,), jnp.float32, 0.5, 1.5)
        return (w, b, gamma, beta, mean, var)

    for (ci, co) in conv_dims:                    # Conv1d weight [out, in] (k=1 squeezed)
        key, sub = jax.random.split(key)
        params["conv"].append(make_layer(sub, ci, (co, ci), co))
    for (fi, fo) in fc_dims:                      # Linear weight [out, in]
        key, sub = jax.random.split(key)
        params["fc"].append(make_layer(sub, fi, (fo, fi), fo))
    return params


def reference_forward(x, params):
    """Pure-JAX f32 mirror of the PyTorch forward (inference-mode BatchNorm)."""
    h = x.astype(jnp.float32)
    for (w, b, gamma, beta, mean, var) in params["conv"]:
        h = jnp.einsum("oc,bcl->bol", w, h) + b[None, :, None]
        h = jnp.where(h > 0, h, LEAKY_SLOPE * h)
        inv = gamma / jnp.sqrt(var + BN_EPS)
        h = (h - mean[None, :, None]) * inv[None, :, None] + beta[None, :, None]
    h = h.reshape(h.shape[0], -1)
    for (w, b, gamma, beta, mean, var) in params["fc"]:
        h = h @ w.T + b
        h = jnp.where(h > 0, h, LEAKY_SLOPE * h)
        h = (h - mean) * (gamma / jnp.sqrt(var + BN_EPS)) + beta
    return h


if __name__ == "__main__":
    key = jax.random.PRNGKey(0)
    k_x, k_p = jax.random.split(key)

    B, L = 2, 25                       # fc1 expects 128 * L == 3200  ->  L == 25
    x = jax.random.normal(k_x, (B, 1, L), jnp.float32)
    params = init_params(k_p)
    prep = prepare_params(params)      # one-time prep, outside the hot path

    out = generator_s2m_forward(x, prep)
    out = jax.block_until_ready(out)

    ref = reference_forward(x, params)
    assert out.shape == (B, N_OUT), out.shape
    # bf16 MXU operands (f32 accumulation) vs the f32 reference -> slightly
    # looser tolerance than a pure-f32 comparison.
    assert jnp.allclose(out, ref, atol=5e-2, rtol=5e-2), float(
        jnp.max(jnp.abs(out - ref))
    )

    print("KERNEL_OK")
</pallas_src>

<mosaic_0001>
module attributes {stable_mosaic.version = 11 : i64} {
  func.func @_generator_kernel(%arg0: memref<200x1xf32, #tpu.memory_space<vmem>>, %arg1: memref<1x128xf32, #tpu.memory_space<vmem>>, %arg2: memref<3x128x128xbf16, #tpu.memory_space<vmem>>, %arg3: memref<4x1x128xf32, #tpu.memory_space<vmem>>, %arg4: memref<4x1x128xf32, #tpu.memory_space<vmem>>, %arg5: memref<4x1x128xf32, #tpu.memory_space<vmem>>, %arg6: memref<25x128x128xbf16, #tpu.memory_space<vmem>>, %arg7: memref<128x128xbf16, #tpu.memory_space<vmem>>, %arg8: memref<2x1x128xf32, #tpu.memory_space<vmem>>, %arg9: memref<2x1x128xf32, #tpu.memory_space<vmem>>, %arg10: memref<2x1x128xf32, #tpu.memory_space<vmem>>, %arg11: memref<8x128xf32, #tpu.memory_space<vmem>>, %arg12: memref<200x128xf32, #tpu.memory_space<vmem>>) attributes {dimension_semantics = [], scalar_prefetch = 0 : i64, scratch_operands = 1 : i64, tpu.core_type = #tpu.core_type<tc>} {
    %c0 = arith.constant 0 : index
    %c0_0 = arith.constant 0 : index
    %0 = vector.load %arg0[%c0, %c0_0] : memref<200x1xf32, #tpu.memory_space<vmem>>, vector<200x1xf32>
    %c0_1 = arith.constant 0 : index
    %c0_2 = arith.constant 0 : index
    %1 = vector.load %arg1[%c0_1, %c0_2] : memref<1x128xf32, #tpu.memory_space<vmem>>, vector<1x128xf32>
    %2 = vector.broadcast %0 : vector<200x1xf32> to vector<200x128xf32>
    %3 = vector.broadcast %1 : vector<1x128xf32> to vector<200x128xf32>
    %4 = arith.mulf %2, %3 : vector<200x128xf32>
    %c0_3 = arith.constant 0 : index
    %c0_4 = arith.constant 0 : index
    %c0_5 = arith.constant 0 : index
    %5 = vector.load %arg3[%c0_3, %c0_4, %c0_5] : memref<4x1x128xf32, #tpu.memory_space<vmem>>, vector<1x1x128xf32>
    %6 = vector.shape_cast %5 : vector<1x1x128xf32> to vector<1x128xf32>
    %7 = vector.broadcast %6 : vector<1x128xf32> to vector<200x128xf32>
    %8 = arith.addf %4, %7 : vector<200x128xf32>
    %cst = arith.constant 0.000000e+00 : f32
    %9 = vector.broadcast %cst : f32 to vector<200x128xf32>
    %10 = arith.cmpf ogt, %8, %9 : vector<200x128xf32>
    %cst_6 = arith.constant 0.00999999977 : f32
    %11 = vector.broadcast %cst_6 : f32 to vector<200x128xf32>
    %12 = arith.mulf %11, %8 : vector<200x128xf32>
    %13 = arith.select %10, %8, %12 : vector<200x128xi1>, vector<200x128xf32>
    %c0_7 = arith.constant 0 : index
    %c0_8 = arith.constant 0 : index
    %c0_9 = arith.constant 0 : index
    %14 = vector.load %arg4[%c0_7, %c0_8, %c0_9] : memref<4x1x128xf32, #tpu.memory_space<vmem>>, vector<1x1x128xf32>
    %15 = vector.shape_cast %14 : vector<1x1x128xf32> to vector<1x128xf32>
    %16 = vector.broadcast %15 : vector<1x128xf32> to vector<200x128xf32>
    %17 = arith.mulf %13, %16 : vector<200x128xf32>
    %c0_10 = arith.constant 0 : index
    %c0_11 = arith.constant 0 : index
    %c0_12 = arith.constant 0 : index
    %18 = vector.load %arg5[%c0_10, %c0_11, %c0_12] : memref<4x1x128xf32, #tpu.memory_space<vmem>>, vector<1x1x128xf32>
    %19 = vector.shape_cast %18 : vector<1x1x128xf32> to vector<1x128xf32>
    %20 = vector.broadcast %19 : vector<1x128xf32> to vector<200x128xf32>
    %21 = arith.addf %17, %20 : vector<200x128xf32>
    %22 = arith.truncf %21 : vector<200x128xf32> to vector<200x128xbf16>
    %c0_13 = arith.constant 0 : index
    %c0_14 = arith.constant 0 : index
    %c0_15 = arith.constant 0 : index
    %23 = vector.load %arg2[%c0_13, %c0_14, %c0_15] : memref<3x128x128xbf16, #tpu.memory_space<vmem>>, vector<1x128x128xbf16>
    %24 = vector.shape_cast %23 : vector<1x128x128xbf16> to vector<128x128xbf16>
    %cst_16 = arith.constant dense<0.000000e+00> : vector<200x128xf32>
    %25 = tpu.matmul %22, %24, %cst_16 {dimension_numbers = #tpu.dot_dimension_numbers<[1], [0], [0], [1], [0, 0, 1, 1], [], []>} : vector<200x128xbf16>, vector<128x128xbf16>, vector<200x128xf32> -> vector<200x128xf32>
    %c1 = arith.constant 1 : index
    %c0_17 = arith.constant 0 : index
    %c0_18 = arith.constant 0 : index
    %26 = vector.load %arg3[%c1, %c0_17, %c0_18] : memref<4x1x128xf32, #tpu.memory_space<vmem>>, vector<1x1x128xf32>
    %27 = vector.shape_cast %26 : vector<1x1x128xf32> to vector<1x128xf32>
    %28 = vector.broadcast %27 : vector<1x128xf32> to vector<200x128xf32>
    %29 = arith.addf %25, %28 : vector<200x128xf32>
    %cst_19 = arith.constant 0.000000e+00 : f32
    %30 = vector.broadcast %cst_19 : f32 to vector<200x128xf32>
    %31 = arith.cmpf ogt, %29, %30 : vector<200x128xf32>
    %cst_20 = arith.constant 0.00999999977 : f32
    %32 = vector.broadcast %cst_20 : f32 to vector<200x128xf32>
    %33 = arith.mulf %32, %29 : vector<200x128xf32>
    %34 = arith.select %31, %29, %33 : vector<200x128xi1>, vector<200x128xf32>
    %c1_21 = arith.constant 1 : index
    %c0_22 = arith.constant 0 : index
    %c0_23 = arith.constant 0 : index
    %35 = vector.load %arg4[%c1_21, %c0_22, %c0_23] : memref<4x1x128xf32, #tpu.memory_space<vmem>>, vector<1x1x128xf32>
    %36 = vector.shape_cast %35 : vector<1x1x128xf32> to vector<1x128xf32>
    %37 = vector.broadcast %36 : vector<1x128xf32> to vector<200x128xf32>
    %38 = arith.mulf %34, %37 : vector<200x128xf32>
    %c1_24 = arith.constant 1 : index
    %c0_25 = arith.constant 0 : index
    %c0_26 = arith.constant 0 : index
    %39 = vector.load %arg5[%c1_24, %c0_25, %c0_26] : memref<4x1x128xf32, #tpu.memory_space<vmem>>, vector<1x1x128xf32>
    %40 = vector.shape_cast %39 : vector<1x1x128xf32> to vector<1x128xf32>
    %41 = vector.broadcast %40 : vector<1x128xf32> to vector<200x128xf32>
    %42 = arith.addf %38, %41 : vector<200x128xf32>
    %43 = arith.truncf %42 : vector<200x128xf32> to vector<200x128xbf16>
    %c1_27 = arith.constant 1 : index
    %c0_28 = arith.constant 0 : index
    %c0_29 = arith.constant 0 : index
    %44 = vector.load %arg2[%c1_27, %c0_28, %c0_29] : memref<3x128x128xbf16, #tpu.memory_space<vmem>>, vector<1x128x128xbf16>
    %45 = vector.shape_cast %44 : vector<1x128x128xbf16> to vector<128x128xbf16>
    %cst_30 = arith.constant dense<0.000000e+00> : vector<200x128xf32>
    %46 = tpu.matmul %43, %45, %cst_30 {dimension_numbers = #tpu.dot_dimension_numbers<[1], [0], [0], [1], [0, 0, 1, 1], [], []>} : vector<200x128xbf16>, vector<128x128xbf16>, vector<200x128xf32> -> vector<200x128xf32>
    %c2 = arith.constant 2 : index
    %c0_31 = arith.constant 0 : index
    %c0_32 = arith.constant 0 : index
    %47 = vector.load %arg3[%c2, %c0_31, %c0_32] : memref<4x1x128xf32, #tpu.memory_space<vmem>>, vector<1x1x128xf32>
    %48 = vector.shape_cast %47 : vector<1x1x128xf32> to vector<1x128xf32>
    %49 = vector.broadcast %48 : vector<1x128xf32> to vector<200x128xf32>
    %50 = arith.addf %46, %49 : vector<200x128xf32>
    %cst_33 = arith.constant 0.000000e+00 : f32
    %51 = vector.broadcast %cst_33 : f32 to vector<200x128xf32>
    %52 = arith.cmpf ogt, %50, %51 : vector<200x128xf32>
    %cst_34 = arith.constant 0.00999999977 : f32
    %53 = vector.broadcast %cst_34 : f32 to vector<200x128xf32>
    %54 = arith.mulf %53, %50 : vector<200x128xf32>
    %55 = arith.select %52, %50, %54 : vector<200x128xi1>, vector<200x128xf32>
    %c2_35 = arith.constant 2 : index
    %c0_36 = arith.constant 0 : index
    %c0_37 = arith.constant 0 : index
    %56 = vector.load %arg4[%c2_35, %c0_36, %c0_37] : memref<4x1x128xf32, #tpu.memory_space<vmem>>, vector<1x1x128xf32>
    %57 = vector.shape_cast %56 : vector<1x1x128xf32> to vector<1x128xf32>
    %58 = vector.broadcast %57 : vector<1x128xf32> to vector<200x128xf32>
    %59 = arith.mulf %55, %58 : vector<200x128xf32>
    %c2_38 = arith.constant 2 : index
    %c0_39 = arith.constant 0 : index
    %c0_40 = arith.constant 0 : index
    %60 = vector.load %arg5[%c2_38, %c0_39, %c0_40] : memref<4x1x128xf32, #tpu.memory_space<vmem>>, vector<1x1x128xf32>
    %61 = vector.shape_cast %60 : vector<1x1x128xf32> to vector<1x128xf32>
    %62 = vector.broadcast %61 : vector<1x128xf32> to vector<200x128xf32>
    %63 = arith.addf %59, %62 : vector<200x128xf32>
    %64 = arith.truncf %63 : vector<200x128xf32> to vector<200x128xbf16>
    %c2_41 = arith.constant 2 : index
    %c0_42 = arith.constant 0 : index
    %c0_43 = arith.constant 0 : index
    %65 = vector.load %arg2[%c2_41, %c0_42, %c0_43] : memref<3x128x128xbf16, #tpu.memory_space<vmem>>, vector<1x128x128xbf16>
    %66 = vector.shape_cast %65 : vector<1x128x128xbf16> to vector<128x128xbf16>
    %cst_44 = arith.constant dense<0.000000e+00> : vector<200x128xf32>
    %67 = tpu.matmul %64, %66, %cst_44 {dimension_numbers = #tpu.dot_dimension_numbers<[1], [0], [0], [1], [0, 0, 1, 1], [], []>} : vector<200x128xbf16>, vector<128x128xbf16>, vector<200x128xf32> -> vector<200x128xf32>
    %c3 = arith.constant 3 : index
    %c0_45 = arith.constant 0 : index
    %c0_46 = arith.constant 0 : index
    %68 = vector.load %arg3[%c3, %c0_45, %c0_46] : memref<4x1x128xf32, #tpu.memory_space<vmem>>, vector<1x1x128xf32>
    %69 = vector.shape_cast %68 : vector<1x1x128xf32> to vector<1x128xf32>
    %70 = vector.broadcast %69 : vector<1x128xf32> to vector<200x128xf32>
    %71 = arith.addf %67, %70 : vector<200x128xf32>
    %cst_47 = arith.constant 0.000000e+00 : f32
    %72 = vector.broadcast %cst_47 : f32 to vector<200x128xf32>
    %73 = arith.cmpf ogt, %71, %72 : vector<200x128xf32>
    %cst_48 = arith.constant 0.00999999977 : f32
    %74 = vector.broadcast %cst_48 : f32 to vector<200x128xf32>
    %75 = arith.mulf %74, %71 : vector<200x128xf32>
    %76 = arith.select %73, %71, %75 : vector<200x128xi1>, vector<200x128xf32>
    %c3_49 = arith.constant 3 : index
    %c0_50 = arith.constant 0 : index
    %c0_51 = arith.constant 0 : index
    %77 = vector.load %arg4[%c3_49, %c0_50, %c0_51] : memref<4x1x128xf32, #tpu.memory_space<vmem>>, vector<1x1x128xf32>
    %78 = vector.shape_cast %77 : vector<1x1x128xf32> to vector<1x128xf32>
    %79 = vector.broadcast %78 : vector<1x128xf32> to vector<200x128xf32>
    %80 = arith.mulf %76, %79 : vector<200x128xf32>
    %c3_52 = arith.constant 3 : index
    %c0_53 = arith.constant 0 : index
    %c0_54 = arith.constant 0 : index
    %81 = vector.load %arg5[%c3_52, %c0_53, %c0_54] : memref<4x1x128xf32, #tpu.memory_space<vmem>>, vector<1x1x128xf32>
    %82 = vector.shape_cast %81 : vector<1x1x128xf32> to vector<1x128xf32>
    %83 = vector.broadcast %82 : vector<1x128xf32> to vector<200x128xf32>
    %84 = arith.addf %80, %83 : vector<200x128xf32>
    %c0_55 = arith.constant 0 : index
    %c0_56 = arith.constant 0 : index
    %85 = vector.load %arg12[%c0_55, %c0_56] : memref<200x128xf32, #tpu.memory_space<vmem>>, vector<200x128xf32>
    tpu.vector_store %arg12[%c0_55, %c0_56], %84 {strides = array<i32>} : memref<200x128xf32, #tpu.memory_space<vmem>>, vector<200x128xf32>,
    %cst_57 = arith.constant 0.000000e+00 : f32
    %86 = vector.broadcast %cst_57 : f32 to vector<8x128xf32>
    %c0_58 = arith.constant 0 : index
    %c0_59 = arith.constant 0 : index
    %87 = vector.load %arg12[%c0_58, %c0_59] : memref<200x128xf32, #tpu.memory_space<vmem>>, vector<8x128xf32>
    %88 = arith.truncf %87 : vector<8x128xf32> to vector<8x128xbf16>
    %c0_60 = arith.constant 0 : index
    %c0_61 = arith.constant 0 : index
    %c0_62 = arith.constant 0 : index
    %89 = vector.load %arg6[%c0_60, %c0_61, %c0_62] : memref<25x128x128xbf16, #tpu.memory_space<vmem>>, vector<1x128x128xbf16>
    %90 = vector.shape_cast %89 : vector<1x128x128xbf16> to vector<128x128xbf16>
    %cst_63 = arith.constant dense<0.000000e+00> : vector<8x128xf32>
    %91 = tpu.matmul %88, %90, %cst_63 {dimension_numbers = #tpu.dot_dimension_numbers<[1], [0], [0], [1], [0, 0, 1, 1], [], []>} : vector<8x128xbf16>, vector<128x128xbf16>, vector<8x128xf32> -> vector<8x128xf32>
    %92 = arith.addf %86, %91 : vector<8x128xf32>
    %c8 = arith.constant 8 : index
    %c0_64 = arith.constant 0 : index
    %93 = vector.load %arg12[%c8, %c0_64] : memref<200x128xf32, #tpu.memory_space<vmem>>, vector<8x128xf32>
    %94 = arith.truncf %93 : vector<8x128xf32> to vector<8x128xbf16>
    %c1_65 = arith.constant 1 : index
    %c0_66 = arith.constant 0 : index
    %c0_67 = arith.constant 0 : index
    %95 = vector.load %arg6[%c1_65, %c0_66, %c0_67] : memref<25x128x128xbf16, #tpu.memory_space<vmem>>, vector<1x128x128xbf16>
    %96 = vector.shape_cast %95 : vector<1x128x128xbf16> to vector<128x128xbf16>
    %cst_68 = arith.constant dense<0.000000e+00> : vector<8x128xf32>
    %97 = tpu.matmul %94, %96, %cst_68 {dimension_numbers = #tpu.dot_dimension_numbers<[1], [0], [0], [1], [0, 0, 1, 1], [], []>} : vector<8x128xbf16>, vector<128x128xbf16>, vector<8x128xf32> -> vector<8x128xf32>
    %98 = arith.addf %92, %97 : vector<8x128xf32>
    %c16 = arith.constant 16 : index
    %c0_69 = arith.constant 0 : index
    %99 = vector.load %arg12[%c16, %c0_69] : memref<200x128xf32, #tpu.memory_space<vmem>>, vector<8x128xf32>
    %100 = arith.truncf %99 : vector<8x128xf32> to vector<8x128xbf16>
    %c2_70 = arith.constant 2 : index
    %c0_71 = arith.constant 0 : index
    %c0_72 = arith.constant 0 : index
    %101 = vector.load %arg6[%c2_70, %c0_71, %c0_72] : memref<25x128x128xbf16, #tpu.memory_space<vmem>>, vector<1x128x128xbf16>
    %102 = vector.shape_cast %101 : vector<1x128x128xbf16> to vector<128x128xbf16>
    %cst_73 = arith.constant dense<0.000000e+00> : vector<8x128xf32>
    %103 = tpu.matmul %100, %102, %cst_73 {dimension_numbers = #tpu.dot_dimension_numbers<[1], [0], [0], [1], [0, 0, 1, 1], [], []>} : vector<8x128xbf16>, vector<128x128xbf16>, vector<8x128xf32> -> vector<8x128xf32>
    %104 = arith.addf %98, %103 : vector<8x128xf32>
    %c24 = arith.constant 24 : index
    %c0_74 = arith.constant 0 : index
    %105 = vector.load %arg12[%c24, %c0_74] : memref<200x128xf32, #tpu.memory_space<vmem>>, vector<8x128xf32>
    %106 = arith.truncf %105 : vector<8x128xf32> to vector<8x128xbf16>
    %c3_75 = arith.constant 3 : index
    %c0_76 = arith.constant 0 : index
    %c0_77 = arith.constant 0 : index
    %107 = vector.load %arg6[%c3_75, %c0_76, %c0_77] : memref<25x128x128xbf16, #tpu.memory_space<vmem>>, vector<1x128x128xbf16>
    %108 = vector.shape_cast %107 : vector<1x128x128xbf16> to vector<128x128xbf16>
    %cst_78 = arith.constant dense<0.000000e+00> : vector<8x128xf32>
    %109 = tpu.matmul %106, %108, %cst_78 {dimension_numbers = #tpu.dot_dimension_numbers<[1], [0], [0], [1], [0, 0, 1, 1], [], []>} : vector<8x128xbf16>, vector<128x128xbf16>, vector<8x128xf32> -> vector<8x128xf32>
    %110 = arith.addf %104, %109 : vector<8x128xf32>
    %c32 = arith.constant 32 : index
    %c0_79 = arith.constant 0 : index
    %111 = vector.load %arg12[%c32, %c0_79] : memref<200x128xf32, #tpu.memory_space<vmem>>, vector<8x128xf32>
    %112 = arith.truncf %111 : vector<8x128xf32> to vector<8x128xbf16>
    %c4 = arith.constant 4 : index
    %c0_80 = arith.constant 0 : index
    %c0_81 = arith.constant 0 : index
    %113 = vector.load %arg6[%c4, %c0_80, %c0_81] : memref<25x128x128xbf16, #tpu.memory_space<vmem>>, vector<1x128x128xbf16>
    %114 = vector.shape_cast %113 : vector<1x128x128xbf16> to vector<128x128xbf16>
    %cst_82 = arith.constant dense<0.000000e+00> : vector<8x128xf32>
    %115 = tpu.matmul %112, %114, %cst_82 {dimension_numbers = #tpu.dot_dimension_numbers<[1], [0], [0], [1], [0, 0, 1, 1], [], []>} : vector<8x128xbf16>, vector<128x128xbf16>, vector<8x128xf32> -> vector<8x128xf32>
    %116 = arith.addf %110, %115 : vector<8x128xf32>
    %c40 = arith.constant 40 : index
    %c0_83 = arith.constant 0 : index
    %117 = vector.load %arg12[%c40, %c0_83] : memref<200x128xf32, #tpu.memory_space<vmem>>, vector<8x128xf32>
    %118 = arith.truncf %117 : vector<8x128xf32> to vector<8x128xbf16>
    %c5 = arith.constant 5 : index
    %c0_84 = arith.constant 0 : index
    %c0_85 = arith.constant 0 : index
    %119 = vector.load %arg6[%c5, %c0_84, %c0_85] : memref<25x128x128xbf16, #tpu.memory_space<vmem>>, vector<1x128x128xbf16>
    %120 = vector.shape_cast %119 : vector<1x128x128xbf16> to vector<128x128xbf16>
    %cst_86 = arith.constant dense<0.000000e+00> : vector<8x128xf32>
    %121 = tpu.matmul %118, %120, %cst_86 {dimension_numbers = #tpu.dot_dimension_numbers<[1], [0], [0], [1], [0, 0, 1, 1], [], []>} : vector<8x128xbf16>, vector<128x128xbf16>, vector<8x128xf32> -> vector<8x128xf32>
    %122 = arith.addf %116, %121 : vector<8x128xf32>
    %c48 = arith.constant 48 : index
    %c0_87 = arith.constant 0 : index
    %123 = vector.load %arg12[%c48, %c0_87] : memref<200x128xf32, #tpu.memory_space<vmem>>, vector<8x128xf32>
    %124 = arith.truncf %123 : vector<8x128xf32> to vector<8x128xbf16>
    %c6 = arith.constant 6 : index
    %c0_88 = arith.constant 0 : index
    %c0_89 = arith.constant 0 : index
    %125 = vector.load %arg6[%c6, %c0_88, %c0_89] : memref<25x128x128xbf16, #tpu.memory_space<vmem>>, vector<1x128x128xbf16>
    %126 = vector.shape_cast %125 : vector<1x128x128xbf16> to vector<128x128xbf16>
    %cst_90 = arith.constant dense<0.000000e+00> : vector<8x128xf32>
    %127 = tpu.matmul %124, %126, %cst_90 {dimension_numbers = #tpu.dot_dimension_numbers<[1], [0], [0], [1], [0, 0, 1, 1], [], []>} : vector<8x128xbf16>, vector<128x128xbf16>, vector<8x128xf32> -> vector<8x128xf32>
    %128 = arith.addf %122, %127 : vector<8x128xf32>
    %c56 = arith.constant 56 : index
    %c0_91 = arith.constant 0 : index
    %129 = vector.load %arg12[%c56, %c0_91] : memref<200x128xf32, #tpu.memory_space<vmem>>, vector<8x128xf32>
    %130 = arith.truncf %129 : vector<8x128xf32> to vector<8x128xbf16>
    %c7 = arith.constant 7 : index
    %c0_92 = arith.constant 0 : index
    %c0_93 = arith.constant 0 : index
    %131 = vector.load %arg6[%c7, %c0_92, %c0_93] : memref<25x128x128xbf16, #tpu.memory_space<vmem>>, vector<1x128x128xbf16>
    %132 = vector.shape_cast %131 : vector<1x128x128xbf16> to vector<128x128xbf16>
    %cst_94 = arith.constant dense<0.000000e+00> : vector<8x128xf32>
    %133 = tpu.matmul %130, %132, %cst_94 {dimension_numbers = #tpu.dot_dimension_numbers<[1], [0], [0], [1], [0, 0, 1, 1], [], []>} : vector<8x128xbf16>, vector<128x128xbf16>, vector<8x128xf32> -> vector<8x128xf32>
    %134 = arith.addf %128, %133 : vector<8x128xf32>
    %c64 = arith.constant 64 : index
    %c0_95 = arith.constant 0 : index
    %135 = vector.load %arg12[%c64, %c0_95] : memref<200x128xf32, #tpu.memory_space<vmem>>, vector<8x128xf32>
    %136 = arith.truncf %135 : vector<8x128xf32> to vector<8x128xbf16>
    %c8_96 = arith.constant 8 : index
    %c0_97 = arith.constant 0 : index
    %c0_98 = arith.constant 0 : index
    %137 = vector.load %arg6[%c8_96, %c0_97, %c0_98] : memref<25x128x128xbf16, #tpu.memory_space<vmem>>, vector<1x128x128xbf16>
    %138 = vector.shape_cast %137 : vector<1x128x128xbf16> to vector<128x128xbf16>
    %cst_99 = arith.constant dense<0.000000e+00> : vector<8x128xf32>
    %139 = tpu.matmul %136, %138, %cst_99 {dimension_numbers = #tpu.dot_dimension_numbers<[1], [0], [0], [1], [0, 0, 1, 1], [], []>} : vector<8x128xbf16>, vector<128x128xbf16>, vector<8x128xf32> -> vector<8x128xf32>
    %140 = arith.addf %134, %139 : vector<8x128xf32>
    %c72 = arith.constant 72 : index
    %c0_100 = arith.constant 0 : index
    %141 = vector.load %arg12[%c72, %c0_100] : memref<200x128xf32, #tpu.memory_space<vmem>>, vector<8x128xf32>
    %142 = arith.truncf %141 : vector<8x128xf32> to vector<8x128xbf16>
    %c9 = arith.constant 9 : index
    %c0_101 = arith.constant 0 : index
    %c0_102 = arith.constant 0 : index
    %143 = vector.load %arg6[%c9, %c0_101, %c0_102] : memref<25x128x128xbf16, #tpu.memory_space<vmem>>, vector<1x128x128xbf16>
    %144 = vector.shape_cast %143 : vector<1x128x128xbf16> to vector<128x128xbf16>
    %cst_103 = arith.constant dense<0.000000e+00> : vector<8x128xf32>
    %145 = tpu.matmul %142, %144, %cst_103 {dimension_numbers = #tpu.dot_dimension_numbers<[1], [0], [0], [1], [0, 0, 1, 1], [], []>} : vector<8x128xbf16>, vector<128x128xbf16>, vector<8x128xf32> -> vector<8x128xf32>
    %146 = arith.addf %140, %145 : vector<8x128xf32>
    %c80 = arith.constant 80 : index
    %c0_104 = arith.constant 0 : index
    %147 = vector.load %arg12[%c80, %c0_104] : memref<200x128xf32, #tpu.memory_space<vmem>>, vector<8x128xf32>
    %148 = arith.truncf %147 : vector<8x128xf32> to vector<8x128xbf16>
    %c10 = arith.constant 10 : index
    %c0_105 = arith.constant 0 : index
    %c0_106 = arith.constant 0 : index
    %149 = vector.load %arg6[%c10, %c0_105, %c0_106] : memref<25x128x128xbf16, #tpu.memory_space<vmem>>, vector<1x128x128xbf16>
    %150 = vector.shape_cast %149 : vector<1x128x128xbf16> to vector<128x128xbf16>
    %cst_107 = arith.constant dense<0.000000e+00> : vector<8x128xf32>
    %151 = tpu.matmul %148, %150, %cst_107 {dimension_numbers = #tpu.dot_dimension_numbers<[1], [0], [0], [1], [0, 0, 1, 1], [], []>} : vector<8x128xbf16>, vector<128x128xbf16>, vector<8x128xf32> -> vector<8x128xf32>
    %152 = arith.addf %146, %151 : vector<8x128xf32>
    %c88 = arith.constant 88 : index
    %c0_108 = arith.constant 0 : index
    %153 = vector.load %arg12[%c88, %c0_108] : memref<200x128xf32, #tpu.memory_space<vmem>>, vector<8x128xf32>
    %154 = arith.truncf %153 : vector<8x128xf32> to vector<8x128xbf16>
    %c11 = arith.constant 11 : index
    %c0_109 = arith.constant 0 : index
    %c0_110 = arith.constant 0 : index
    %155 = vector.load %arg6[%c11, %c0_109, %c0_110] : memref<25x128x128xbf16, #tpu.memory_space<vmem>>, vector<1x128x128xbf16>
    %156 = vector.shape_cast %155 : vector<1x128x128xbf16> to vector<128x128xbf16>
    %cst_111 = arith.constant dense<0.000000e+00> : vector<8x128xf32>
    %157 = tpu.matmul %154, %156, %cst_111 {dimension_numbers = #tpu.dot_dimension_numbers<[1], [0], [0], [1], [0, 0, 1, 1], [], []>} : vector<8x128xbf16>, vector<128x128xbf16>, vector<8x128xf32> -> vector<8x128xf32>
    %158 = arith.addf %152, %157 : vector<8x128xf32>
    %c96 = arith.constant 96 : index
    %c0_112 = arith.constant 0 : index
    %159 = vector.load %arg12[%c96, %c0_112] : memref<200x128xf32, #tpu.memory_space<vmem>>, vector<8x128xf32>
    %160 = arith.truncf %159 : vector<8x128xf32> to vector<8x128xbf16>
    %c12 = arith.constant 12 : index
    %c0_113 = arith.constant 0 : index
    %c0_114 = arith.constant 0 : index
    %161 = vector.load %arg6[%c12, %c0_113, %c0_114] : memref<25x128x128xbf16, #tpu.memory_space<vmem>>, vector<1x128x128xbf16>
    %162 = vector.shape_cast %161 : vector<1x128x128xbf16> to vector<128x128xbf16>
    %cst_115 = arith.constant dense<0.000000e+00> : vector<8x128xf32>
    %163 = tpu.matmul %160, %162, %cst_115 {dimension_numbers = #tpu.dot_dimension_numbers<[1], [0], [0], [1], [0, 0, 1, 1], [], []>} : vector<8x128xbf16>, vector<128x128xbf16>, vector<8x128xf32> -> vector<8x128xf32>
    %164 = arith.addf %158, %163 : vector<8x128xf32>
    %c104 = arith.constant 104 : index
    %c0_116 = arith.constant 0 : index
    %165 = vector.load %arg12[%c104, %c0_116] : memref<200x128xf32, #tpu.memory_space<vmem>>, vector<8x128xf32>
    %166 = arith.truncf %165 : vector<8x128xf32> to vector<8x128xbf16>
    %c13 = arith.constant 13 : index
    %c0_117 = arith.constant 0 : index
    %c0_118 = arith.constant 0 : index
    %167 = vector.load %arg6[%c13, %c0_117, %c0_118] : memref<25x128x128xbf16, #tpu.memory_space<vmem>>, vector<1x128x128xbf16>
    %168 = vector.shape_cast %167 : vector<1x128x128xbf16> to vector<128x128xbf16>
    %cst_119 = arith.constant dense<0.000000e+00> : vector<8x128xf32>
    %169 = tpu.matmul %166, %168, %cst_119 {dimension_numbers = #tpu.dot_dimension_numbers<[1], [0], [0], [1], [0, 0, 1, 1], [], []>} : vector<8x128xbf16>, vector<128x128xbf16>, vector<8x128xf32> -> vector<8x128xf32>
    %170 = arith.addf %164, %169 : vector<8x128xf32>
    %c112 = arith.constant 112 : index
    %c0_120 = arith.constant 0 : index
    %171 = vector.load %arg12[%c112, %c0_120] : memref<200x128xf32, #tpu.memory_space<vmem>>, vector<8x128xf32>
    %172 = arith.truncf %171 : vector<8x128xf32> to vector<8x128xbf16>
    %c14 = arith.constant 14 : index
    %c0_121 = arith.constant 0 : index
    %c0_122 = arith.constant 0 : index
    %173 = vector.load %arg6[%c14, %c0_121, %c0_122] : memref<25x128x128xbf16, #tpu.memory_space<vmem>>, vector<1x128x128xbf16>
    %174 = vector.shape_cast %173 : vector<1x128x128xbf16> to vector<128x128xbf16>
    %cst_123 = arith.constant dense<0.000000e+00> : vector<8x128xf32>
    %175 = tpu.matmul %172, %174, %cst_123 {dimension_numbers = #tpu.dot_dimension_numbers<[1], [0], [0], [1], [0, 0, 1, 1], [], []>} : vector<8x128xbf16>, vector<128x128xbf16>, vector<8x128xf32> -> vector<8x128xf32>
    %176 = arith.addf %170, %175 : vector<8x128xf32>
    %c120 = arith.constant 120 : index
    %c0_124 = arith.constant 0 : index
    %177 = vector.load %arg12[%c120, %c0_124] : memref<200x128xf32, #tpu.memory_space<vmem>>, vector<8x128xf32>
    %178 = arith.truncf %177 : vector<8x128xf32> to vector<8x128xbf16>
    %c15 = arith.constant 15 : index
    %c0_125 = arith.constant 0 : index
    %c0_126 = arith.constant 0 : index
    %179 = vector.load %arg6[%c15, %c0_125, %c0_126] : memref<25x128x128xbf16, #tpu.memory_space<vmem>>, vector<1x128x128xbf16>
    %180 = vector.shape_cast %179 : vector<1x128x128xbf16> to vector<128x128xbf16>
    %cst_127 = arith.constant dense<0.000000e+00> : vector<8x128xf32>
    %181 = tpu.matmul %178, %180, %cst_127 {dimension_numbers = #tpu.dot_dimension_numbers<[1], [0], [0], [1], [0, 0, 1, 1], [], []>} : vector<8x128xbf16>, vector<128x128xbf16>, vector<8x128xf32> -> vector<8x128xf32>
    %182 = arith.addf %176, %181 : vector<8x128xf32>
    %c128 = arith.constant 128 : index
    %c0_128 = arith.constant 0 : index
    %183 = vector.load %arg12[%c128, %c0_128] : memref<200x128xf32, #tpu.memory_space<vmem>>, vector<8x128xf32>
    %184 = arith.truncf %183 : vector<8x128xf32> to vector<8x128xbf16>
    %c16_129 = arith.constant 16 : index
    %c0_130 = arith.constant 0 : index
    %c0_131 = arith.constant 0 : index
    %185 = vector.load %arg6[%c16_129, %c0_130, %c0_131] : memref<25x128x128xbf16, #tpu.memory_space<vmem>>, vector<1x128x128xbf16>
    %186 = vector.shape_cast %185 : vector<1x128x128xbf16> to vector<128x128xbf16>
    %cst_132 = arith.constant dense<0.000000e+00> : vector<8x128xf32>
    %187 = tpu.matmul %184, %186, %cst_132 {dimension_numbers = #tpu.dot_dimension_numbers<[1], [0], [0], [1], [0, 0, 1, 1], [], []>} : vector<8x128xbf16>, vector<128x128xbf16>, vector<8x128xf32> -> vector<8x128xf32>
    %188 = arith.addf %182, %187 : vector<8x128xf32>
    %c136 = arith.constant 136 : index
    %c0_133 = arith.constant 0 : index
    %189 = vector.load %arg12[%c136, %c0_133] : memref<200x128xf32, #tpu.memory_space<vmem>>, vector<8x128xf32>
    %190 = arith.truncf %189 : vector<8x128xf32> to vector<8x128xbf16>
    %c17 = arith.constant 17 : index
    %c0_134 = arith.constant 0 : index
    %c0_135 = arith.constant 0 : index
    %191 = vector.load %arg6[%c17, %c0_134, %c0_135] : memref<25x128x128xbf16, #tpu.memory_space<vmem>>, vector<1x128x128xbf16>
    %192 = vector.shape_cast %191 : vector<1x128x128xbf16> to vector<128x128xbf16>
    %cst_136 = arith.constant dense<0.000000e+00> : vector<8x128xf32>
    %193 = tpu.matmul %190, %192, %cst_136 {dimension_numbers = #tpu.dot_dimension_numbers<[1], [0], [0], [1], [0, 0, 1, 1], [], []>} : vector<8x128xbf16>, vector<128x128xbf16>, vector<8x128xf32> -> vector<8x128xf32>
    %194 = arith.addf %188, %193 : vector<8x128xf32>
    %c144 = arith.constant 144 : index
    %c0_137 = arith.constant 0 : index
    %195 = vector.load %arg12[%c144, %c0_137] : memref<200x128xf32, #tpu.memory_space<vmem>>, vector<8x128xf32>
    %196 = arith.truncf %195 : vector<8x128xf32> to vector<8x128xbf16>
    %c18 = arith.constant 18 : index
    %c0_138 = arith.constant 0 : index
    %c0_139 = arith.constant 0 : index
    %197 = vector.load %arg6[%c18, %c0_138, %c0_139] : memref<25x128x128xbf16, #tpu.memory_space<vmem>>, vector<1x128x128xbf16>
    %198 = vector.shape_cast %197 : vector<1x128x128xbf16> to vector<128x128xbf16>
    %cst_140 = arith.constant dense<0.000000e+00> : vector<8x128xf32>
    %199 = tpu.matmul %196, %198, %cst_140 {dimension_numbers = #tpu.dot_dimension_numbers<[1], [0], [0], [1], [0, 0, 1, 1], [], []>} : vector<8x128xbf16>, vector<128x128xbf16>, vector<8x128xf32> -> vector<8x128xf32>
    %200 = arith.addf %194, %199 : vector<8x128xf32>
    %c152 = arith.constant 152 : index
    %c0_141 = arith.constant 0 : index
    %201 = vector.load %arg12[%c152, %c0_141] : memref<200x128xf32, #tpu.memory_space<vmem>>, vector<8x128xf32>
    %202 = arith.truncf %201 : vector<8x128xf32> to vector<8x128xbf16>
    %c19 = arith.constant 19 : index
    %c0_142 = arith.constant 0 : index
    %c0_143 = arith.constant 0 : index
    %203 = vector.load %arg6[%c19, %c0_142, %c0_143] : memref<25x128x128xbf16, #tpu.memory_space<vmem>>, vector<1x128x128xbf16>
    %204 = vector.shape_cast %203 : vector<1x128x128xbf16> to vector<128x128xbf16>
    %cst_144 = arith.constant dense<0.000000e+00> : vector<8x128xf32>
    %205 = tpu.matmul %202, %204, %cst_144 {dimension_numbers = #tpu.dot_dimension_numbers<[1], [0], [0], [1], [0, 0, 1, 1], [], []>} : vector<8x128xbf16>, vector<128x128xbf16>, vector<8x128xf32> -> vector<8x128xf32>
    %206 = arith.addf %200, %205 : vector<8x128xf32>
    %c160 = arith.constant 160 : index
    %c0_145 = arith.constant 0 : index
    %207 = vector.load %arg12[%c160, %c0_145] : memref<200x128xf32, #tpu.memory_space<vmem>>, vector<8x128xf32>
    %208 = arith.truncf %207 : vector<8x128xf32> to vector<8x128xbf16>
    %c20 = arith.constant 20 : index
    %c0_146 = arith.constant 0 : index
    %c0_147 = arith.constant 0 : index
    %209 = vector.load %arg6[%c20, %c0_146, %c0_147] : memref<25x128x128xbf16, #tpu.memory_space<vmem>>, vector<1x128x128xbf16>
    %210 = vector.shape_cast %209 : vector<1x128x128xbf16> to vector<128x128xbf16>
    %cst_148 = arith.constant dense<0.000000e+00> : vector<8x128xf32>
    %211 = tpu.matmul %208, %210, %cst_148 {dimension_numbers = #tpu.dot_dimension_numbers<[1], [0], [0], [1], [0, 0, 1, 1], [], []>} : vector<8x128xbf16>, vector<128x128xbf16>, vector<8x128xf32> -> vector<8x128xf32>
    %212 = arith.addf %206, %211 : vector<8x128xf32>
    %c168 = arith.constant 168 : index
    %c0_149 = arith.constant 0 : index
    %213 = vector.load %arg12[%c168, %c0_149] : memref<200x128xf32, #tpu.memory_space<vmem>>, vector<8x128xf32>
    %214 = arith.truncf %213 : vector<8x128xf32> to vector<8x128xbf16>
    %c21 = arith.constant 21 : index
    %c0_150 = arith.constant 0 : index
    %c0_151 = arith.constant 0 : index
    %215 = vector.load %arg6[%c21, %c0_150, %c0_151] : memref<25x128x128xbf16, #tpu.memory_space<vmem>>, vector<1x128x128xbf16>
    %216 = vector.shape_cast %215 : vector<1x128x128xbf16> to vector<128x128xbf16>
    %cst_152 = arith.constant dense<0.000000e+00> : vector<8x128xf32>
    %217 = tpu.matmul %214, %216, %cst_152 {dimension_numbers = #tpu.dot_dimension_numbers<[1], [0], [0], [1], [0, 0, 1, 1], [], []>} : vector<8x128xbf16>, vector<128x128xbf16>, vector<8x128xf32> -> vector<8x128xf32>
    %218 = arith.addf %212, %217 : vector<8x128xf32>
    %c176 = arith.constant 176 : index
    %c0_153 = arith.constant 0 : index
    %219 = vector.load %arg12[%c176, %c0_153] : memref<200x128xf32, #tpu.memory_space<vmem>>, vector<8x128xf32>
    %220 = arith.truncf %219 : vector<8x128xf32> to vector<8x128xbf16>
    %c22 = arith.constant 22 : index
    %c0_154 = arith.constant 0 : index
    %c0_155 = arith.constant 0 : index
    %221 = vector.load %arg6[%c22, %c0_154, %c0_155] : memref<25x128x128xbf16, #tpu.memory_space<vmem>>, vector<1x128x128xbf16>
    %222 = vector.shape_cast %221 : vector<1x128x128xbf16> to vector<128x128xbf16>
    %cst_156 = arith.constant dense<0.000000e+00> : vector<8x128xf32>
    %223 = tpu.matmul %220, %222, %cst_156 {dimension_numbers = #tpu.dot_dimension_numbers<[1], [0], [0], [1], [0, 0, 1, 1], [], []>} : vector<8x128xbf16>, vector<128x128xbf16>, vector<8x128xf32> -> vector<8x128xf32>
    %224 = arith.addf %218, %223 : vector<8x128xf32>
    %c184 = arith.constant 184 : index
    %c0_157 = arith.constant 0 : index
    %225 = vector.load %arg12[%c184, %c0_157] : memref<200x128xf32, #tpu.memory_space<vmem>>, vector<8x128xf32>
    %226 = arith.truncf %225 : vector<8x128xf32> to vector<8x128xbf16>
    %c23 = arith.constant 23 : index
    %c0_158 = arith.constant 0 : index
    %c0_159 = arith.constant 0 : index
    %227 = vector.load %arg6[%c23, %c0_158, %c0_159] : memref<25x128x128xbf16, #tpu.memory_space<vmem>>, vector<1x128x128xbf16>
    %228 = vector.shape_cast %227 : vector<1x128x128xbf16> to vector<128x128xbf16>
    %cst_160 = arith.constant dense<0.000000e+00> : vector<8x128xf32>
    %229 = tpu.matmul %226, %228, %cst_160 {dimension_numbers = #tpu.dot_dimension_numbers<[1], [0], [0], [1], [0, 0, 1, 1], [], []>} : vector<8x128xbf16>, vector<128x128xbf16>, vector<8x128xf32> -> vector<8x128xf32>
    %230 = arith.addf %224, %229 : vector<8x128xf32>
    %c192 = arith.constant 192 : index
    %c0_161 = arith.constant 0 : index
    %231 = vector.load %arg12[%c192, %c0_161] : memref<200x128xf32, #tpu.memory_space<vmem>>, vector<8x128xf32>
    %232 = arith.truncf %231 : vector<8x128xf32> to vector<8x128xbf16>
    %c24_162 = arith.constant 24 : index
    %c0_163 = arith.constant 0 : index
    %c0_164 = arith.constant 0 : index
    %233 = vector.load %arg6[%c24_162, %c0_163, %c0_164] : memref<25x128x128xbf16, #tpu.memory_space<vmem>>, vector<1x128x128xbf16>
    %234 = vector.shape_cast %233 : vector<1x128x128xbf16> to vector<128x128xbf16>
    %cst_165 = arith.constant dense<0.000000e+00> : vector<8x128xf32>
    %235 = tpu.matmul %232, %234, %cst_165 {dimension_numbers = #tpu.dot_dimension_numbers<[1], [0], [0], [1], [0, 0, 1, 1], [], []>} : vector<8x128xbf16>, vector<128x128xbf16>, vector<8x128xf32> -> vector<8x128xf32>
    %236 = arith.addf %230, %235 : vector<8x128xf32>
    %c0_166 = arith.constant 0 : index
    %c0_167 = arith.constant 0 : index
    %c0_168 = arith.constant 0 : index
    %237 = vector.load %arg8[%c0_166, %c0_167, %c0_168] : memref<2x1x128xf32, #tpu.memory_space<vmem>>, vector<1x1x128xf32>
    %238 = vector.shape_cast %237 : vector<1x1x128xf32> to vector<1x128xf32>
    %239 = vector.broadcast %238 : vector<1x128xf32> to vector<8x128xf32>
    %240 = arith.addf %236, %239 : vector<8x128xf32>
    %cst_169 = arith.constant 0.000000e+00 : f32
    %241 = vector.broadcast %cst_169 : f32 to vector<8x128xf32>
    %242 = arith.cmpf ogt, %240, %241 : vector<8x128xf32>
    %cst_170 = arith.constant 0.00999999977 : f32
    %243 = vector.broadcast %cst_170 : f32 to vector<8x128xf32>
    %244 = arith.mulf %243, %240 : vector<8x128xf32>
    %245 = arith.select %242, %240, %244 : vector<8x128xi1>, vector<8x128xf32>
    %c0_171 = arith.constant 0 : index
    %c0_172 = arith.constant 0 : index
    %c0_173 = arith.constant 0 : index
    %246 = vector.load %arg9[%c0_171, %c0_172, %c0_173] : memref<2x1x128xf32, #tpu.memory_space<vmem>>, vector<1x1x128xf32>
    %247 = vector.shape_cast %246 : vector<1x1x128xf32> to vector<1x128xf32>
    %248 = vector.broadcast %247 : vector<1x128xf32> to vector<8x128xf32>
    %249 = arith.mulf %245, %248 : vector<8x128xf32>
    %c0_174 = arith.constant 0 : index
    %c0_175 = arith.constant 0 : index
    %c0_176 = arith.constant 0 : index
    %250 = vector.load %arg10[%c0_174, %c0_175, %c0_176] : memref<2x1x128xf32, #tpu.memory_space<vmem>>, vector<1x1x128xf32>
    %251 = vector.shape_cast %250 : vector<1x1x128xf32> to vector<1x128xf32>
    %252 = vector.broadcast %251 : vector<1x128xf32> to vector<8x128xf32>
    %253 = arith.addf %249, %252 : vector<8x128xf32>
    %254 = arith.truncf %253 : vector<8x128xf32> to vector<8x128xbf16>
    %c0_177 = arith.constant 0 : index
    %c0_178 = arith.constant 0 : index
    %255 = vector.load %arg7[%c0_177, %c0_178] : memref<128x128xbf16, #tpu.memory_space<vmem>>, vector<128x128xbf16>
    %cst_179 = arith.constant dense<0.000000e+00> : vector<8x128xf32>
    %256 = tpu.matmul %254, %255, %cst_179 {dimension_numbers = #tpu.dot_dimension_numbers<[1], [0], [0], [1], [0, 0, 1, 1], [], []>} : vector<8x128xbf16>, vector<128x128xbf16>, vector<8x128xf32> -> vector<8x128xf32>
    %c1_180 = arith.constant 1 : index
    %c0_181 = arith.constant 0 : index
    %c0_182 = arith.constant 0 : index
    %257 = vector.load %arg8[%c1_180, %c0_181, %c0_182] : memref<2x1x128xf32, #tpu.memory_space<vmem>>, vector<1x1x128xf32>
    %258 = vector.shape_cast %257 : vector<1x1x128xf32> to vector<1x128xf32>
    %259 = vector.broadcast %258 : vector<1x128xf32> to vector<8x128xf32>
    %260 = arith.addf %256, %259 : vector<8x128xf32>
    %cst_183 = arith.constant 0.000000e+00 : f32
    %261 = vector.broadcast %cst_183 : f32 to vector<8x128xf32>
    %262 = arith.cmpf ogt, %260, %261 : vector<8x128xf32>
    %cst_184 = arith.constant 0.00999999977 : f32
    %263 = vector.broadcast %cst_184 : f32 to vector<8x128xf32>
    %264 = arith.mulf %263, %260 : vector<8x128xf32>
    %265 = arith.select %262, %260, %264 : vector<8x128xi1>, vector<8x128xf32>
    %c1_185 = arith.constant 1 : index
    %c0_186 = arith.constant 0 : index
    %c0_187 = arith.constant 0 : index
    %266 = vector.load %arg9[%c1_185, %c0_186, %c0_187] : memref<2x1x128xf32, #tpu.memory_space<vmem>>, vector<1x1x128xf32>
    %267 = vector.shape_cast %266 : vector<1x1x128xf32> to vector<1x128xf32>
    %268 = vector.broadcast %267 : vector<1x128xf32> to vector<8x128xf32>
    %269 = arith.mulf %265, %268 : vector<8x128xf32>
    %c1_188 = arith.constant 1 : index
    %c0_189 = arith.constant 0 : index
    %c0_190 = arith.constant 0 : index
    %270 = vector.load %arg10[%c1_188, %c0_189, %c0_190] : memref<2x1x128xf32, #tpu.memory_space<vmem>>, vector<1x1x128xf32>
    %271 = vector.shape_cast %270 : vector<1x1x128xf32> to vector<1x128xf32>
    %272 = vector.broadcast %271 : vector<1x128xf32> to vector<8x128xf32>
    %273 = arith.addf %269, %272 : vector<8x128xf32>
    %c0_191 = arith.constant 0 : index
    %c0_192 = arith.constant 0 : index
    %274 = vector.load %arg11[%c0_191, %c0_192] : memref<8x128xf32, #tpu.memory_space<vmem>>, vector<8x128xf32>
    tpu.vector_store %arg11[%c0_191, %c0_192], %273 {strides = array<i32>} : memref<8x128xf32, #tpu.memory_space<vmem>>, vector<8x128xf32>,
    return
  }
}

</mosaic_0001>

<bundles_post_ra>
// kernel: generator_s2m_forward.1
= control target key start
LH: loop header
LB: loop body
LE: loop exit
PB: predicated region body
PF: predicated region fallthrough
CT: control target
= control target key end

     0   :  { %16 = vsyncpa [#allocation4], 0  ;;  %s5964_s17 = smov [#allocation3]   ;;  %s7148_s0 = inlined_call_operand.vmem [shape: f32[200,1], index: 0, kind: input, shape index: {}]   ;;  %s7149_s1 = inlined_call_operand.vmem [shape: f32[1,128], index: 1, kind: input, shape index: {}]   ;;  %s7150_s2 = inlined_call_operand.vmem [shape: bf16[3,128,128], index: 2, kind: input, shape index: {}]   ;;  %s7151_s3 = inlined_call_operand.vmem [shape: f32[4,1,128], index: 3, kind: input, shape index: {}]   ;;  %s7152_s4 = inlined_call_operand.vmem [shape: f32[4,1,128], index: 4, kind: input, shape index: {}]   ;;  %s7153_s5 = inlined_call_operand.vmem [shape: f32[4,1,128], index: 5, kind: input, shape index: {}]   ;;  %s7154_s6 = inlined_call_operand.hbm [shape: bf16[25,128,128], index: 6, kind: input, shape index: {}]   ;;  %s7155_s7 = inlined_call_operand.vmem [shape: bf16[128,128], index: 7, kind: input, shape index: {}]   ;;  %s7156_s8 = inlined_call_operand.vmem [shape: f32[2,1,128], index: 8, kind: input, shape index: {}]   ;;  %s7157_s9 = inlined_call_operand.vmem [shape: f32[2,1,128], index: 9, kind: input, shape index: {}]   ;;  %s7158_s10 = inlined_call_operand.vmem [shape: f32[2,1,128], index: 10, kind: input, shape index: {}]   ;;  %s7159_s11 = inlined_call_operand.vmem [shape: f32[8,128], index: 11, kind: output, shape index: {}]  }
   0x1   :  { %s34_s18 = sshll.u32 %s5964_s17, 4  ;;  %s35_s18 = int_to_ptr.vmem [resolvable:$true] %s34_s18 }
   0x2   :  { %s5950_s19 = scalar_lea.vmem %s35_s18, 25600  ;;  %p5955_p1 = scmp.lt.s32.totalorder %s35_s18, %s35_s18 }
   0x3   :  { %p5951_p0 = scmp.ne.s32.totalorder %s35_s18, %s5950_s19  ;;  %p5956_p2 = scmp.lt.s32.totalorder %s5950_s19, %s5950_s19 }
   0x5   :  { %p5957_p3 = por %p5956_p2, %p5955_p1 }
   0x7   :  { %p5958_p4 = pnand %p5957_p3, %p5951_p0 }
   0x9   :  { %5961 = shalt.err (!%p5958_p4)
}
   0xa   :  { %s5965_s20 = smov 64   ;;  %s5966_s21 = smov 4  }
   0xb   :  { %40 = dma.hbm_to_vmem [thread:$0]  %s7154_s6, 25600, %s35_s18, [#allocation4], %s5965_s20, %s5965_s20, %s5966_s21  }
   0xc   :  { %5962 = dma.done.wait [#allocation4], 25600  }
   0xd   :  { %5963 = vsyncadd [#allocation4], 4294941696  ;;  %v5967_v0 = vmov 0   ;;  %v5968_v1 = vmov 0.0   ;;  %v55_v2 = vld [vmem:[%s7148_s0 + $0x10] sm:$0xff]  ;;  %v53_v3 = vld [vmem:[%s7148_s0] sm:$0xff] }
   0xe   :  { %5706 = vset.pattern.permute.xlu1 %v5967_v0  ;;  %5705 = vset.pattern.permute.xlu0 %v5967_v0  ;;  %v56_v4 = vld [vmem:[%s7148_s0 + $0x18] sm:$0xff]  ;;  %v54_v5 = vld [vmem:[%s7148_s0 + $0x8] sm:$0xff]  ;;  %v57_v7 = vld [vmem:[%s7148_s0 + $0x20] sm:$0xff]  ;;  %vm5969_vm0 = vmmov 0  }
   0xf   :  { %4975 = vmatprep.subr.bf16.mxu0 %v5968_v1  ;;  %5043 = vmatprep.subr.bf16.mxu1 %v5968_v1  ;;  %v58_v6 = vld [vmem:[%s7148_s0 + $0x28] sm:$0xff]  ;;  %v60_v8 = vld [vmem:[%s7148_s0 + $0x38] sm:$0xff]  ;;  %v59_v10 = vld [vmem:[%s7148_s0 + $0x30] sm:$0xff] }
  0x10   :  { %91 = vperm.xlu1 %5706, %v55_v2   ;;  %81 = vperm.xlu0 %5705, %v53_v3   ;;  %v5707_v9 = vld [vmem:[%s7150_s2 + $0x38] sm:$0xff]   ;;  %v5708_v11 = vld [vmem:[%s7150_s2 + $0x30] sm:$0xff]   ;;  %v62_v12 = vld [vmem:[%s7148_s0 + $0x48] sm:$0xff] }
  0x11   :  { %4976 = vmatpush3.bf16.msra.mxu0 %v5707_v9  ;;  %v61_v13 = vld [vmem:[%s7148_s0 + $0x40] sm:$0xff]  ;;  %4991 = vmatprep.mubr.msk.bf16.mxu0 %vm5969_vm0, %v5968_v1  ;;  %v5709_v14 = vld [vmem:[%s7150_s2 + $0x28] sm:$0xff]   ;;  %v64_v15 = vld [vmem:[%s7148_s0 + $0x58] sm:$0xff] }
  0x12   :  { %4977 = vmatprep.subr.bf16.mxu0 %v5968_v1  ;;  %5059 = vmatprep.mubr.msk.bf16.mxu1 %vm5969_vm0, %v5968_v1  ;;  %v63_v16 = vld [vmem:[%s7148_s0 + $0x50] sm:$0xff]  ;;  %v5710_v17 = vld [vmem:[%s7150_s2 + $0x20] sm:$0xff]   ;;  %v66_v18 = vld [vmem:[%s7148_s0 + $0x68] sm:$0xff] }
  0x13   :  { %v65_v19 = vld [vmem:[%s7148_s0 + $0x60] sm:$0xff]  ;;  %v5711_v20 = vld [vmem:[%s7150_s2 + $0x18] sm:$0xff]   ;;  %v67_v22 = vld [vmem:[%s7148_s0 + $0x70] sm:$0xff] }
  0x14   :  { %96 = vperm.xlu1 %5706, %v56_v4   ;;  %86 = vperm.xlu0 %5705, %v54_v5   ;;  %v68_v21 = vld [vmem:[%s7148_s0 + $0x78] sm:$0xff]  ;;  %v5712_v23 = vld [vmem:[%s7150_s2 + $0x10] sm:$0xff]   ;;  %v70_v24 = vld [vmem:[%s7148_s0 + $0x88] sm:$0xff] }
  0x15   :  { %4978 = vmatpush3.bf16.msra.mxu0 %v5708_v11  ;;  %v69_v25 = vld [vmem:[%s7148_s0 + $0x80] sm:$0xff]  ;;  %v5713_v26 = vld [vmem:[%s7150_s2 + $0x8] sm:$0xff]   ;;  %v72_v27 = vld [vmem:[%s7148_s0 + $0x98] sm:$0xff] }
  0x16   :  { %4979 = vmatprep.subr.bf16.mxu0 %v5968_v1  ;;  %v71_v28 = vld [vmem:[%s7148_s0 + $0x90] sm:$0xff]  ;;  %v5714_v29 = vld [vmem:[%s7150_s2] sm:$0xff]   ;;  %v74_v30 = vld [vmem:[%s7148_s0 + $0xa8] sm:$0xff] }
  0x17   :  { %v73_v31 = vld [vmem:[%s7148_s0 + $0xa0] sm:$0xff]  ;;  %v76_v32 = vld [vmem:[%s7148_s0 + $0xb8] sm:$0xff]  ;;  %v75_v33 = vld [vmem:[%s7148_s0 + $0xb0] sm:$0xff] }
  0x18   :  { %106 = vperm.xlu1 %5706, %v58_v6   ;;  %101 = vperm.xlu0 %5705, %v57_v7   ;;  %v77_v34 = vld [vmem:[%s7148_s0 + $0xc0] sm:$0xff]  ;;  %v5715_v35 = vld [vmem:[%s7150_s2 + $0x78] sm:$0xff]   ;;  %v5716_v36 = vld [vmem:[%s7150_s2 + $0x70] sm:$0xff]  }
  0x19   :  { %4980 = vmatpush3.bf16.msra.mxu0 %v5709_v14  ;;  %5044 = vmatpush3.bf16.msra.mxu1 %v5715_v35  ;;  %v5717_v37 = vld [vmem:[%s7150_s2 + $0x68] sm:$0xff]   ;;  %v6159_v38 = vld [vmem:[%s7149_s1] ss:$0 sm:$0xff] }
  0x1a   :  { %4981 = vmatprep.subr.bf16.mxu0 %v5968_v1  ;;  %5045 = vmatprep.subr.bf16.mxu1 %v5968_v1  ;;  %v5718_v39 = vld [vmem:[%s7150_s2 + $0x60] sm:$0xff]  }
  0x1b   :  { %v6168_v40 = vld [vmem:[%s7151_s3] ss:$0 sm:$0xff] }
  0x1c   :  { %116 = vperm.xlu1 %5706, %v60_v8   ;;  %111 = vperm.xlu0 %5705, %v59_v10   ;;  %v6181_v53 = vld [vmem:[%s7152_s4] ss:$0 sm:$0xff] }
  0x1d   :  { %4982 = vmatpush3.bf16.msra.mxu0 %v5710_v17  ;;  %5046 = vmatpush3.bf16.msra.mxu1 %v5716_v36  ;;  %v6194_v8 = vld [vmem:[%s7153_s5] ss:$0 sm:$0xff] }
  0x1e   :  { %4983 = vmatprep.subr.bf16.mxu0 %v5968_v1  ;;  %5047 = vmatprep.subr.bf16.mxu1 %v5968_v1 }
  0x20   :  { %126 = vperm.xlu1 %5706, %v62_v12   ;;  %121 = vperm.xlu0 %5705, %v61_v13  }
  0x21   :  { %4984 = vmatpush3.bf16.msra.mxu0 %v5711_v20  ;;  %5048 = vmatpush3.bf16.msra.mxu1 %v5717_v37 }
  0x22   :  { %4985 = vmatprep.subr.bf16.mxu0 %v5968_v1  ;;  %5049 = vmatprep.subr.bf16.mxu1 %v5968_v1 }
  0x24   :  { %136 = vperm.xlu1 %5706, %v64_v15   ;;  %131 = vperm.xlu0 %5705, %v63_v16  }
  0x25   :  { %4986 = vmatpush3.bf16.msra.mxu0 %v5712_v23  ;;  %5050 = vmatpush3.bf16.msra.mxu1 %v5718_v39 }
  0x26   :  { %4987 = vmatprep.subr.bf16.mxu0 %v5968_v1  ;;  %5051 = vmatprep.subr.bf16.mxu1 %v5968_v1 }
  0x28   :  { %146 = vperm.xlu1 %5706, %v66_v18   ;;  %141 = vperm.xlu0 %5705, %v65_v19  }
  0x29   :  { %4988 = vmatpush3.bf16.msra.mxu0 %v5713_v26 }
  0x2a   :  { %4989 = vmatprep.subr.bf16.mxu0 %v5968_v1 }
  0x2c   :  { %156 = vperm.xlu1 %5706, %v68_v21   ;;  %151 = vperm.xlu0 %5705, %v67_v22  }
  0x2d   :  { %4990 = vmatpush3.bf16.msra.mxu0 %v5714_v29 }
  0x2e   :  { %5111 = vmatprep.subr.bf16.mxu0 %v5968_v1 }
  0x30   :  { %166 = vperm.xlu1 %5706, %v70_v24   ;;  %161 = vperm.xlu0 %5705, %v69_v25  }
  0x34   :  { %176 = vperm.xlu1 %5706, %v72_v27   ;;  %171 = vperm.xlu0 %5705, %v71_v28  }
  0x38   :  { %186 = vperm.xlu1 %5706, %v74_v30   ;;  %181 = vperm.xlu0 %5705, %v73_v31  }
  0x3c   :  { %196 = vperm.xlu1 %5706, %v76_v32   ;;  %191 = vperm.xlu0 %5705, %v75_v33  }
  0x40   :  { %201 = vperm.xlu0 %5705, %v77_v34  }
  0x8b   :  { %v92_v41 = vpop.permute.xlu1 %91  ;;  %v82_v42 = vpop.permute.xlu0 %81 }
  0x8c   :  { %v212_v43 = vmul.f32 %v6159_v38, %v92_v41  ;;  %v210_v44 = vmul.f32 %v6159_v38, %v82_v42 }
  0x8e   :  { %v244_v45 = vadd.f32 %v6168_v40, %v212_v43  ;;  %v242_v46 = vadd.f32 %v6168_v40, %v210_v44 }
  0x8f   :  { %v97_v47 = vpop.permute.xlu1 %96  ;;  %v87_v48 = vpop.permute.xlu0 %86 }
  0x90   :  { %vm269_vm1 = vcmp.gt.f32.partialorder %v244_v45, 0.0  ;;  %v294_v49 = vmul.f32 0.01, %v244_v45  ;;  %vm267_vm2 = vcmp.gt.f32.partialorder %v242_v46, 0.0  ;;  %v292_v50 = vmul.f32 0.01, %v242_v46 }
  0x91   :  { %v213_v51 = vmul.f32 %v6159_v38, %v97_v47  ;;  %v211_v52 = vmul.f32 %v6159_v38, %v87_v48 }
  0x92   :  { %v317_v58 = vsel %vm267_vm2, %v242_v46, %v292_v50  ;;  %v319_v2 = vsel %vm269_vm1, %v244_v45, %v294_v49 }
  0x93   :  { %v245_v54 = vadd.f32 %v6168_v40, %v213_v51  ;;  %v243_v55 = vadd.f32 %v6168_v40, %v211_v52  ;;  %v107_v56 = vpop.permute.xlu1 %106  ;;  %v102_v57 = vpop.permute.xlu0 %101  ;;  %v349_v7 = vmul.f32 %v6181_v53, %v317_v58  ;;  %v351_v14 = vmul.f32 %v6181_v53, %v319_v2 }
  0x94   :  { %v215_v59 = vmul.f32 %v6159_v38, %v107_v56  ;;  %v214_v60 = vmul.f32 %v6159_v38, %v102_v57 }
  0x95   :  { %vm270_vm3 = vcmp.gt.f32.partialorder %v245_v54, 0.0  ;;  %v295_v61 = vmul.f32 0.01, %v245_v54  ;;  %vm268_vm4 = vcmp.gt.f32.partialorder %v243_v55, 0.0  ;;  %v293_v62 = vmul.f32 0.01, %v243_v55 }
  0x96   :  { %v247_v63 = vadd.f32 %v6168_v40, %v215_v59  ;;  %v246_v0 = vadd.f32 %v6168_v40, %v214_v60  ;;  %v381_v21 = vadd.f32 %v6194_v8, %v349_v7  ;;  %v383_v24 = vadd.f32 %v6194_v8, %v351_v14 }
  0x97   :  { %v320_v3 = vsel %vm270_vm3, %v245_v54, %v295_v61  ;;  %v318_v4 = vsel %vm268_vm4, %v243_v55, %v293_v62  ;;  %v117_v5 = vpop.permute.xlu1 %116  ;;  %v112_v6 = vpop.permute.xlu0 %111 }
  0x98   :  { %vm272_vm5 = vcmp.gt.f32.partialorder %v247_v63, 0.0  ;;  %v297_v9 = vmul.f32 0.01, %v247_v63  ;;  %vm271_vm6 = vcmp.gt.f32.partialorder %v246_v0, 0.0  ;;  %v296_v10 = vmul.f32 0.01, %v246_v0 }
  0x99   :  { %v217_v11 = vmul.f32 %v6159_v38, %v117_v5  ;;  %v216_v12 = vmul.f32 %v6159_v38, %v112_v6  ;;  %v350_v13 = vmul.f32 %v6181_v53, %v318_v4  ;;  %v352_v18 = vmul.f32 %v6181_v53, %v320_v3 }
  0x9a   :  { %v322_v25 = vsel %vm272_vm5, %v247_v63, %v297_v9  ;;  %v321_v26 = vsel %vm271_vm6, %v246_v0, %v296_v10 }
  0x9b   :  { %v127_v15 = vpop.permute.xlu1 %126  ;;  %v122_v16 = vpop.permute.xlu0 %121  ;;  %v382_v17 = vadd.f32 %v6194_v8, %v350_v13  ;;  %v249_v19 = vadd.f32 %v6168_v40, %v217_v11  ;;  %v248_v20 = vadd.f32 %v6168_v40, %v216_v12  ;;  %v384_v30 = vadd.f32 %v6194_v8, %v352_v18 }
  0x9c   :  { %v218_v22 = vmul.f32 %v6159_v38, %v122_v16  ;;  %v219_v27 = vmul.f32 %v6159_v38, %v127_v15  ;;  %v353_v39 = vmul.f32 %v6181_v53, %v321_v26  ;;  %v354_v41 = vmul.f32 %v6181_v53, %v322_v25 }
  0x9d   :  { %v406_v23 = vpack.c.bf16 %v382_v17, %v381_v21  ;;  %vm274_vm7 = vcmp.gt.f32.partialorder %v249_v19, 0.0  ;;  %v299_v31 = vmul.f32 0.01, %v249_v19  ;;  %vm273_vm8 = vcmp.gt.f32.partialorder %v248_v20, 0.0 }
  0x9e   :  { %v298_v32 = vmul.f32 0.01, %v248_v20  ;;  %v250_v33 = vadd.f32 %v6168_v40, %v218_v22  ;;  %v251_v42 = vadd.f32 %v6168_v40, %v219_v27  ;;  %v407_v44 = vpack.c.bf16 %v384_v30, %v383_v24 }
  0x9f   :  { %v137_v28 = vpop.permute.xlu1 %136  ;;  %v132_v29 = vpop.permute.xlu0 %131  ;;  %4992 = vmatmul.mubr.bf16.vlgmr.msra.gmra.mxu0 %v406_v23  ;;  %v324_v49 = vsel %vm274_vm7, %v249_v19, %v299_v31  ;;  %v385_v54 = vadd.f32 %v6194_v8, %v353_v39  ;;  %v386_v55 = vadd.f32 %v6194_v8, %v354_v41 }
  0xa0   :  { %v221_v34 = vmul.f32 %v6159_v38, %v137_v28  ;;  %4995 = vmatprep.mubr.msk.bf16.mxu0 %vm5969_vm0, %v5968_v1  ;;  %v220_v35 = vmul.f32 %v6159_v38, %v132_v29  ;;  %v300_v45 = vmul.f32 0.01, %v250_v33  ;;  %v323_v48 = vsel %vm273_vm8, %v248_v20, %v298_v32 }
  0xa1   :  { %vm276_vm9 = vcmp.gt.f32.partialorder %v251_v42, 0.0  ;;  %v301_v56 = vmul.f32 0.01, %v251_v42  ;;  %vm275_vm10 = vcmp.gt.f32.partialorder %v250_v33, 0.0  ;;  %v355_v60 = vmul.f32 %v6181_v53, %v323_v48 }
  0xa2   :  { %v253_v43 = vadd.f32 %v6168_v40, %v221_v34  ;;  %v252_v50 = vadd.f32 %v6168_v40, %v220_v35  ;;  %v356_v61 = vmul.f32 %v6181_v53, %v324_v49  ;;  %v325_v62 = vsel %vm275_vm10, %v250_v33, %v300_v45 }
  0xa3   :  { %v147_v36 = vpop.permute.xlu1 %146  ;;  %v142_v37 = vpop.permute.xlu0 %141  ;;  %v326_v2 = vsel %vm276_vm9, %v251_v42, %v301_v56  ;;  %v408_v5 = vpack.c.bf16 %v386_v55, %v385_v54  ;;  %v387_v10 = vadd.f32 %v6194_v8, %v355_v60  ;;  %v357_v14 = vmul.f32 %v6181_v53, %v325_v62 }
  0xa4   :  { %v223_v46 = vmul.f32 %v6159_v38, %v147_v36  ;;  %v222_v47 = vmul.f32 %v6159_v38, %v142_v37  ;;  %v303_v57 = vmul.f32 0.01, %v253_v43  ;;  %vm278_vm11 = vcmp.gt.f32.partialorder %v253_v43, 0.0 }
  0xa5   :  { %vm277_vm12 = vcmp.gt.f32.partialorder %v252_v50, 0.0  ;;  %v302_v6 = vmul.f32 0.01, %v252_v50  ;;  %v388_v13 = vadd.f32 %v6194_v8, %v356_v61  ;;  %v358_v17 = vmul.f32 %v6181_v53, %v326_v2 }
  0xa6   :  { %v6232_v58 = vadd.f32 %v6168_v40, %v223_v46  ;;  %v6235_v59 = vadd.f32 %v6168_v40, %v222_v47  ;;  %v6260_v25 = vadd.f32 %v6194_v8, %v357_v14  ;;  %v328_v32 = vsel %vm278_vm11, %v253_v43, %v303_v57 }
  0xa7   :  { %v6225_v51 = vpop.permute.xlu1 %156  ;;  %v6227_v52 = vpop.permute.xlu0 %151  ;;  %4996 = vmatmul.mubr.bf16.gmra.mxu0 %v407_v44  ;;  %v409_v24 = vpack.c.bf16 %v388_v13, %v387_v10  ;;  %v390_v30 = vadd.f32 %v6194_v8, %v358_v17  ;;  %v327_v39 = vsel %vm277_vm12, %v252_v50, %v302_v6 }
  0xa8   :  { %4999 = vmatprep.mubr.msk.bf16.mxu0 %vm5969_vm0, %v5968_v1  ;;  %v6244_v7 = vmul.f32 0.01, %v6232_v58  ;;  %v6247_v9 = vmul.f32 0.01, %v6235_v59  ;;  %vm280_vm2 = vcmp.gt.f32.partialorder %v6232_v58, 0.0  ;;  %vm279_vm3 = vcmp.gt.f32.partialorder %v6235_v59, 0.0 }
  0xa9   :  { %v410_v48 = vpack.c.bf16 %v390_v30, %v6260_v25 }
  0xab   :  { %v167_v63 = vpop.permute.xlu1 %166  ;;  %v162_v0 = vpop.permute.xlu0 %161 }
  0xac   :  { %v227_v3 = vmul.f32 %v6159_v38, %v167_v63  ;;  %v226_v4 = vmul.f32 %v6159_v38, %v162_v0  ;;  %v359_v63 = vmul.f32 %v6181_v53, %v327_v39 }
  0xae   :  { %v259_v11 = vadd.f32 %v6168_v40, %v227_v3  ;;  %v258_v12 = vadd.f32 %v6168_v40, %v226_v4 }
  0xaf   :  { %v177_v15 = vpop.permute.xlu1 %176  ;;  %v172_v16 = vpop.permute.xlu0 %171  ;;  %5000 = vmatmul.mubr.bf16.gmra.mxu0 %v408_v5 }
  0xb0   :  { %vm284_vm13 = vcmp.gt.f32.partialorder %v259_v11, 0.0  ;;  %v309_v18 = vmul.f32 0.01, %v259_v11  ;;  %vm283_vm14 = vcmp.gt.f32.partialorder %v258_v12, 0.0  ;;  %v308_v19 = vmul.f32 0.01, %v258_v12  ;;  %5003 = vmatprep.mubr.msk.bf16.mxu0 %vm5969_vm0, %v5968_v1 }
  0xb1   :  { %v229_v20 = vmul.f32 %v6159_v38, %v177_v15  ;;  %v228_v21 = vmul.f32 %v6159_v38, %v172_v16 }
  0xb2   :  { %v334_v22 = vsel %vm284_vm13, %v259_v11, %v309_v18  ;;  %v333_v23 = vsel %vm283_vm14, %v258_v12, %v308_v19  ;;  %v360_v11 = vmul.f32 %v6181_v53, %v328_v32 }
  0xb3   :  { %v261_v26 = vadd.f32 %v6168_v40, %v229_v20  ;;  %v260_v27 = vadd.f32 %v6168_v40, %v228_v21  ;;  %v187_v28 = vpop.permute.xlu1 %186  ;;  %v182_v29 = vpop.permute.xlu0 %181  ;;  %v365_v31 = vmul.f32 %v6181_v53, %v333_v23  ;;  %v366_v35 = vmul.f32 %v6181_v53, %v334_v22 }
  0xb4   :  { %v231_v33 = vmul.f32 %v6159_v38, %v187_v28  ;;  %v230_v34 = vmul.f32 %v6159_v38, %v182_v29  ;;  %v225_v20 = vmul.f32 %v6159_v38, %v6225_v51  ;;  %v224_v21 = vmul.f32 %v6159_v38, %v6227_v52 }
  0xb5   :  { %vm286_vm15 = vcmp.gt.f32.partialorder %v261_v26, 0.0  ;;  %v311_v36 = vmul.f32 0.01, %v261_v26  ;;  %vm285_vm1 = vcmp.gt.f32.partialorder %v260_v27, 0.0  ;;  %v310_v37 = vmul.f32 0.01, %v260_v27 }
  0xb6   :  { %v263_v41 = vadd.f32 %v6168_v40, %v231_v33  ;;  %v262_v42 = vadd.f32 %v6168_v40, %v230_v34  ;;  %v6276_v43 = vadd.f32 %v6194_v8, %v365_v31  ;;  %v6280_v49 = vadd.f32 %v6194_v8, %v366_v35 }
  0xb7   :  { %v336_v44 = vsel %vm286_vm15, %v261_v26, %v311_v36  ;;  %v335_v45 = vsel %vm285_vm1, %v260_v27, %v310_v37  ;;  %v197_v46 = vpop.permute.xlu1 %196  ;;  %v192_v47 = vpop.permute.xlu0 %191  ;;  %5004 = vmatmul.mubr.bf16.gmra.mxu0 %v409_v24  ;;  %v330_v27 = vsel %vm280_vm2, %v6232_v58, %v6244_v7  ;;  %v391_v28 = vadd.f32 %v6194_v8, %v359_v63 }
  0xb8   :  { %vm288_vm4 = vcmp.gt.f32.partialorder %v263_v41, 0.0  ;;  %v313_v50 = vmul.f32 0.01, %v263_v41  ;;  %vm287_vm5 = vcmp.gt.f32.partialorder %v262_v42, 0.0  ;;  %v312_v54 = vmul.f32 0.01, %v262_v42  ;;  %5007 = vmatprep.mubr.msk.bf16.mxu0 %vm5969_vm0, %v5968_v1 }
  0xb9   :  { %v233_v55 = vmul.f32 %v6159_v38, %v197_v46  ;;  %v232_v56 = vmul.f32 %v6159_v38, %v192_v47  ;;  %v414_v57 = vpack.c.bf16 %v6280_v49, %v6276_v43  ;;  %v367_v60 = vmul.f32 %v6181_v53, %v335_v45  ;;  %v5722_v43 = vld [vmem:[%s7150_s2 + $0x40] sm:$0xff]  }
  0xba   :  { %v338_v61 = vsel %vm288_vm4, %v263_v41, %v313_v50  ;;  %v337_v62 = vsel %vm287_vm5, %v262_v42, %v312_v54  ;;  %v368_v0 = vmul.f32 %v6181_v53, %v336_v44  ;;  %v392_v29 = vadd.f32 %v6194_v8, %v360_v11  ;;  %v5719_v54 = vld [vmem:[%s7150_s2 + $0x58] sm:$0xff]  }
  0xbb   :  { %v265_v2 = vadd.f32 %v6168_v40, %v233_v55  ;;  %v264_v3 = vadd.f32 %v6168_v40, %v232_v56  ;;  %v202_v4 = vpop.permute.xlu0 %201  ;;  %v6294_v5 = vadd.f32 %v6194_v8, %v367_v60  ;;  %v369_v6 = vmul.f32 %v6181_v53, %v337_v62  ;;  %5052 = vmatpush3.bf16.msra.mxu1 %v5719_v54  ;;  %v5723_v55 = vld [vmem:[%s7150_s2 + $0xb8] sm:$0xff]   ;;  %v5724_v56 = vld [vmem:[%s7150_s2 + $0xb0] sm:$0xff]   ;;  %v5726_v60 = vld [vmem:[%s7150_s2 + $0xa0] sm:$0xff]  }
  0xbc   :  { %v234_v10 = vmul.f32 %v6159_v38, %v202_v4  ;;  %v6300_v12 = vadd.f32 %v6194_v8, %v368_v0  ;;  %v370_v13 = vmul.f32 %v6181_v53, %v338_v61  ;;  %v329_v38 = vsel %vm279_vm3, %v6235_v59, %v6247_v9  ;;  %5053 = vmatprep.subr.bf16.mxu1 %v5968_v1  ;;  %v6399_v61 = vld [vmem:[%s7151_s3 + $0x1] ss:$0 sm:$0xff]  ;;  %v5727_v62 = vld [vmem:[%s7150_s2 + $0x98] sm:$0xff]  }
  0xbd   :  { %vm290_vm6 = vcmp.gt.f32.partialorder %v265_v2, 0.0  ;;  %v315_v14 = vmul.f32 0.01, %v265_v2  ;;  %vm289_vm7 = vcmp.gt.f32.partialorder %v264_v3, 0.0  ;;  %v314_v15 = vmul.f32 0.01, %v264_v3  ;;  %5112 = vmatpush3.bf16.msra.mxu0 %v5723_v55 }
  0xbe   :  { %v266_v16 = vadd.f32 %v6168_v40, %v234_v10  ;;  %v415_v17 = vpack.c.bf16 %v6300_v12, %v6294_v5  ;;  %v6307_v18 = vadd.f32 %v6194_v8, %v369_v6  ;;  %v6310_v19 = vadd.f32 %v6194_v8, %v370_v13  ;;  %5113 = vmatprep.subr.bf16.mxu0 %v5968_v1  ;;  %v6413_v10 = vld [vmem:[%s7152_s4 + $0x1] ss:$0 sm:$0xff]  ;;  %v5729_v13 = vld [vmem:[%s7150_s2 + $0x88] sm:$0xff]  }
  0xbf   :  { %v340_v22 = vsel %vm290_vm6, %v265_v2, %v315_v14  ;;  %v339_v23 = vsel %vm289_vm7, %v264_v3, %v314_v15  ;;  %5008 = vmatmul.mubr.bf16.gmra.mxu0 %v410_v48  ;;  %v257_v31 = vadd.f32 %v6168_v40, %v225_v20  ;;  %v256_v58 = vadd.f32 %v6168_v40, %v224_v21  ;;  %v5728_v3 = vld [vmem:[%s7150_s2 + $0x90] sm:$0xff]  }
  0xc0   :  { %vm291_vm8 = vcmp.gt.f32.partialorder %v266_v16, 0.0  ;;  %v316_v24 = vmul.f32 0.01, %v266_v16  ;;  %v416_v25 = vpack.c.bf16 %v6310_v19, %v6307_v18  ;;  %v371_v26 = vmul.f32 %v6181_v53, %v339_v23  ;;  %5011 = vmatprep.mubr.msk.bf16.mxu0 %vm5969_vm0, %v5968_v1  ;;  %v6425_v19 = vld [vmem:[%s7153_s5 + $0x1] ss:$0 sm:$0xff] }
  0xc1   :  { %v372_v51 = vmul.f32 %v6181_v53, %v340_v22  ;;  %v411_v33 = vpack.c.bf16 %v392_v29, %v391_v28  ;;  %v361_v34 = vmul.f32 %v6181_v53, %v329_v38  ;;  %v362_v35 = vmul.f32 %v6181_v53, %v330_v27  ;;  %5114 = vmatpush3.bf16.msra.mxu0 %v5724_v56 }
  0xc2   :  { %v341_v52 = vsel %vm291_vm8, %v266_v16, %v316_v24  ;;  %v403_v30 = vadd.f32 %v6194_v8, %v371_v26  ;;  %v307_v36 = vmul.f32 0.01, %v257_v31  ;;  %v306_v37 = vmul.f32 0.01, %v256_v58  ;;  %5115 = vmatprep.subr.bf16.mxu0 %v5968_v1 }
  0xc3   :  { %v404_v7 = vadd.f32 %v6194_v8, %v372_v51  ;;  %v373_v59 = vmul.f32 %v6181_v53, %v341_v52  ;;  %vm282_vm9 = vcmp.gt.f32.partialorder %v257_v31, 0.0  ;;  %vm281_vm10 = vcmp.gt.f32.partialorder %v256_v58, 0.0 }
  0xc4   :  { %v393_v40 = vadd.f32 %v6194_v8, %v361_v34  ;;  %v394_v39 = vadd.f32 %v6194_v8, %v362_v35  ;;  %v332_v41 = vsel %vm282_vm9, %v257_v31, %v307_v36  ;;  %v331_v42 = vsel %vm281_vm10, %v256_v58, %v306_v37 }
  0xc5   :  { %v417_v9 = vpack.c.bf16 %v404_v7, %v403_v30  ;;  %v405_v32 = vadd.f32 %v6194_v8, %v373_v59  ;;  %v363_v45 = vmul.f32 %v6181_v53, %v331_v42  ;;  %v364_v46 = vmul.f32 %v6181_v53, %v332_v41  ;;  %v5720_v53 = vld [vmem:[%s7150_s2 + $0x50] sm:$0xff]  }
  0xc6   :  { %v412_v44 = vpack.c.bf16 %v394_v39, %v393_v40  ;;  %5054 = vmatpush3.bf16.msra.mxu1 %v5720_v53 }
  0xc7   :  { %5012 = vmatmul.mubr.bf16.gmra.mxu0 %v411_v33  ;;  %v395_v47 = vadd.f32 %v6194_v8, %v363_v45  ;;  %v396_v48 = vadd.f32 %v6194_v8, %v364_v46  ;;  %5055 = vmatprep.subr.bf16.mxu1 %v5968_v1  ;;  %v5721_v8 = vld [vmem:[%s7150_s2 + $0x48] sm:$0xff]   ;;  %v418_v49 = vpack.c.bf16 %v405_v32, %v405_v32 }
  0xc8   :  { %5015 = vmatprep.mubr.msk.bf16.mxu0 %vm5969_vm0, %v5968_v1 }
  0xc9   :  { %v413_v50 = vpack.c.bf16 %v396_v48, %v395_v47 }
  0xca   :  { %5056 = vmatpush3.bf16.msra.mxu1 %v5721_v8 }
  0xcb   :  { %5057 = vmatprep.subr.bf16.mxu1 %v5968_v1 }
  0xce   :  { %5058 = vmatpush3.bf16.msra.mxu1 %v5722_v43 }
  0xcf   :  { %5016 = vmatmul.mubr.bf16.gmra.mxu0 %v412_v44  ;;  %5179 = vmatprep.subr.bf16.mxu1 %v5968_v1 }
  0xd0   :  { %5019 = vmatprep.mubr.msk.bf16.mxu0 %vm5969_vm0, %v5968_v1 }
  0xd7   :  { %5020 = vmatmul.mubr.bf16.gmra.mxu0 %v413_v50 }
  0xd8   :  { %5023 = vmatprep.mubr.msk.bf16.mxu0 %vm5969_vm0, %v5968_v1 }
  0xdf   :  { %5024 = vmatmul.mubr.bf16.gmra.mxu0 %v414_v57  ;;  %v5725_v57 = vld [vmem:[%s7150_s2 + $0xa8] sm:$0xff]  }
  0xe0   :  { %5027 = vmatprep.mubr.msk.bf16.mxu0 %vm5969_vm0, %v5968_v1  ;;  %5116 = vmatpush3.bf16.msra.mxu0 %v5725_v57 }
  0xe1   :  { %5117 = vmatprep.subr.bf16.mxu0 %v5968_v1 }
  0xe4   :  { %5118 = vmatpush3.bf16.msra.mxu0 %v5726_v60 }
  0xe5   :  { %5119 = vmatprep.subr.bf16.mxu0 %v5968_v1 }
  0xe7   :  { %5028 = vmatmul.mubr.bf16.gmra.mxu0 %v415_v17 }
  0xe8   :  { %5031 = vmatprep.mubr.msk.bf16.mxu0 %vm5969_vm0, %v5968_v1  ;;  %5120 = vmatpush3.bf16.msra.mxu0 %v5727_v62 }
  0xe9   :  { %5121 = vmatprep.subr.bf16.mxu0 %v5968_v1 }
  0xec   :  { %5122 = vmatpush3.bf16.msra.mxu0 %v5728_v3 }
  0xed   :  { %5123 = vmatprep.subr.bf16.mxu0 %v5968_v1 }
  0xef   :  { %5032 = vmatmul.mubr.bf16.gmra.mxu0 %v416_v25 }
  0xf0   :  { %5035 = vmatprep.mubr.msk.bf16.mxu0 %vm5969_vm0, %v5968_v1  ;;  %5124 = vmatpush3.bf16.msra.mxu0 %v5729_v13 }
  0xf1   :  { %5125 = vmatprep.subr.bf16.mxu0 %v5968_v1 }
  0xf7   :  { %5036 = vmatmul.mubr.bf16.gmra.mxu0 %v417_v9 }
  0xf8   :  { %5039 = vmatprep.mubr.msk.bf16.mxu0 %vm5969_vm0, %v5968_v1 }
  0xff   :  { %5040 = vmatmul.mubr.bf16.gmra.mxu0 %v418_v49 }
 0x100   :  { %5127 = vmatprep.mubr.msk.bf16.mxu0 %vm5969_vm0, %v5968_v1 }
 0x15f   :  { %v525_v63 = vpop.f32.mrf.mxu0 }
 0x160   :  { %v526_v0 = vadd.f32 %v6399_v61, %v525_v63 }
 0x161   :  { %v4993_v2 = vpop.f32.mrf.mxu0 }
 0x162   :  { %vm627_vm11 = vcmp.gt.f32.partialorder %v526_v0, 0.0  ;;  %v652_v4 = vmul.f32 0.01, %v526_v0 }
 0x163   :  { %v528_v5 = vpop.f32.mrf.mxu0 }
 0x164   :  { %v677_v6 = vsel %vm627_vm11, %v526_v0, %v652_v4  ;;  %v529_v11 = vadd.f32 %v6399_v61, %v528_v5 }
 0x165   :  { %v4994_v12 = vpop.f32.mrf.mxu0  ;;  %v710_v15 = vmul.f32 %v6413_v10, %v677_v6 }
 0x166   :  { %vm628_vm12 = vcmp.gt.f32.partialorder %v529_v11, 0.0  ;;  %v653_v14 = vmul.f32 0.01, %v529_v11 }
 0x167   :  { %v533_v16 = vpop.f32.mrf.mxu0  ;;  %v743_v24 = vadd.f32 %v6425_v19, %v710_v15 }
 0x168   :  { %v678_v17 = vsel %vm628_vm12, %v529_v11, %v653_v14  ;;  %v534_v18 = vadd.f32 %v6399_v61, %v533_v16 }
 0x169   :  { %v711_v20 = vmul.f32 %v6413_v10, %v678_v17  ;;  %v4997_v21 = vpop.f32.mrf.mxu0 }
 0x16a   :  { %vm629_vm13 = vcmp.gt.f32.partialorder %v534_v18, 0.0  ;;  %v654_v22 = vmul.f32 0.01, %v534_v18 }
 0x16b   :  { %v536_v23 = vpop.f32.mrf.mxu0  ;;  %v744_v25 = vadd.f32 %v6425_v19, %v711_v20 }
 0x16c   :  { %v679_v26 = vsel %vm629_vm13, %v534_v18, %v654_v22  ;;  %v537_v27 = vadd.f32 %v6399_v61, %v536_v23 }
 0x16d   :  { %v712_v38 = vmul.f32 %v6413_v10, %v679_v26  ;;  %v4998_v51 = vpop.f32.mrf.mxu0  ;;  %v768_v52 = vpack.c.bf16 %v744_v25, %v743_v24 }
 0x16e   :  { %vm630_vm14 = vcmp.gt.f32.partialorder %v537_v27, 0.0  ;;  %v655_v28 = vmul.f32 0.01, %v537_v27 }
 0x16f   :  { %v541_v29 = vpop.f32.mrf.mxu0  ;;  %5060 = vmatmul.mubr.bf16.vlgmr.msra.gmra.mxu1 %v768_v52  ;;  %v745_v59 = vadd.f32 %v6425_v19, %v712_v38 }
 0x170   :  { %v680_v30 = vsel %vm630_vm14, %v537_v27, %v655_v28  ;;  %v542_v31 = vadd.f32 %v6399_v61, %v541_v29  ;;  %5063 = vmatprep.mubr.msk.bf16.mxu1 %vm5969_vm0, %v5968_v1 }
 0x171   :  { %v713_v58 = vmul.f32 %v6413_v10, %v680_v30  ;;  %v5001_v7 = vpop.f32.mrf.mxu0 }
 0x172   :  { %vm631_vm15 = vcmp.gt.f32.partialorder %v542_v31, 0.0  ;;  %v656_v9 = vmul.f32 0.01, %v542_v31 }
 0x173   :  { %v544_v32 = vpop.f32.mrf.mxu0  ;;  %v746_v33 = vadd.f32 %v6425_v19, %v713_v58 }
 0x174   :  { %v681_v34 = vsel %vm631_vm15, %v542_v31, %v656_v9  ;;  %v545_v35 = vadd.f32 %v6399_v61, %v544_v32 }
 0x175   :  { %v5002_v36 = vpop.f32.mrf.mxu0  ;;  %v769_v37 = vpack.c.bf16 %v746_v33, %v745_v59  ;;  %v714_v39 = vmul.f32 %v6413_v10, %v681_v34 }
 0x176   :  { %vm632_vm1 = vcmp.gt.f32.partialorder %v545_v35, 0.0  ;;  %v657_v40 = vmul.f32 0.01, %v545_v35 }
 0x177   :  { %v549_v41 = vpop.f32.mrf.mxu0  ;;  %5064 = vmatmul.mubr.bf16.gmra.mxu1 %v769_v37  ;;  %v747_v50 = vadd.f32 %v6425_v19, %v714_v39 }
 0x178   :  { %v682_v42 = vsel %vm632_vm1, %v545_v35, %v657_v40  ;;  %v550_v44 = vadd.f32 %v6399_v61, %v549_v41  ;;  %5067 = vmatprep.mubr.msk.bf16.mxu1 %vm5969_vm0, %v5968_v1 }
 0x179   :  { %v715_v45 = vmul.f32 %v6413_v10, %v682_v42  ;;  %v5005_v46 = vpop.f32.mrf.mxu0 }
 0x17a   :  { %vm633_vm2 = vcmp.gt.f32.partialorder %v550_v44, 0.0  ;;  %v658_v47 = vmul.f32 0.01, %v550_v44 }
 0x17b   :  { %v552_v48 = vpop.f32.mrf.mxu0  ;;  %v748_v54 = vadd.f32 %v6425_v19, %v715_v45 }
 0x17c   :  { %v683_v53 = vsel %vm633_vm2, %v550_v44, %v658_v47  ;;  %v553_v8 = vadd.f32 %v6399_v61, %v552_v48 }
 0x17d   :  { %v5006_v43 = vpop.f32.mrf.mxu0  ;;  %v770_v49 = vpack.c.bf16 %v748_v54, %v747_v50  ;;  %v716_v56 = vmul.f32 %v6413_v10, %v683_v53 }
 0x17e   :  { %vm634_vm3 = vcmp.gt.f32.partialorder %v553_v8, 0.0  ;;  %v659_v55 = vmul.f32 0.01, %v553_v8 }
 0x17f   :  { %v557_v57 = vpop.f32.mrf.mxu0  ;;  %5068 = vmatmul.mubr.bf16.gmra.mxu1 %v770_v49  ;;  %v749_v4 = vadd.f32 %v6425_v19, %v716_v56 }
 0x180   :  { %v684_v60 = vsel %vm634_vm3, %v553_v8, %v659_v55  ;;  %v558_v62 = vadd.f32 %v6399_v61, %v557_v57  ;;  %5071 = vmatprep.mubr.msk.bf16.mxu1 %vm5969_vm0, %v5968_v1 }
 0x181   :  { %v717_v63 = vmul.f32 %v6413_v10, %v684_v60  ;;  %v5009_v0 = vpop.f32.mrf.mxu0 }
 0x182   :  { %vm635_vm4 = vcmp.gt.f32.partialorder %v558_v62, 0.0  ;;  %v660_v2 = vmul.f32 0.01, %v558_v62 }
 0x183   :  { %v560_v3 = vpop.f32.mrf.mxu0  ;;  %v750_v5 = vadd.f32 %v6425_v19, %v717_v63 }
 0x184   :  { %v685_v6 = vsel %vm635_vm4, %v558_v62, %v660_v2  ;;  %v561_v11 = vadd.f32 %v6399_v61, %v560_v3 }
 0x185   :  { %v5010_v12 = vpop.f32.mrf.mxu0  ;;  %v771_v13 = vpack.c.bf16 %v750_v5, %v749_v4  ;;  %v718_v15 = vmul.f32 %v6413_v10, %v685_v6 }
 0x186   :  { %vm636_vm5 = vcmp.gt.f32.partialorder %v561_v11, 0.0  ;;  %v661_v14 = vmul.f32 0.01, %v561_v11 }
 0x187   :  { %v565_v16 = vpop.f32.mrf.mxu0  ;;  %5072 = vmatmul.mubr.bf16.gmra.mxu1 %v771_v13  ;;  %v751_v24 = vadd.f32 %v6425_v19, %v718_v15 }
 0x188   :  { %v686_v17 = vsel %vm636_vm5, %v561_v11, %v661_v14  ;;  %v566_v18 = vadd.f32 %v6399_v61, %v565_v16  ;;  %5075 = vmatprep.mubr.msk.bf16.mxu1 %vm5969_vm0, %v5968_v1 }
 0x189   :  { %v719_v20 = vmul.f32 %v6413_v10, %v686_v17  ;;  %v5013_v21 = vpop.f32.mrf.mxu0 }
 0x18a   :  { %vm637_vm6 = vcmp.gt.f32.partialorder %v566_v18, 0.0  ;;  %v662_v22 = vmul.f32 0.01, %v566_v18 }
 0x18b   :  { %v568_v23 = vpop.f32.mrf.mxu0  ;;  %v752_v25 = vadd.f32 %v6425_v19, %v719_v20 }
 0x18c   :  { %v687_v26 = vsel %vm637_vm6, %v566_v18, %v662_v22  ;;  %v569_v27 = vadd.f32 %v6399_v61, %v568_v23 }
 0x18d   :  { %v5014_v38 = vpop.f32.mrf.mxu0  ;;  %v772_v51 = vpack.c.bf16 %v752_v25, %v751_v24  ;;  %v720_v28 = vmul.f32 %v6413_v10, %v687_v26 }
 0x18e   :  { %vm638_vm7 = vcmp.gt.f32.partialorder %v569_v27, 0.0  ;;  %v663_v52 = vmul.f32 0.01, %v569_v27 }
 0x18f   :  { %v573_v29 = vpop.f32.mrf.mxu0  ;;  %5076 = vmatmul.mubr.bf16.gmra.mxu1 %v772_v51  ;;  %v753_v32 = vadd.f32 %v6425_v19, %v720_v28 }
 0x190   :  { %v688_v30 = vsel %vm638_vm7, %v569_v27, %v663_v52  ;;  %v574_v31 = vadd.f32 %v6399_v61, %v573_v29  ;;  %5079 = vmatprep.mubr.msk.bf16.mxu1 %vm5969_vm0, %v5968_v1 }
 0x191   :  { %v721_v58 = vmul.f32 %v6413_v10, %v688_v30  ;;  %v5017_v7 = vpop.f32.mrf.mxu0 }
 0x192   :  { %vm639_vm8 = vcmp.gt.f32.partialorder %v574_v31, 0.0  ;;  %v664_v59 = vmul.f32 0.01, %v574_v31 }
 0x193   :  { %v576_v9 = vpop.f32.mrf.mxu0  ;;  %v754_v33 = vadd.f32 %v6425_v19, %v721_v58 }
 0x194   :  { %v689_v34 = vsel %vm639_vm8, %v574_v31, %v664_v59  ;;  %v577_v35 = vadd.f32 %v6399_v61, %v576_v9 }
 0x195   :  { %v5018_v36 = vpop.f32.mrf.mxu0  ;;  %v773_v37 = vpack.c.bf16 %v754_v33, %v753_v32  ;;  %v722_v39 = vmul.f32 %v6413_v10, %v689_v34 }
 0x196   :  { %vm640_vm9 = vcmp.gt.f32.partialorder %v577_v35, 0.0  ;;  %v665_v40 = vmul.f32 0.01, %v577_v35 }
 0x197   :  { %v581_v41 = vpop.f32.mrf.mxu0  ;;  %5080 = vmatmul.mubr.bf16.gmra.mxu1 %v773_v37  ;;  %v755_v50 = vadd.f32 %v6425_v19, %v722_v39 }
 0x198   :  { %v690_v42 = vsel %vm640_vm9, %v577_v35, %v665_v40  ;;  %v582_v44 = vadd.f32 %v6399_v61, %v581_v41  ;;  %5083 = vmatprep.mubr.msk.bf16.mxu1 %vm5969_vm0, %v5968_v1 }
 0x199   :  { %v723_v45 = vmul.f32 %v6413_v10, %v690_v42  ;;  %v5021_v46 = vpop.f32.mrf.mxu0  ;;  %v5730_v42 = vld [vmem:[%s7150_s2 + $0x80] sm:$0xff]  }
 0x19a   :  { %vm641_vm10 = vcmp.gt.f32.partialorder %v582_v44, 0.0  ;;  %v666_v47 = vmul.f32 0.01, %v582_v44  ;;  %5126 = vmatpush3.bf16.msra.mxu0 %v5730_v42 }
 0x19b   :  { %v584_v48 = vpop.f32.mrf.mxu0  ;;  %v756_v54 = vadd.f32 %v6425_v19, %v723_v45  ;;  %5259 = vmatprep.subr.bf16.mxu0 %v5968_v1 }
 0x19c   :  { %v691_v53 = vsel %vm641_vm10, %v582_v44, %v666_v47  ;;  %v585_v8 = vadd.f32 %v6399_v61, %v584_v48 }
 0x19d   :  { %v5022_v43 = vpop.f32.mrf.mxu0  ;;  %v774_v49 = vpack.c.bf16 %v756_v54, %v755_v50  ;;  %v724_v56 = vmul.f32 %v6413_v10, %v691_v53 }
 0x19e   :  { %vm642_vm11 = vcmp.gt.f32.partialorder %v585_v8, 0.0  ;;  %v667_v55 = vmul.f32 0.01, %v585_v8 }
 0x19f   :  { %v589_v57 = vpop.f32.mrf.mxu0  ;;  %5084 = vmatmul.mubr.bf16.gmra.mxu1 %v774_v49  ;;  %v757_v4 = vadd.f32 %v6425_v19, %v724_v56 }
 0x1a0   :  { %v692_v60 = vsel %vm642_vm11, %v585_v8, %v667_v55  ;;  %v590_v62 = vadd.f32 %v6399_v61, %v589_v57  ;;  %5087 = vmatprep.mubr.msk.bf16.mxu1 %vm5969_vm0, %v5968_v1 }
 0x1a1   :  { %v725_v63 = vmul.f32 %v6413_v10, %v692_v60  ;;  %v5025_v0 = vpop.f32.mrf.mxu0 }
 0x1a2   :  { %vm643_vm12 = vcmp.gt.f32.partialorder %v590_v62, 0.0  ;;  %v668_v2 = vmul.f32 0.01, %v590_v62 }
 0x1a3   :  { %v592_v3 = vpop.f32.mrf.mxu0  ;;  %v758_v5 = vadd.f32 %v6425_v19, %v725_v63 }
 0x1a4   :  { %v693_v6 = vsel %vm643_vm12, %v590_v62, %v668_v2  ;;  %v593_v11 = vadd.f32 %v6399_v61, %v592_v3 }
 0x1a5   :  { %v5026_v12 = vpop.f32.mrf.mxu0  ;;  %v775_v13 = vpack.c.bf16 %v758_v5, %v757_v4  ;;  %v726_v15 = vmul.f32 %v6413_v10, %v693_v6 }
 0x1a6   :  { %vm644_vm13 = vcmp.gt.f32.partialorder %v593_v11, 0.0  ;;  %v669_v14 = vmul.f32 0.01, %v593_v11 }
 0x1a7   :  { %v597_v16 = vpop.f32.mrf.mxu0  ;;  %5088 = vmatmul.mubr.bf16.gmra.mxu1 %v775_v13  ;;  %v759_v24 = vadd.f32 %v6425_v19, %v726_v15 }
 0x1a8   :  { %v694_v17 = vsel %vm644_vm13, %v593_v11, %v669_v14  ;;  %v598_v18 = vadd.f32 %v6399_v61, %v597_v16  ;;  %5091 = vmatprep.mubr.msk.bf16.mxu1 %vm5969_vm0, %v5968_v1  ;;  %v5731_v16 = vld [vmem:[#allocation3 + $0x78] sm:$0xff]  }
 0x1a9   :  { %v727_v20 = vmul.f32 %v6413_v10, %v694_v17  ;;  %v5029_v21 = vpop.f32.mrf.mxu0  ;;  %5180 = vmatpush3.bf16.msra.mxu1 %v5731_v16  ;;  %v5732_v17 = vld [vmem:[#allocation3 + $0x70] sm:$0xff]  }
 0x1aa   :  { %vm645_vm14 = vcmp.gt.f32.partialorder %v598_v18, 0.0  ;;  %v670_v22 = vmul.f32 0.01, %v598_v18  ;;  %5181 = vmatprep.subr.bf16.mxu1 %v5968_v1 }
 0x1ab   :  { %v600_v23 = vpop.f32.mrf.mxu0  ;;  %v760_v25 = vadd.f32 %v6425_v19, %v727_v20  ;;  %v5735_v20 = vld [vmem:[#allocation3 + $0x58] sm:$0xff]  }
 0x1ac   :  { %v695_v26 = vsel %vm645_vm14, %v598_v18, %v670_v22  ;;  %v601_v27 = vadd.f32 %v6399_v61, %v600_v23  ;;  %v5734_v18 = vld [vmem:[#allocation3 + $0x60] sm:$0xff]  }
 0x1ad   :  { %v5030_v38 = vpop.f32.mrf.mxu0  ;;  %v776_v51 = vpack.c.bf16 %v760_v25, %v759_v24  ;;  %v728_v28 = vmul.f32 %v6413_v10, %v695_v26  ;;  %5182 = vmatpush3.bf16.msra.mxu1 %v5732_v17  ;;  %v5736_v24 = vld [vmem:[#allocation3 + $0x50] sm:$0xff]  }
 0x1ae   :  { %vm646_vm15 = vcmp.gt.f32.partialorder %v601_v27, 0.0  ;;  %v671_v52 = vmul.f32 0.01, %v601_v27  ;;  %5183 = vmatprep.subr.bf16.mxu1 %v5968_v1  ;;  %v6543_v38 = vld [vmem:[%s7152_s4 + $0x2] ss:$0 sm:$0xff] }
 0x1af   :  { %v605_v29 = vpop.f32.mrf.mxu0  ;;  %5092 = vmatmul.mubr.bf16.gmra.mxu1 %v776_v51  ;;  %v761_v32 = vadd.f32 %v6425_v19, %v728_v28  ;;  %v5737_v28 = vld [vmem:[#allocation3 + $0x48] sm:$0xff]  }
 0x1b0   :  { %v696_v30 = vsel %vm646_vm15, %v601_v27, %v671_v52  ;;  %v606_v31 = vadd.f32 %v6399_v61, %v605_v29  ;;  %5095 = vmatprep.mubr.msk.bf16.mxu1 %vm5969_vm0, %v5968_v1 }
 0x1b1   :  { %v729_v58 = vmul.f32 %v6413_v10, %v696_v30  ;;  %v5033_v7 = vpop.f32.mrf.mxu0 }
 0x1b2   :  { %vm647_vm1 = vcmp.gt.f32.partialorder %v606_v31, 0.0  ;;  %v672_v59 = vmul.f32 0.01, %v606_v31 }
 0x1b3   :  { %v608_v9 = vpop.f32.mrf.mxu0  ;;  %v762_v33 = vadd.f32 %v6425_v19, %v729_v58  ;;  %v6551_v58 = vld [vmem:[%s7153_s5 + $0x2] ss:$0 sm:$0xff] }
 0x1b4   :  { %v697_v34 = vsel %vm647_vm1, %v606_v31, %v672_v59  ;;  %v609_v35 = vadd.f32 %v6399_v61, %v608_v9 }
 0x1b5   :  { %v5034_v36 = vpop.f32.mrf.mxu0  ;;  %v777_v37 = vpack.c.bf16 %v762_v33, %v761_v32  ;;  %v730_v39 = vmul.f32 %v6413_v10, %v697_v34 }
 0x1b6   :  { %vm648_vm2 = vcmp.gt.f32.partialorder %v609_v35, 0.0  ;;  %v673_v40 = vmul.f32 0.01, %v609_v35 }
 0x1b7   :  { %v613_v41 = vpop.f32.mrf.mxu0  ;;  %5096 = vmatmul.mubr.bf16.gmra.mxu1 %v777_v37  ;;  %v763_v54 = vadd.f32 %v6425_v19, %v730_v39  ;;  %v5738_v39 = vld [vmem:[#allocation3 + $0x138] sm:$0xff]  }
 0x1b8   :  { %v698_v44 = vsel %vm648_vm2, %v609_v35, %v673_v40  ;;  %v614_v45 = vadd.f32 %v6399_v61, %v613_v41  ;;  %5099 = vmatprep.mubr.msk.bf16.mxu1 %vm5969_vm0, %v5968_v1 }
 0x1b9   :  { %v731_v46 = vmul.f32 %v6413_v10, %v698_v44  ;;  %v5037_v47 = vpop.f32.mrf.mxu0 }
 0x1ba   :  { %vm649_vm3 = vcmp.gt.f32.partialorder %v614_v45, 0.0  ;;  %v674_v48 = vmul.f32 0.01, %v614_v45 }
 0x1bb   :  { %v616_v50 = vpop.f32.mrf.mxu0  ;;  %v764_v53 = vadd.f32 %v6425_v19, %v731_v46 }
 0x1bc   :  { %v699_v8 = vsel %vm649_vm3, %v614_v45, %v674_v48  ;;  %v617_v43 = vadd.f32 %v6399_v61, %v616_v50 }
 0x1bd   :  { %v5038_v49 = vpop.f32.mrf.mxu0  ;;  %v778_v55 = vpack.c.bf16 %v764_v53, %v763_v54  ;;  %v732_v57 = vmul.f32 %v6413_v10, %v699_v8 }
 0x1be   :  { %vm650_vm4 = vcmp.gt.f32.partialorder %v617_v43, 0.0  ;;  %v675_v56 = vmul.f32 0.01, %v617_v43 }
 0x1bf   :  { %v621_v60 = vpop.f32.mrf.mxu0  ;;  %5100 = vmatmul.mubr.bf16.gmra.mxu1 %v778_v55  ;;  %v765_v5 = vadd.f32 %v6425_v19, %v732_v57 }
 0x1c0   :  { %v700_v62 = vsel %vm650_vm4, %v617_v43, %v675_v56  ;;  %v622_v63 = vadd.f32 %v6399_v61, %v621_v60  ;;  %5103 = vmatprep.mubr.msk.bf16.mxu1 %vm5969_vm0, %v5968_v1 }
 0x1c1   :  { %v733_v0 = vmul.f32 %v6413_v10, %v700_v62  ;;  %v5041_v2 = vpop.f32.mrf.mxu0 }
 0x1c2   :  { %vm651_vm5 = vcmp.gt.f32.partialorder %v622_v63, 0.0  ;;  %v676_v3 = vmul.f32 0.01, %v622_v63 }
 0x1c3   :  { %v624_v4 = vpop.f32.mrf.mxu0  ;;  %v766_v6 = vadd.f32 %v6425_v19, %v733_v0 }
 0x1c4   :  { %v701_v11 = vsel %vm651_vm5, %v622_v63, %v676_v3 }
 0x1c5   :  { %v734_v12 = vmul.f32 %v6413_v10, %v701_v11  ;;  %v5042_v13 = vpop.f32.mrf.mxu0  ;;  %v779_v14 = vpack.c.bf16 %v766_v6, %v765_v5  ;;  %v5733_v10 = vld [vmem:[#allocation3 + $0x68] sm:$0xff]  }
 0x1c6   :  { %5184 = vmatpush3.bf16.msra.mxu1 %v5733_v10 }
 0x1c7   :  { %5104 = vmatmul.mubr.bf16.gmra.mxu1 %v779_v14  ;;  %v767_v61 = vadd.f32 %v6425_v19, %v734_v12  ;;  %5185 = vmatprep.subr.bf16.mxu1 %v5968_v1  ;;  %v6535_v19 = vld [vmem:[%s7151_s3 + $0x2] ss:$0 sm:$0xff] }
 0x1c8   :  { %5107 = vmatprep.mubr.msk.bf16.mxu1 %vm5969_vm0, %v5968_v1 }
 0x1c9   :  { %v780_v15 = vpack.c.bf16 %v767_v61, %v767_v61 }
 0x1ca   :  { %5186 = vmatpush3.bf16.msra.mxu1 %v5734_v18 }
 0x1cb   :  { %5187 = vmatprep.subr.bf16.mxu1 %v5968_v1 }
 0x1ce   :  { %5188 = vmatpush3.bf16.msra.mxu1 %v5735_v20 }
 0x1cf   :  { %5108 = vmatmul.mubr.bf16.gmra.mxu1 %v780_v15  ;;  %5189 = vmatprep.subr.bf16.mxu1 %v5968_v1 }
 0x1d0   :  { %5195 = vmatprep.mubr.msk.bf16.mxu1 %vm5969_vm0, %v5968_v1 }
 0x1d2   :  { %5190 = vmatpush3.bf16.msra.mxu1 %v5736_v24 }
 0x1d3   :  { %5191 = vmatprep.subr.bf16.mxu1 %v5968_v1 }
 0x1d6   :  { %5192 = vmatpush3.bf16.msra.mxu1 %v5737_v28 }
 0x1d7   :  { %5193 = vmatprep.subr.bf16.mxu1 %v5968_v1 }
 0x22f   :  { %v888_v21 = vpop.f32.mrf.mxu1 }
 0x230   :  { %v889_v22 = vadd.f32 %v6535_v19, %v888_v21 }
 0x231   :  { %v5061_v23 = vpop.f32.mrf.mxu1 }
 0x232   :  { %vm990_vm6 = vcmp.gt.f32.partialorder %v889_v22, 0.0  ;;  %v1015_v25 = vmul.f32 0.01, %v889_v22 }
 0x233   :  { %v891_v26 = vpop.f32.mrf.mxu1 }
 0x234   :  { %v1040_v27 = vsel %vm990_vm6, %v889_v22, %v1015_v25  ;;  %v892_v51 = vadd.f32 %v6535_v19, %v891_v26 }
 0x235   :  { %v5062_v52 = vpop.f32.mrf.mxu1  ;;  %v1073_v30 = vmul.f32 %v6543_v38, %v1040_v27 }
 0x236   :  { %vm991_vm7 = vcmp.gt.f32.partialorder %v892_v51, 0.0  ;;  %v1016_v29 = vmul.f32 0.01, %v892_v51 }
 0x237   :  { %v896_v31 = vpop.f32.mrf.mxu1  ;;  %v1106_v34 = vadd.f32 %v6551_v58, %v1073_v30 }
 0x238   :  { %v1041_v7 = vsel %vm991_vm7, %v892_v51, %v1016_v29  ;;  %v897_v59 = vadd.f32 %v6535_v19, %v896_v31 }
 0x239   :  { %v1074_v9 = vmul.f32 %v6543_v38, %v1041_v7  ;;  %v5065_v32 = vpop.f32.mrf.mxu1 }
 0x23a   :  { %vm992_vm8 = vcmp.gt.f32.partialorder %v897_v59, 0.0  ;;  %v1017_v33 = vmul.f32 0.01, %v897_v59 }
 0x23b   :  { %v1107_v35 = vadd.f32 %v6551_v58, %v1074_v9  ;;  %v899_v36 = vpop.f32.mrf.mxu1 }
 0x23c   :  { %v1042_v37 = vsel %vm992_vm8, %v897_v59, %v1017_v33  ;;  %v900_v40 = vadd.f32 %v6535_v19, %v899_v36 }
 0x23d   :  { %v1131_v41 = vpack.c.bf16 %v1107_v35, %v1106_v34  ;;  %v1075_v42 = vmul.f32 %v6543_v38, %v1042_v37  ;;  %v5066_v44 = vpop.f32.mrf.mxu1 }
 0x23e   :  { %vm993_vm9 = vcmp.gt.f32.partialorder %v900_v40, 0.0  ;;  %v1018_v45 = vmul.f32 0.01, %v900_v40 }
 0x23f   :  { %v904_v46 = vpop.f32.mrf.mxu1  ;;  %5128 = vmatmul.mubr.bf16.vlgmr.msra.gmra.mxu0 %v1131_v41  ;;  %v1108_v53 = vadd.f32 %v6551_v58, %v1075_v42 }
 0x240   :  { %v1043_v47 = vsel %vm993_vm9, %v900_v40, %v1018_v45  ;;  %v905_v48 = vadd.f32 %v6535_v19, %v904_v46  ;;  %5131 = vmatprep.mubr.msk.bf16.mxu0 %vm5969_vm0, %v5968_v1  ;;  %5260 = vmatpush3.bf16.msra.mxu0 %v5738_v39 }
 0x241   :  { %v1076_v50 = vmul.f32 %v6543_v38, %v1043_v47  ;;  %v5069_v54 = vpop.f32.mrf.mxu1  ;;  %5261 = vmatprep.subr.bf16.mxu0 %v5968_v1 }
 0x242   :  { %vm994_vm10 = vcmp.gt.f32.partialorder %v905_v48, 0.0  ;;  %v1019_v8 = vmul.f32 0.01, %v905_v48 }
 0x243   :  { %v907_v43 = vpop.f32.mrf.mxu1  ;;  %v1109_v49 = vadd.f32 %v6551_v58, %v1076_v50 }
 0x244   :  { %v1044_v55 = vsel %vm994_vm10, %v905_v48, %v1019_v8  ;;  %v908_v56 = vadd.f32 %v6535_v19, %v907_v43 }
 0x245   :  { %v5070_v57 = vpop.f32.mrf.mxu1  ;;  %v1132_v60 = vpack.c.bf16 %v1109_v49, %v1108_v53  ;;  %v1077_v63 = vmul.f32 %v6543_v38, %v1044_v55 }
 0x246   :  { %vm995_vm11 = vcmp.gt.f32.partialorder %v908_v56, 0.0  ;;  %v1020_v62 = vmul.f32 0.01, %v908_v56 }
 0x247   :  { %v912_v0 = vpop.f32.mrf.mxu1  ;;  %5132 = vmatmul.mubr.bf16.gmra.mxu0 %v1132_v60  ;;  %v1110_v12 = vadd.f32 %v6551_v58, %v1077_v63 }
 0x248   :  { %v1045_v2 = vsel %vm995_vm11, %v908_v56, %v1020_v62  ;;  %v913_v3 = vadd.f32 %v6535_v19, %v912_v0  ;;  %5135 = vmatprep.mubr.msk.bf16.mxu0 %vm5969_vm0, %v5968_v1 }
 0x249   :  { %v1078_v4 = vmul.f32 %v6543_v38, %v1045_v2  ;;  %v5073_v5 = vpop.f32.mrf.mxu1 }
 0x24a   :  { %vm996_vm12 = vcmp.gt.f32.partialorder %v913_v3, 0.0  ;;  %v1021_v6 = vmul.f32 0.01, %v913_v3 }
 0x24b   :  { %v915_v11 = vpop.f32.mrf.mxu1  ;;  %v1111_v13 = vadd.f32 %v6551_v58, %v1078_v4 }
 0x24c   :  { %v1046_v14 = vsel %vm996_vm12, %v913_v3, %v1021_v6  ;;  %v916_v61 = vadd.f32 %v6535_v19, %v915_v11 }
 0x24d   :  { %v5074_v15 = vpop.f32.mrf.mxu1  ;;  %v1133_v16 = vpack.c.bf16 %v1111_v13, %v1110_v12  ;;  %v1079_v10 = vmul.f32 %v6543_v38, %v1046_v14 }
 0x24e   :  { %vm997_vm13 = vcmp.gt.f32.partialorder %v916_v61, 0.0  ;;  %v1022_v17 = vmul.f32 0.01, %v916_v61 }
 0x24f   :  { %v920_v18 = vpop.f32.mrf.mxu1  ;;  %5136 = vmatmul.mubr.bf16.gmra.mxu0 %v1133_v16  ;;  %v1112_v26 = vadd.f32 %v6551_v58, %v1079_v10 }
 0x250   :  { %v1047_v20 = vsel %vm997_vm13, %v916_v61, %v1022_v17  ;;  %v921_v21 = vadd.f32 %v6535_v19, %v920_v18  ;;  %5139 = vmatprep.mubr.msk.bf16.mxu0 %vm5969_vm0, %v5968_v1 }
 0x251   :  { %v1080_v22 = vmul.f32 %v6543_v38, %v1047_v20  ;;  %v5077_v23 = vpop.f32.mrf.mxu1 }
 0x252   :  { %vm998_vm14 = vcmp.gt.f32.partialorder %v921_v21, 0.0  ;;  %v1023_v24 = vmul.f32 0.01, %v921_v21 }
 0x253   :  { %v923_v25 = vpop.f32.mrf.mxu1  ;;  %v1113_v27 = vadd.f32 %v6551_v58, %v1080_v22 }
 0x254   :  { %v1048_v51 = vsel %vm998_vm14, %v921_v21, %v1023_v24  ;;  %v924_v52 = vadd.f32 %v6535_v19, %v923_v25 }
 0x255   :  { %v5078_v28 = vpop.f32.mrf.mxu1  ;;  %v1134_v29 = vpack.c.bf16 %v1113_v27, %v1112_v26  ;;  %v1081_v31 = vmul.f32 %v6543_v38, %v1048_v51 }
 0x256   :  { %vm999_vm15 = vcmp.gt.f32.partialorder %v924_v52, 0.0  ;;  %v1024_v30 = vmul.f32 0.01, %v924_v52 }
 0x257   :  { %v928_v7 = vpop.f32.mrf.mxu1  ;;  %5140 = vmatmul.mubr.bf16.gmra.mxu0 %v1134_v29  ;;  %v1114_v36 = vadd.f32 %v6551_v58, %v1081_v31 }
 0x258   :  { %v1049_v59 = vsel %vm999_vm15, %v924_v52, %v1024_v30  ;;  %v929_v9 = vadd.f32 %v6535_v19, %v928_v7  ;;  %5143 = vmatprep.mubr.msk.bf16.mxu0 %vm5969_vm0, %v5968_v1 }
 0x259   :  { %v1082_v32 = vmul.f32 %v6543_v38, %v1049_v59  ;;  %v5081_v33 = vpop.f32.mrf.mxu1 }
 0x25a   :  { %vm1000_vm1 = vcmp.gt.f32.partialorder %v929_v9, 0.0  ;;  %v1025_v34 = vmul.f32 0.01, %v929_v9 }
 0x25b   :  { %v931_v35 = vpop.f32.mrf.mxu1  ;;  %v1115_v37 = vadd.f32 %v6551_v58, %v1082_v32 }
 0x25c   :  { %v1050_v40 = vsel %vm1000_vm1, %v929_v9, %v1025_v34  ;;  %v932_v39 = vadd.f32 %v6535_v19, %v931_v35 }
 0x25d   :  { %v5082_v41 = vpop.f32.mrf.mxu1  ;;  %v1135_v42 = vpack.c.bf16 %v1115_v37, %v1114_v36  ;;  %v1083_v45 = vmul.f32 %v6543_v38, %v1050_v40 }
 0x25e   :  { %vm1001_vm2 = vcmp.gt.f32.partialorder %v932_v39, 0.0  ;;  %v1026_v44 = vmul.f32 0.01, %v932_v39 }
 0x25f   :  { %v936_v46 = vpop.f32.mrf.mxu1  ;;  %5144 = vmatmul.mubr.bf16.gmra.mxu0 %v1135_v42  ;;  %v1116_v43 = vadd.f32 %v6551_v58, %v1083_v45 }
 0x260   :  { %v1051_v47 = vsel %vm1001_vm2, %v932_v39, %v1026_v44  ;;  %v937_v48 = vadd.f32 %v6535_v19, %v936_v46  ;;  %5147 = vmatprep.mubr.msk.bf16.mxu0 %vm5969_vm0, %v5968_v1  ;;  %v5739_v44 = vld [vmem:[#allocation3 + $0x130] sm:$0xff]  }
 0x261   :  { %v1084_v50 = vmul.f32 %v6543_v38, %v1051_v47  ;;  %v5085_v54 = vpop.f32.mrf.mxu1  ;;  %5262 = vmatpush3.bf16.msra.mxu0 %v5739_v44  ;;  %v6672_v44 = vld [vmem:[%s7152_s4 + $0x3] ss:$0 sm:$0xff] }
 0x262   :  { %vm1002_vm3 = vcmp.gt.f32.partialorder %v937_v48, 0.0  ;;  %v1027_v53 = vmul.f32 0.01, %v937_v48  ;;  %5263 = vmatprep.subr.bf16.mxu0 %v5968_v1 }
 0x263   :  { %v939_v8 = vpop.f32.mrf.mxu1  ;;  %v1117_v49 = vadd.f32 %v6551_v58, %v1084_v50 }
 0x264   :  { %v1052_v55 = vsel %vm1002_vm3, %v937_v48, %v1027_v53  ;;  %v940_v56 = vadd.f32 %v6535_v19, %v939_v8  ;;  %v5741_v8 = vld [vmem:[#allocation3 + $0x128] sm:$0xff]  }
 0x265   :  { %v5086_v57 = vpop.f32.mrf.mxu1  ;;  %v1136_v60 = vpack.c.bf16 %v1117_v49, %v1116_v43  ;;  %v1085_v63 = vmul.f32 %v6543_v38, %v1052_v55  ;;  %5264 = vmatpush3.bf16.msra.mxu0 %v5741_v8 }
 0x266   :  { %vm1003_vm4 = vcmp.gt.f32.partialorder %v940_v56, 0.0  ;;  %v1028_v62 = vmul.f32 0.01, %v940_v56  ;;  %5265 = vmatprep.subr.bf16.mxu0 %v5968_v1 }
 0x267   :  { %v944_v0 = vpop.f32.mrf.mxu1  ;;  %5148 = vmatmul.mubr.bf16.gmra.mxu0 %v1136_v60  ;;  %v1118_v12 = vadd.f32 %v6551_v58, %v1085_v63 }
 0x268   :  { %v1053_v2 = vsel %vm1003_vm4, %v940_v56, %v1028_v62  ;;  %v945_v3 = vadd.f32 %v6535_v19, %v944_v0  ;;  %5151 = vmatprep.mubr.msk.bf16.mxu0 %vm5969_vm0, %v5968_v1  ;;  %v5740_v0 = vld [vmem:[#allocation3 + $0x40] sm:$0xff]  }
 0x269   :  { %v1086_v4 = vmul.f32 %v6543_v38, %v1053_v2  ;;  %v5089_v5 = vpop.f32.mrf.mxu1  ;;  %v5742_v2 = vld [vmem:[#allocation3 + $0x120] sm:$0xff]   ;;  %5194 = vmatpush3.bf16.msra.mxu1 %v5740_v0  ;;  %v5748_v0 = vld [vmem:[#allocation3 + $0x28] sm:$0xff]  }
 0x26a   :  { %vm1004_vm5 = vcmp.gt.f32.partialorder %v945_v3, 0.0  ;;  %v1029_v6 = vmul.f32 0.01, %v945_v3  ;;  %5266 = vmatpush3.bf16.msra.mxu0 %v5742_v2  ;;  %5199 = vmatprep.subr.bf16.mxu1 %v5968_v1 }
 0x26b   :  { %v947_v11 = vpop.f32.mrf.mxu1  ;;  %v1119_v13 = vadd.f32 %v6551_v58, %v1086_v4  ;;  %5267 = vmatprep.subr.bf16.mxu0 %v5968_v1 }
 0x26c   :  { %v1054_v14 = vsel %vm1004_vm5, %v945_v3, %v1029_v6  ;;  %v948_v61 = vadd.f32 %v6535_v19, %v947_v11 }
 0x26d   :  { %v5090_v15 = vpop.f32.mrf.mxu1  ;;  %v1137_v16 = vpack.c.bf16 %v1119_v13, %v1118_v12  ;;  %v1087_v10 = vmul.f32 %v6543_v38, %v1054_v14  ;;  %v5743_v14 = vld [vmem:[#allocation3 + $0x118] sm:$0xff]  }
 0x26e   :  { %vm1005_vm6 = vcmp.gt.f32.partialorder %v948_v61, 0.0  ;;  %v1030_v17 = vmul.f32 0.01, %v948_v61  ;;  %5268 = vmatpush3.bf16.msra.mxu0 %v5743_v14 }
 0x26f   :  { %v952_v18 = vpop.f32.mrf.mxu1  ;;  %5152 = vmatmul.mubr.bf16.gmra.mxu0 %v1137_v16  ;;  %v1120_v26 = vadd.f32 %v6551_v58, %v1087_v10  ;;  %5269 = vmatprep.subr.bf16.mxu0 %v5968_v1 }
 0x270   :  { %v1055_v20 = vsel %vm1005_vm6, %v948_v61, %v1030_v17  ;;  %v953_v21 = vadd.f32 %v6535_v19, %v952_v18  ;;  %5155 = vmatprep.mubr.msk.bf16.mxu0 %vm5969_vm0, %v5968_v1 }
 0x271   :  { %v1088_v22 = vmul.f32 %v6543_v38, %v1055_v20  ;;  %v5093_v23 = vpop.f32.mrf.mxu1 }
 0x272   :  { %vm1006_vm7 = vcmp.gt.f32.partialorder %v953_v21, 0.0  ;;  %v1031_v24 = vmul.f32 0.01, %v953_v21  ;;  %v5745_v23 = vld [vmem:[#allocation3 + $0x110] sm:$0xff]  }
 0x273   :  { %v955_v25 = vpop.f32.mrf.mxu1  ;;  %v1121_v27 = vadd.f32 %v6551_v58, %v1088_v22  ;;  %5270 = vmatpush3.bf16.msra.mxu0 %v5745_v23 }
 0x274   :  { %v1056_v51 = vsel %vm1006_vm7, %v953_v21, %v1031_v24  ;;  %v956_v52 = vadd.f32 %v6535_v19, %v955_v25  ;;  %5271 = vmatprep.subr.bf16.mxu0 %v5968_v1 }
 0x275   :  { %v5094_v28 = vpop.f32.mrf.mxu1  ;;  %v1138_v29 = vpack.c.bf16 %v1121_v27, %v1120_v26  ;;  %v1089_v31 = vmul.f32 %v6543_v38, %v1056_v51 }
 0x276   :  { %vm1007_vm8 = vcmp.gt.f32.partialorder %v956_v52, 0.0  ;;  %v1032_v30 = vmul.f32 0.01, %v956_v52 }
 0x277   :  { %v960_v7 = vpop.f32.mrf.mxu1  ;;  %5156 = vmatmul.mubr.bf16.gmra.mxu0 %v1138_v29  ;;  %v1122_v36 = vadd.f32 %v6551_v58, %v1089_v31  ;;  %v5747_v29 = vld [vmem:[#allocation3 + $0x108] sm:$0xff]  }
 0x278   :  { %v1057_v59 = vsel %vm1007_vm8, %v956_v52, %v1032_v30  ;;  %v961_v9 = vadd.f32 %v6535_v19, %v960_v7  ;;  %5159 = vmatprep.mubr.msk.bf16.mxu0 %vm5969_vm0, %v5968_v1  ;;  %5272 = vmatpush3.bf16.msra.mxu0 %v5747_v29  ;;  %v5758_v29 = vld [vmem:[#allocation3] sm:$0xff]  }
 0x279   :  { %v1090_v32 = vmul.f32 %v6543_v38, %v1057_v59  ;;  %v5097_v33 = vpop.f32.mrf.mxu1  ;;  %5273 = vmatprep.subr.bf16.mxu0 %v5968_v1 }
 0x27a   :  { %vm1008_vm9 = vcmp.gt.f32.partialorder %v961_v9, 0.0  ;;  %v1033_v34 = vmul.f32 0.01, %v961_v9  ;;  %v5749_v33 = vld [vmem:[#allocation3 + $0x100] sm:$0xff]  }
 0x27b   :  { %v963_v35 = vpop.f32.mrf.mxu1  ;;  %v1123_v37 = vadd.f32 %v6551_v58, %v1090_v32 }
 0x27c   :  { %v1058_v40 = vsel %vm1008_vm9, %v961_v9, %v1033_v34  ;;  %v964_v39 = vadd.f32 %v6535_v19, %v963_v35  ;;  %5274 = vmatpush3.bf16.msra.mxu0 %v5749_v33 }
 0x27d   :  { %v5098_v41 = vpop.f32.mrf.mxu1  ;;  %v1139_v42 = vpack.c.bf16 %v1123_v37, %v1122_v36  ;;  %v1091_v46 = vmul.f32 %v6543_v38, %v1058_v40  ;;  %5299 = vmatprep.subr.bf16.mxu0 %v5968_v1  ;;  %v6664_v37 = vld [vmem:[%s7151_s3 + $0x3] ss:$0 sm:$0xff] }
 0x27e   :  { %vm1009_vm10 = vcmp.gt.f32.partialorder %v964_v39, 0.0  ;;  %v1034_v45 = vmul.f32 0.01, %v964_v39 }
 0x27f   :  { %v968_v47 = vpop.f32.mrf.mxu1  ;;  %5160 = vmatmul.mubr.bf16.gmra.mxu0 %v1139_v42  ;;  %v1124_v55 = vadd.f32 %v6551_v58, %v1091_v46 }
 0x280   :  { %v1059_v48 = vsel %vm1009_vm10, %v964_v39, %v1034_v45  ;;  %v969_v50 = vadd.f32 %v6535_v19, %v968_v47  ;;  %5163 = vmatprep.mubr.msk.bf16.mxu0 %vm5969_vm0, %v5968_v1 }
 0x281   :  { %v1092_v54 = vmul.f32 %v6543_v38, %v1059_v48  ;;  %v5101_v53 = vpop.f32.mrf.mxu1  ;;  %v6678_v48 = vld [vmem:[%s7153_s5 + $0x3] ss:$0 sm:$0xff] }
 0x282   :  { %vm1010_vm11 = vcmp.gt.f32.partialorder %v969_v50, 0.0  ;;  %v1035_v43 = vmul.f32 0.01, %v969_v50  ;;  %v5744_v53 = vld [vmem:[#allocation3 + $0x38] sm:$0xff]  }
 0x283   :  { %v971_v49 = vpop.f32.mrf.mxu1  ;;  %v1125_v56 = vadd.f32 %v6551_v58, %v1092_v54 }
 0x284   :  { %v1060_v57 = vsel %vm1010_vm11, %v969_v50, %v1035_v43  ;;  %v972_v60 = vadd.f32 %v6535_v19, %v971_v49 }
 0x285   :  { %v5102_v62 = vpop.f32.mrf.mxu1  ;;  %v1140_v63 = vpack.c.bf16 %v1125_v56, %v1124_v55  ;;  %v1093_v4 = vmul.f32 %v6543_v38, %v1060_v57  ;;  %v5746_v56 = vld [vmem:[#allocation3 + $0x30] sm:$0xff]  }
 0x286   :  { %vm1011_vm12 = vcmp.gt.f32.partialorder %v972_v60, 0.0  ;;  %v1036_v3 = vmul.f32 0.01, %v972_v60 }
 0x287   :  { %v976_v5 = vpop.f32.mrf.mxu1  ;;  %5164 = vmatmul.mubr.bf16.gmra.mxu0 %v1140_v63  ;;  %v1126_v16 = vadd.f32 %v6551_v58, %v1093_v4 }
 0x288   :  { %v1061_v6 = vsel %vm1011_vm12, %v972_v60, %v1036_v3  ;;  %v977_v11 = vadd.f32 %v6535_v19, %v976_v5  ;;  %5167 = vmatprep.mubr.msk.bf16.mxu0 %vm5969_vm0, %v5968_v1 }
 0x289   :  { %v1094_v12 = vmul.f32 %v6543_v38, %v1061_v6  ;;  %v5105_v13 = vpop.f32.mrf.mxu1  ;;  %v5750_v6 = vld [vmem:[#allocation3 + $0x20] sm:$0xff]  }
 0x28a   :  { %vm1012_vm13 = vcmp.gt.f32.partialorder %v977_v11, 0.0  ;;  %v1037_v61 = vmul.f32 0.01, %v977_v11 }
 0x28b   :  { %v979_v15 = vpop.f32.mrf.mxu1  ;;  %v1127_v17 = vadd.f32 %v6551_v58, %v1094_v12 }
 0x28c   :  { %v1062_v10 = vsel %vm1012_vm13, %v977_v11, %v1037_v61  ;;  %v980_v18 = vadd.f32 %v6535_v19, %v979_v15  ;;  %v5751_v11 = vld [vmem:[#allocation3 + $0x1b8] sm:$0xff]  }
 0x28d   :  { %v5106_v20 = vpop.f32.mrf.mxu1  ;;  %v1141_v21 = vpack.c.bf16 %v1127_v17, %v1126_v16  ;;  %v1095_v24 = vmul.f32 %v6543_v38, %v1062_v10  ;;  %v5752_v15 = vld [vmem:[#allocation3 + $0x18] sm:$0xff]   ;;  %v5753_v16 = vld [vmem:[#allocation3 + $0x1b0] sm:$0xff]  }
 0x28e   :  { %vm1013_vm14 = vcmp.gt.f32.partialorder %v980_v18, 0.0  ;;  %v1038_v22 = vmul.f32 0.01, %v980_v18  ;;  %v5754_v20 = vld [vmem:[#allocation3 + $0x10] sm:$0xff]  }
 0x28f   :  { %v984_v25 = vpop.f32.mrf.mxu1  ;;  %5168 = vmatmul.mubr.bf16.gmra.mxu0 %v1141_v21  ;;  %v1128_v31 = vadd.f32 %v6551_v58, %v1095_v24  ;;  %v5755_v21 = vld [vmem:[#allocation3 + $0x1a8] sm:$0xff]  }
 0x290   :  { %v1063_v26 = vsel %vm1013_vm14, %v980_v18, %v1038_v22  ;;  %v985_v27 = vadd.f32 %v6535_v19, %v984_v25  ;;  %5171 = vmatprep.mubr.msk.bf16.mxu0 %vm5969_vm0, %v5968_v1  ;;  %v5756_v25 = vld [vmem:[#allocation3 + $0x8] sm:$0xff]  }
 0x291   :  { %v1096_v51 = vmul.f32 %v6543_v38, %v1063_v26  ;;  %v5109_v52 = vpop.f32.mrf.mxu1  ;;  %v5757_v26 = vld [vmem:[#allocation3 + $0x1a0] sm:$0xff]  }
 0x292   :  { %vm1014_vm15 = vcmp.gt.f32.partialorder %v985_v27, 0.0  ;;  %v1039_v28 = vmul.f32 0.01, %v985_v27 }
 0x293   :  { %v987_v30 = vpop.f32.mrf.mxu1  ;;  %v1129_v7 = vadd.f32 %v6551_v58, %v1096_v51 }
 0x294   :  { %v1064_v59 = vsel %vm1014_vm15, %v985_v27, %v1039_v28  ;;  %v5759_v30 = vld [vmem:[#allocation3 + $0x198] sm:$0xff]  }
 0x295   :  { %v1097_v19 = vmul.f32 %v6543_v38, %v1064_v59  ;;  %v5110_v9 = vpop.f32.mrf.mxu1  ;;  %v1142_v32 = vpack.c.bf16 %v1129_v7, %v1128_v31 }
 0x296   :  { %v5760_v9 = vld [vmem:[#allocation3 + $0xb8] sm:$0xff]  }
 0x297   :  { %5172 = vmatmul.mubr.bf16.gmra.mxu0 %v1142_v32  ;;  %v1130_v34 = vadd.f32 %v6551_v58, %v1097_v19  ;;  %v5761_v32 = vld [vmem:[#allocation3 + $0x190] sm:$0xff]  }
 0x298   :  { %5175 = vmatprep.mubr.msk.bf16.mxu0 %vm5969_vm0, %v5968_v1 }
 0x299   :  { %v1143_v35 = vpack.c.bf16 %v1130_v34, %v1130_v34 }
 0x29f   :  { %5176 = vmatmul.mubr.bf16.gmra.mxu0 %v1143_v35 }
 0x2a0   :  { %5275 = vmatprep.mubr.msk.bf16.mxu0 %vm5969_vm0, %v5968_v1 }
 0x2ff   :  { %v1251_v38 = vpop.f32.mrf.mxu0 }
 0x300   :  { %v1252_v14 = vadd.f32 %v6664_v37, %v1251_v38 }
 0x301   :  { %v5129_v36 = vpop.f32.mrf.mxu0 }
 0x302   :  { %v1378_v10 = vmul.f32 0.01, %v1252_v14  ;;  %vm1353_vm3 = vcmp.gt.f32.partialorder %v1252_v14, 0.0  ;;  %v5762_v36 = vld [vmem:[#allocation3 + $0xb0] sm:$0xff]  }
 0x303   :  { %v1254_v40 = vpop.f32.mrf.mxu0 }
 0x304   :  { %v1255_v39 = vadd.f32 %v6664_v37, %v1254_v40  ;;  %v1403_v23 = vsel %vm1353_vm3, %v1252_v14, %v1378_v10  ;;  %v5763_v40 = vld [vmem:[#allocation3 + $0x188] sm:$0xff]   ;;  %v5774_v10 = vld [vmem:[#allocation3 + $0x80] sm:$0xff]  }
 0x305   :  { %v5130_v41 = vpop.f32.mrf.mxu0  ;;  %v1436_v27 = vmul.f32 %v6672_v44, %v1403_v23 }
 0x306   :  { %vm1354_vm1 = vcmp.gt.f32.partialorder %v1255_v39, 0.0  ;;  %v1379_v58 = vmul.f32 0.01, %v1255_v39 }
 0x307   :  { %v6667_v42 = vpop.f32.mrf.mxu0  ;;  %v1469_v7 = vadd.f32 %v6678_v48, %v1436_v27 }
 0x308   :  { %v1404_v45 = vsel %vm1354_vm1, %v1255_v39, %v1379_v58 }
 0x309   :  { %v1437_v46 = vmul.f32 %v6672_v44, %v1404_v45  ;;  %v5133_v47 = vpop.f32.mrf.mxu0  ;;  %v1520_v34 = vpack.c.bf16 %v1469_v7, %v1469_v7  ;;  %v5764_v45 = vld [vmem:[#allocation3 + $0xa8] sm:$0xff]  }
 0x30b   :  { %v1470_v50 = vadd.f32 %v6678_v48, %v1437_v46  ;;  %v6681_v54 = vpop.f32.mrf.mxu0  ;;  %v5765_v46 = vld [vmem:[#allocation3 + $0x180] sm:$0xff]  }
 0x30d   :  { %v1538_v8 = vpack.c.bf16 %v1470_v50, %v1470_v50  ;;  %v5134_v43 = vpop.f32.mrf.mxu0 }
 0x30e   :  { %v5767_v43 = vld [vmem:[#allocation3 + $0x238] sm:$0xff]  }
 0x30f   :  { %v1267_v49 = vpop.f32.mrf.mxu0  ;;  %5196 = vmatmul.mubr.bf16.vlgmr.msra.gmra.mxu1 %v1538_v8  ;;  %v5766_v8 = vld [vmem:[#allocation3 + $0xa0] sm:$0xff]  }
 0x310   :  { %v1268_v55 = vadd.f32 %v6664_v37, %v1267_v49  ;;  %5200 = vmatpush3.bf16.msra.mxu1 %v5744_v53  ;;  %5215 = vmatprep.mubr.msk.bf16.mxu1 %vm5969_vm0, %v5968_v1 }
 0x311   :  { %v5137_v57 = vpop.f32.mrf.mxu0  ;;  %5201 = vmatprep.subr.bf16.mxu1 %v5968_v1 }
 0x312   :  { %vm1357_vm2 = vcmp.gt.f32.partialorder %v1268_v55, 0.0  ;;  %v1382_v60 = vmul.f32 0.01, %v1268_v55 }
 0x313   :  { %v6687_v62 = vpop.f32.mrf.mxu0 }
 0x314   :  { %v1407_v63 = vsel %vm1357_vm2, %v1268_v55, %v1382_v60  ;;  %5202 = vmatpush3.bf16.msra.mxu1 %v5746_v56  ;;  %v1260_v56 = vadd.f32 %v6664_v37, %v6667_v42  ;;  %v5768_v60 = vld [vmem:[#allocation3 + $0x98] sm:$0xff]   ;;  %v5770_v42 = vld [vmem:[#allocation3 + $0x90] sm:$0xff]  }
 0x315   :  { %v1440_v2 = vmul.f32 %v6672_v44, %v1407_v63  ;;  %v5138_v3 = vpop.f32.mrf.mxu0  ;;  %5203 = vmatprep.subr.bf16.mxu1 %v5968_v1  ;;  %v5769_v63 = vld [vmem:[#allocation3 + $0x230] sm:$0xff]  }
 0x316   :  { %vm1355_vm5 = vcmp.gt.f32.partialorder %v1260_v56, 0.0 }
 0x317   :  { %v1473_v4 = vadd.f32 %v6678_v48, %v1440_v2  ;;  %v1275_v5 = vpop.f32.mrf.mxu0  ;;  %v1380_v2 = vmul.f32 0.01, %v1260_v56 }
 0x318   :  { %5204 = vmatpush3.bf16.msra.mxu1 %v5748_v0  ;;  %v1276_v52 = vadd.f32 %v6664_v37, %v1275_v5 }
 0x319   :  { %v1949_v12 = vpack.c.bf16 %v1473_v4, %v1473_v4  ;;  %v5141_v13 = vpop.f32.mrf.mxu0  ;;  %5205 = vmatprep.subr.bf16.mxu1 %v5968_v1  ;;  %v5771_v4 = vld [vmem:[#allocation3 + $0x228] sm:$0xff]  }
 0x31a   :  { %v1384_v59 = vmul.f32 0.01, %v1276_v52  ;;  %vm1359_vm4 = vcmp.gt.f32.partialorder %v1276_v52, 0.0  ;;  %v5773_v13 = vld [vmem:[#allocation3 + $0x220] sm:$0xff]  }
 0x31b   :  { %v6694_v61 = vpop.f32.mrf.mxu0  ;;  %5276 = vmatmul.mubr.bf16.vlgmr.msra.gmra.mxu0 %v1949_v12  ;;  %v5772_v12 = vld [vmem:[#allocation3 + $0x88] sm:$0xff]  }
 0x31c   :  { %5206 = vmatpush3.bf16.msra.mxu1 %v5750_v6  ;;  %5300 = vmatpush3.bf16.msra.mxu0 %v5751_v11  ;;  %v1409_v35 = vsel %vm1359_vm4, %v1276_v52, %v1384_v59  ;;  %v1405_v6 = vsel %vm1355_vm5, %v1260_v56, %v1380_v2  ;;  %v5787_v56 = vld [vmem:[#allocation3 + $0x2a8] sm:$0xff]  }
 0x31d   :  { %v5142_v17 = vpop.f32.mrf.mxu0  ;;  %5207 = vmatprep.subr.bf16.mxu1 %v5968_v1  ;;  %5301 = vmatprep.subr.bf16.mxu0 %v5968_v1  ;;  %v1442_v39 = vmul.f32 %v6672_v44, %v1409_v35  ;;  %v1438_v14 = vmul.f32 %v6672_v44, %v1405_v6  ;;  %v5788_v2 = vld [vmem:[#allocation3 + $0xc8] sm:$0xff]  }
 0x31e   :  { %5315 = vmatprep.mubr.msk.bf16.mxu0 %vm5969_vm0, %v5968_v1 }
 0x31f   :  { %v6700_v18 = vpop.f32.mrf.mxu0  ;;  %v1475_v50 = vadd.f32 %v6678_v48, %v1442_v39  ;;  %v5783_v39 = vld [vmem:[#allocation3 + $0x2b8] sm:$0xff]  }
 0x320   :  { %5208 = vmatpush3.bf16.msra.mxu1 %v5752_v15  ;;  %5302 = vmatpush3.bf16.msra.mxu0 %v5753_v16  ;;  %v1284_v16 = vadd.f32 %v6664_v37, %v6700_v18  ;;  %v5776_v18 = vld [vmem:[#allocation3 + $0xf8] sm:$0xff]  }
 0x321   :  { %v5145_v22 = vpop.f32.mrf.mxu0  ;;  %5209 = vmatprep.subr.bf16.mxu1 %v5968_v1  ;;  %5303 = vmatprep.subr.bf16.mxu0 %v5968_v1  ;;  %v2165_v55 = vpack.c.bf16 %v1475_v50, %v1475_v50  ;;  %v5784_v50 = vld [vmem:[#allocation3 + $0xd8] sm:$0xff]  }
 0x322   :  { %v1471_v22 = vadd.f32 %v6678_v48, %v1438_v14  ;;  %v1386_v23 = vmul.f32 0.01, %v1284_v16  ;;  %vm1361_vm6 = vcmp.gt.f32.partialorder %v1284_v16, 0.0 }
 0x323   :  { %v6704_v24 = vpop.f32.mrf.mxu0 }
 0x324   :  { %5210 = vmatpush3.bf16.msra.mxu1 %v5754_v20  ;;  %5304 = vmatpush3.bf16.msra.mxu0 %v5755_v21  ;;  %v5775_v20 = vld [vmem:[#allocation3 + $0x218] sm:$0xff]   ;;  %v1411_v52 = vsel %vm1361_vm6, %v1284_v16, %v1386_v23 }
 0x325   :  { %v5146_v51 = vpop.f32.mrf.mxu0  ;;  %5211 = vmatprep.subr.bf16.mxu1 %v5968_v1  ;;  %5305 = vmatprep.subr.bf16.mxu0 %v5968_v1  ;;  %v1444_v7 = vmul.f32 %v6672_v44, %v1411_v52  ;;  %v5792_v16 = vld [vmem:[#allocation3 + $0x178] sm:$0xff]  }
 0x326   :  { %v1733_v51 = vpack.c.bf16 %v1471_v22, %v1471_v22  ;;  %v5795_v22 = vld [vmem:[#allocation3 + $0x288] sm:$0xff]   ;;  %v5799_v52 = vld [vmem:[#allocation3 + $0x338] sm:$0xff]  }
 0x327   :  { %v6710_v28 = vpop.f32.mrf.mxu0 }
 0x328   :  { %5212 = vmatpush3.bf16.msra.mxu1 %v5756_v25  ;;  %5306 = vmatpush3.bf16.msra.mxu0 %v5757_v26  ;;  %v5777_v26 = vld [vmem:[#allocation3 + $0x210] sm:$0xff]   ;;  %v1292_v6 = vadd.f32 %v6664_v37, %v6710_v28 }
 0x329   :  { %v5149_v31 = vpop.f32.mrf.mxu0  ;;  %5213 = vmatprep.subr.bf16.mxu1 %v5968_v1  ;;  %5307 = vmatprep.subr.bf16.mxu0 %v5968_v1 }
 0x32a   :  { %v5779_v31 = vld [vmem:[#allocation3 + $0x208] sm:$0xff]   ;;  %vm1363_vm8 = vcmp.gt.f32.partialorder %v1292_v6, 0.0 }
 0x32b   :  { %v6715_v19 = vpop.f32.mrf.mxu0 }
 0x32c   :  { %5214 = vmatpush3.bf16.msra.mxu1 %v5758_v29  ;;  %5308 = vmatpush3.bf16.msra.mxu0 %v5759_v30  ;;  %v5778_v30 = vld [vmem:[#allocation3 + $0xf0] sm:$0xff]  }
 0x32d   :  { %v5150_v33 = vpop.f32.mrf.mxu0  ;;  %5219 = vmatprep.subr.bf16.mxu1 %v5968_v1  ;;  %5309 = vmatprep.subr.bf16.mxu0 %v5968_v1 }
 0x32e   :  { %v5781_v33 = vld [vmem:[#allocation3 + $0x200] sm:$0xff]  }
 0x32f   :  { %5216 = vmatmul.mubr.bf16.vlgmr.msra.gmra.mxu1 %v1520_v34  ;;  %v6719_v38 = vpop.f32.mrf.mxu0  ;;  %v1477_v34 = vadd.f32 %v6678_v48, %v1444_v7  ;;  %v5800_v7 = vld [vmem:[#allocation3 + $0x158] sm:$0xff]  }
 0x330   :  { %5220 = vmatpush3.bf16.msra.mxu1 %v5760_v9  ;;  %5310 = vmatpush3.bf16.msra.mxu0 %v5761_v32  ;;  %v5780_v32 = vld [vmem:[#allocation3 + $0xe8] sm:$0xff]  }
 0x331   :  { %v5153_v41 = vpop.f32.mrf.mxu0  ;;  %5221 = vmatprep.subr.bf16.mxu1 %v5968_v1  ;;  %5311 = vmatprep.subr.bf16.mxu0 %v5968_v1 }
 0x332   :  { %5235 = vmatprep.mubr.msk.bf16.mxu1 %vm5969_vm0, %v5968_v1  ;;  %v2381_v41 = vpack.c.bf16 %v1477_v34, %v1477_v34  ;;  %v5803_v34 = vld [vmem:[#allocation3 + $0x328] sm:$0xff]  }
 0x333   :  { %v6726_v58 = vpop.f32.mrf.mxu0 }
 0x334   :  { %5222 = vmatpush3.bf16.msra.mxu1 %v5762_v36  ;;  %5312 = vmatpush3.bf16.msra.mxu0 %v5763_v40  ;;  %v5782_v40 = vld [vmem:[#allocation3 + $0xe0] sm:$0xff]  }
 0x335   :  { %v5154_v47 = vpop.f32.mrf.mxu0  ;;  %5223 = vmatprep.subr.bf16.mxu1 %v5968_v1  ;;  %5313 = vmatprep.subr.bf16.mxu0 %v5968_v1 }
 0x337   :  { %v6731_v53 = vpop.f32.mrf.mxu0 }
 0x338   :  { %5224 = vmatpush3.bf16.msra.mxu1 %v5764_v45  ;;  %5314 = vmatpush3.bf16.msra.mxu0 %v5765_v46  ;;  %v1263_v46 = vadd.f32 %v6664_v37, %v6681_v54  ;;  %v5786_v54 = vld [vmem:[#allocation3 + $0xd0] sm:$0xff]  }
 0x339   :  { %v5157_v49 = vpop.f32.mrf.mxu0  ;;  %5225 = vmatprep.subr.bf16.mxu1 %v5968_v1  ;;  %5339 = vmatprep.subr.bf16.mxu0 %v5968_v1 }
 0x33a   :  { %v1381_v49 = vmul.f32 0.01, %v1263_v46  ;;  %vm1356_vm7 = vcmp.gt.f32.partialorder %v1263_v46, 0.0 }
 0x33b   :  { %5316 = vmatmul.mubr.bf16.vlgmr.msra.gmra.mxu0 %v2165_v55  ;;  %v6737_v57 = vpop.f32.mrf.mxu0 }
 0x33c   :  { %5226 = vmatpush3.bf16.msra.mxu1 %v5766_v8  ;;  %5340 = vmatpush3.bf16.msra.mxu0 %v5767_v43  ;;  %v5785_v8 = vld [vmem:[#allocation3 + $0x2b0] sm:$0xff]  }
 0x33d   :  { %v5158_v0 = vpop.f32.mrf.mxu0  ;;  %5227 = vmatprep.subr.bf16.mxu1 %v5968_v1  ;;  %5341 = vmatprep.subr.bf16.mxu0 %v5968_v1 }
 0x33e   :  { %5355 = vmatprep.mubr.msk.bf16.mxu0 %vm5969_vm0, %v5968_v1 }
 0x33f   :  { %v6743_v3 = vpop.f32.mrf.mxu0 }
 0x340   :  { %5228 = vmatpush3.bf16.msra.mxu1 %v5768_v60  ;;  %5342 = vmatpush3.bf16.msra.mxu0 %v5769_v63  ;;  %v1406_v63 = vsel %vm1356_vm7, %v1263_v46, %v1381_v49  ;;  %v5807_v46 = vld [vmem:[#allocation3 + $0x318] sm:$0xff]   ;;  %v5809_v49 = vld [vmem:[#allocation3 + $0x310] sm:$0xff]  }
 0x341   :  { %v5161_v5 = vpop.f32.mrf.mxu0  ;;  %5229 = vmatprep.subr.bf16.mxu1 %v5968_v1  ;;  %5343 = vmatprep.subr.bf16.mxu0 %v5968_v1 }
 0x343   :  { %v6747_v11 = vpop.f32.mrf.mxu0 }
 0x344   :  { %5230 = vmatpush3.bf16.msra.mxu1 %v5770_v42  ;;  %5344 = vmatpush3.bf16.msra.mxu0 %v5771_v4  ;;  %v5789_v42 = vld [vmem:[#allocation3 + $0x2a0] sm:$0xff]   ;;  %v1439_v4 = vmul.f32 %v6672_v44, %v1406_v63 }
 0x345   :  { %v5162_v15 = vpop.f32.mrf.mxu0  ;;  %5231 = vmatprep.subr.bf16.mxu1 %v5968_v1  ;;  %5345 = vmatprep.subr.bf16.mxu0 %v5968_v1 }
 0x346   :  { %v1472_v14 = vadd.f32 %v6678_v48, %v1439_v4  ;;  %v1388_v15 = vmul.f32 0.01, %v1292_v6  ;;  %v5814_v4 = vld [vmem:[#allocation3 + $0x1e0] sm:$0xff]  }
 0x347   :  { %v6754_v17 = vpop.f32.mrf.mxu0 }
 0x348   :  { %5232 = vmatpush3.bf16.msra.mxu1 %v5772_v12  ;;  %5346 = vmatpush3.bf16.msra.mxu0 %v5773_v13  ;;  %v5790_v12 = vld [vmem:[#allocation3 + $0xc0] sm:$0xff]   ;;  %v5791_v13 = vld [vmem:[#allocation3 + $0x298] sm:$0xff]   ;;  %v1413_v28 = vsel %vm1363_vm8, %v1292_v6, %v1388_v15 }
 0x349   :  { %v5165_v21 = vpop.f32.mrf.mxu0  ;;  %5233 = vmatprep.subr.bf16.mxu1 %v5968_v1  ;;  %5347 = vmatprep.subr.bf16.mxu0 %v5968_v1  ;;  %v1446_v23 = vmul.f32 %v6672_v44, %v1413_v28  ;;  %v5821_v28 = vld [vmem:[#allocation3 + $0x3a0] sm:$0xff]  }
 0x34a   :  { %v5794_v21 = vld [vmem:[#allocation3 + $0x170] sm:$0xff]  }
 0x34b   :  { %v6759_v25 = vpop.f32.mrf.mxu0 }
 0x34c   :  { %5234 = vmatpush3.bf16.msra.mxu1 %v5774_v10  ;;  %5348 = vmatpush3.bf16.msra.mxu0 %v5775_v20  ;;  %v5793_v10 = vld [vmem:[#allocation3 + $0x290] sm:$0xff]   ;;  %v1841_v20 = vpack.c.bf16 %v1472_v14, %v1472_v14 }
 0x34d   :  { %v5166_v27 = vpop.f32.mrf.mxu0  ;;  %5239 = vmatprep.subr.bf16.mxu1 %v5968_v1  ;;  %5349 = vmatprep.subr.bf16.mxu0 %v5968_v1  ;;  %v5817_v14 = vld [vmem:[#allocation3 + $0x3b0] sm:$0xff]  }
 0x34e   :  { %v1479_v27 = vadd.f32 %v6678_v48, %v1446_v23  ;;  %v5822_v23 = vld [vmem:[#allocation3 + $0x1c0] sm:$0xff]  }
 0x34f   :  { %5236 = vmatmul.mubr.bf16.vlgmr.msra.gmra.mxu1 %v1733_v51  ;;  %v6763_v29 = vpop.f32.mrf.mxu0  ;;  %v5798_v51 = vld [vmem:[#allocation3 + $0x160] sm:$0xff]  }
 0x350   :  { %5240 = vmatpush3.bf16.msra.mxu1 %v5776_v18  ;;  %5350 = vmatpush3.bf16.msra.mxu0 %v5777_v26  ;;  %v5796_v18 = vld [vmem:[#allocation3 + $0x168] sm:$0xff]   ;;  %v5797_v26 = vld [vmem:[#allocation3 + $0x280] sm:$0xff]  }
 0x351   :  { %v5169_v59 = vpop.f32.mrf.mxu0  ;;  %5241 = vmatprep.subr.bf16.mxu1 %v5968_v1  ;;  %5351 = vmatprep.subr.bf16.mxu0 %v5968_v1 }
 0x352   :  { %5255 = vmatprep.mubr.msk.bf16.mxu1 %vm5969_vm0, %v5968_v1  ;;  %v5801_v59 = vld [vmem:[#allocation3 + $0x330] sm:$0xff]  }
 0x353   :  { %v6770_v9 = vpop.f32.mrf.mxu0 }
 0x354   :  { %5242 = vmatpush3.bf16.msra.mxu1 %v5778_v30  ;;  %5352 = vmatpush3.bf16.msra.mxu0 %v5779_v31  ;;  %v2597_v30 = vpack.c.bf16 %v1479_v27, %v1479_v27  ;;  %v1271_v31 = vadd.f32 %v6664_v37, %v6687_v62 }
 0x355   :  { %v5170_v35 = vpop.f32.mrf.mxu0  ;;  %5243 = vmatprep.subr.bf16.mxu1 %v5968_v1  ;;  %5353 = vmatprep.subr.bf16.mxu0 %v5968_v1 }
 0x356   :  { %vm1358_vm9 = vcmp.gt.f32.partialorder %v1271_v31, 0.0  ;;  %v5804_v35 = vld [vmem:[#allocation3 + $0x148] sm:$0xff]  }
 0x357   :  { %v6775_v36 = vpop.f32.mrf.mxu0 }
 0x358   :  { %5244 = vmatpush3.bf16.msra.mxu1 %v5780_v32  ;;  %5354 = vmatpush3.bf16.msra.mxu0 %v5781_v33  ;;  %v1383_v32 = vmul.f32 0.01, %v1271_v31  ;;  %v5802_v33 = vld [vmem:[#allocation3 + $0x150] sm:$0xff]  }
 0x359   :  { %v5173_v45 = vpop.f32.mrf.mxu0  ;;  %5245 = vmatprep.subr.bf16.mxu1 %v5968_v1  ;;  %5379 = vmatprep.subr.bf16.mxu0 %v5968_v1 }
 0x35a   :  { %v1408_v62 = vsel %vm1358_vm9, %v1271_v31, %v1383_v32  ;;  %v5806_v45 = vld [vmem:[#allocation3 + $0x140] sm:$0xff]   ;;  %v5826_v31 = vld [vmem:[#allocation3 + $0x270] sm:$0xff]   ;;  %v5828_v32 = vld [vmem:[#allocation3 + $0x268] sm:$0xff]  }
 0x35b   :  { %5356 = vmatmul.mubr.bf16.vlgmr.msra.gmra.mxu0 %v2381_v41  ;;  %v6781_v47 = vpop.f32.mrf.mxu0  ;;  %v1300_v41 = vadd.f32 %v6664_v37, %v6719_v38 }
 0x35c   :  { %5246 = vmatpush3.bf16.msra.mxu1 %v5782_v40  ;;  %5380 = vmatpush3.bf16.msra.mxu0 %v5783_v39  ;;  %v5805_v40 = vld [vmem:[#allocation3 + $0x320] sm:$0xff]   ;;  %v1441_v39 = vmul.f32 %v6672_v44, %v1408_v62 }
 0x35d   :  { %v5174_v43 = vpop.f32.mrf.mxu0  ;;  %5247 = vmatprep.subr.bf16.mxu1 %v5968_v1  ;;  %5381 = vmatprep.subr.bf16.mxu0 %v5968_v1  ;;  %vm1365_vm10 = vcmp.gt.f32.partialorder %v1300_v41, 0.0  ;;  %v5830_v62 = vld [vmem:[#allocation3 + $0x260] sm:$0xff]  }
 0x35e   :  { %5395 = vmatprep.mubr.msk.bf16.mxu0 %vm5969_vm0, %v5968_v1  ;;  %v5808_v43 = vld [vmem:[#allocation3 + $0x1f8] sm:$0xff]  }
 0x35f   :  { %v6787_v55 = vpop.f32.mrf.mxu0 }
 0x360   :  { %5248 = vmatpush3.bf16.msra.mxu1 %v5784_v50  ;;  %5382 = vmatpush3.bf16.msra.mxu0 %v5785_v8  ;;  %v1474_v50 = vadd.f32 %v6678_v48, %v1441_v39  ;;  %v1390_v8 = vmul.f32 0.01, %v1300_v41  ;;  %v1287_v39 = vadd.f32 %v6664_v37, %v6704_v24 }
 0x361   :  { %v5177_v60 = vpop.f32.mrf.mxu0  ;;  %5249 = vmatprep.subr.bf16.mxu1 %v5968_v1  ;;  %5383 = vmatprep.subr.bf16.mxu0 %v5968_v1 }
 0x362   :  { %v1415_v38 = vsel %vm1365_vm10, %v1300_v41, %v1390_v8  ;;  %v5811_v60 = vld [vmem:[#allocation3 + $0x308] sm:$0xff]   ;;  %v5832_v41 = vld [vmem:[#allocation3 + $0x258] sm:$0xff]   ;;  %vm1362_vm13 = vcmp.gt.f32.partialorder %v1287_v39, 0.0 }
 0x363   :  { %v1350_v0 = vpop.f32.mrf.mxu0  ;;  %v1448_v63 = vmul.f32 %v6672_v44, %v1415_v38  ;;  %v5835_v8 = vld [vmem:[#allocation3 + $0x428] sm:$0xff]   ;;  %v1316_v38 = vadd.f32 %v6664_v37, %v6743_v3 }
 0x364   :  { %5250 = vmatpush3.bf16.msra.mxu1 %v5786_v54  ;;  %5384 = vmatpush3.bf16.msra.mxu0 %v5787_v56  ;;  %v2057_v54 = vpack.c.bf16 %v1474_v50, %v1474_v50  ;;  %v5810_v56 = vld [vmem:[#allocation3 + $0x1f0] sm:$0xff]   ;;  %v5812_v0 = vld [vmem:[#allocation3 + $0x1e8] sm:$0xff]  }
 0x365   :  { %v5178_v5 = vpop.f32.mrf.mxu0  ;;  %5251 = vmatprep.subr.bf16.mxu1 %v5968_v1  ;;  %5385 = vmatprep.subr.bf16.mxu0 %v5968_v1  ;;  %v5834_v50 = vld [vmem:[#allocation3 + $0x250] sm:$0xff]   ;;  %vm1369_vm14 = vcmp.gt.f32.partialorder %v1316_v38, 0.0 }
 0x366   :  { %v5815_v5 = vld [vmem:[#allocation3 + $0x3b8] sm:$0xff]  }
 0x368   :  { %5252 = vmatpush3.bf16.msra.mxu1 %v5788_v2  ;;  %5386 = vmatpush3.bf16.msra.mxu0 %v5789_v42  ;;  %v5813_v2 = vld [vmem:[#allocation3 + $0x300] sm:$0xff]   ;;  %v1481_v42 = vadd.f32 %v6678_v48, %v1448_v63 }
 0x369   :  { %5253 = vmatprep.subr.bf16.mxu1 %v5968_v1  ;;  %5387 = vmatprep.subr.bf16.mxu0 %v5968_v1 }
 0x36a   :  { %v2813_v6 = vpack.c.bf16 %v1481_v42, %v1481_v42  ;;  %v5841_v42 = vld [vmem:[#allocation3 + $0x410] sm:$0xff]  }
 0x36c   :  { %5254 = vmatpush3.bf16.msra.mxu1 %v5790_v12  ;;  %5388 = vmatpush3.bf16.msra.mxu0 %v5791_v13  ;;  %v1279_v12 = vadd.f32 %v6664_v37, %v6694_v61  ;;  %v5816_v13 = vld [vmem:[#allocation3 + $0x1d8] sm:$0xff]  }
 0x36d   :  { %5279 = vmatprep.subr.bf16.mxu1 %v5968_v1  ;;  %5389 = vmatprep.subr.bf16.mxu0 %v5968_v1 }
 0x36e   :  { %v1385_v15 = vmul.f32 0.01, %v1279_v12  ;;  %vm1360_vm11 = vcmp.gt.f32.partialorder %v1279_v12, 0.0 }
 0x36f   :  { %5256 = vmatmul.mubr.bf16.vlgmr.msra.gmra.mxu1 %v1841_v20  ;;  %v5820_v20 = vld [vmem:[#allocation3 + $0x1c8] sm:$0xff]  }
 0x370   :  { %5280 = vmatpush3.bf16.msra.mxu1 %v5792_v16  ;;  %5390 = vmatpush3.bf16.msra.mxu0 %v5793_v10  ;;  %v5818_v16 = vld [vmem:[#allocation3 + $0x1d0] sm:$0xff]   ;;  %v5819_v10 = vld [vmem:[#allocation3 + $0x3a8] sm:$0xff]   ;;  %v1410_v61 = vsel %vm1360_vm11, %v1279_v12, %v1385_v15 }
 0x371   :  { %5281 = vmatprep.subr.bf16.mxu1 %v5968_v1  ;;  %5391 = vmatprep.subr.bf16.mxu0 %v5968_v1  ;;  %v5843_v12 = vld [vmem:[#allocation3 + $0x408] sm:$0xff]  }
 0x372   :  { %5295 = vmatprep.mubr.msk.bf16.mxu1 %vm5969_vm0, %v5968_v1 }
 0x374   :  { %5282 = vmatpush3.bf16.msra.mxu1 %v5794_v21  ;;  %5392 = vmatpush3.bf16.msra.mxu0 %v5795_v22  ;;  %v1443_v21 = vmul.f32 %v6672_v44, %v1410_v61  ;;  %v1308_v22 = vadd.f32 %v6664_v37, %v6731_v53 }
 0x375   :  { %5283 = vmatprep.subr.bf16.mxu1 %v5968_v1  ;;  %5393 = vmatprep.subr.bf16.mxu0 %v5968_v1 }
 0x376   :  { %v1392_v27 = vmul.f32 0.01, %v1308_v22  ;;  %vm1367_vm12 = vcmp.gt.f32.partialorder %v1308_v22, 0.0 }
 0x378   :  { %5284 = vmatpush3.bf16.msra.mxu1 %v5796_v18  ;;  %5394 = vmatpush3.bf16.msra.mxu0 %v5797_v26  ;;  %v5823_v18 = vld [vmem:[#allocation3 + $0x398] sm:$0xff]   ;;  %v1476_v26 = vadd.f32 %v6678_v48, %v1443_v21  ;;  %v1417_v53 = vsel %vm1367_vm12, %v1308_v22, %v1392_v27  ;;  %v5849_v27 = vld [vmem:[#allocation3 + $0x4b0] sm:$0xff]  }
 0x379   :  { %5285 = vmatprep.subr.bf16.mxu1 %v5968_v1  ;;  %5419 = vmatprep.subr.bf16.mxu0 %v5968_v1  ;;  %v5847_v21 = vld [vmem:[#allocation3 + $0x4b8] sm:$0xff]  }
 0x37b   :  { %5396 = vmatmul.mubr.bf16.vlgmr.msra.gmra.mxu0 %v2597_v30  ;;  %v2273_v30 = vpack.c.bf16 %v1476_v26, %v1476_v26  ;;  %v5848_v26 = vld [vmem:[#allocation3 + $0x2d8] sm:$0xff]  }
 0x37c   :  { %5286 = vmatpush3.bf16.msra.mxu1 %v5798_v51  ;;  %5420 = vmatpush3.bf16.msra.mxu0 %v5799_v52  ;;  %v5824_v51 = vld [vmem:[#allocation3 + $0x278] sm:$0xff]   ;;  %v5825_v52 = vld [vmem:[#allocation3 + $0x390] sm:$0xff]  }
 0x37d   :  { %5287 = vmatprep.subr.bf16.mxu1 %v5968_v1  ;;  %5421 = vmatprep.subr.bf16.mxu0 %v5968_v1 }
 0x37e   :  { %5435 = vmatprep.mubr.msk.bf16.mxu0 %vm5969_vm0, %v5968_v1 }
 0x380   :  { %5288 = vmatpush3.bf16.msra.mxu1 %v5800_v7  ;;  %5422 = vmatpush3.bf16.msra.mxu0 %v5801_v59  ;;  %v5827_v7 = vld [vmem:[#allocation3 + $0x388] sm:$0xff]   ;;  %v1450_v59 = vmul.f32 %v6672_v44, %v1417_v53 }
 0x381   :  { %5289 = vmatprep.subr.bf16.mxu1 %v5968_v1  ;;  %5423 = vmatprep.subr.bf16.mxu0 %v5968_v1  ;;  %v5851_v53 = vld [vmem:[#allocation3 + $0x4a8] sm:$0xff]  }
 0x384   :  { %5290 = vmatpush3.bf16.msra.mxu1 %v5802_v33  ;;  %5424 = vmatpush3.bf16.msra.mxu0 %v5803_v34  ;;  %v5829_v33 = vld [vmem:[#allocation3 + $0x380] sm:$0xff]   ;;  %v1483_v34 = vadd.f32 %v6678_v48, %v1450_v59  ;;  %v5852_v59 = vld [vmem:[#allocation3 + $0x2c8] sm:$0xff]  }
 0x385   :  { %5291 = vmatprep.subr.bf16.mxu1 %v5968_v1  ;;  %5425 = vmatprep.subr.bf16.mxu0 %v5968_v1 }
 0x388   :  { %5292 = vmatpush3.bf16.msra.mxu1 %v5804_v35  ;;  %5426 = vmatpush3.bf16.msra.mxu0 %v5805_v40  ;;  %v5831_v35 = vld [vmem:[#allocation3 + $0x438] sm:$0xff]   ;;  %v3029_v40 = vpack.c.bf16 %v1483_v34, %v1483_v34  ;;  %v1324_v34 = vadd.f32 %v6664_v37, %v6754_v17 }
 0x389   :  { %5293 = vmatprep.subr.bf16.mxu1 %v5968_v1  ;;  %5427 = vmatprep.subr.bf16.mxu0 %v5968_v1 }
 0x38a   :  { %vm1371_vm1 = vcmp.gt.f32.partialorder %v1324_v34, 0.0 }
 0x38c   :  { %5294 = vmatpush3.bf16.msra.mxu1 %v5806_v45  ;;  %5428 = vmatpush3.bf16.msra.mxu0 %v5807_v46  ;;  %v5833_v45 = vld [vmem:[#allocation3 + $0x430] sm:$0xff]   ;;  %v1387_v46 = vmul.f32 0.01, %v1287_v39 }
 0x38d   :  { %5319 = vmatprep.subr.bf16.mxu1 %v5968_v1  ;;  %5429 = vmatprep.subr.bf16.mxu0 %v5968_v1 }
 0x38e   :  { %v1412_v24 = vsel %vm1362_vm13, %v1287_v39, %v1387_v46  ;;  %v1396_v39 = vmul.f32 0.01, %v1324_v34 }
 0x38f   :  { %5296 = vmatmul.mubr.bf16.vlgmr.msra.gmra.mxu1 %v2057_v54  ;;  %v1445_v54 = vmul.f32 %v6672_v44, %v1412_v24 }
 0x390   :  { %5320 = vmatpush3.bf16.msra.mxu1 %v5808_v43  ;;  %5430 = vmatpush3.bf16.msra.mxu0 %v5809_v49  ;;  %v5836_v43 = vld [vmem:[#allocation3 + $0x248] sm:$0xff]   ;;  %v5837_v49 = vld [vmem:[#allocation3 + $0x420] sm:$0xff]  }
 0x391   :  { %5321 = vmatprep.subr.bf16.mxu1 %v5968_v1  ;;  %5431 = vmatprep.subr.bf16.mxu0 %v5968_v1  ;;  %v1478_v63 = vadd.f32 %v6678_v48, %v1445_v54  ;;  %v5860_v54 = vld [vmem:[#allocation3 + $0x368] sm:$0xff]  }
 0x392   :  { %5335 = vmatprep.mubr.msk.bf16.mxu1 %vm5969_vm0, %v5968_v1 }
 0x394   :  { %5322 = vmatpush3.bf16.msra.mxu1 %v5810_v56  ;;  %5432 = vmatpush3.bf16.msra.mxu0 %v5811_v60  ;;  %v5838_v56 = vld [vmem:[#allocation3 + $0x240] sm:$0xff]   ;;  %v5839_v60 = vld [vmem:[#allocation3 + $0x418] sm:$0xff]  }
 0x395   :  { %5323 = vmatprep.subr.bf16.mxu1 %v5968_v1  ;;  %5433 = vmatprep.subr.bf16.mxu0 %v5968_v1 }
 0x398   :  { %5324 = vmatpush3.bf16.msra.mxu1 %v5812_v0  ;;  %5434 = vmatpush3.bf16.msra.mxu0 %v5813_v2  ;;  %v1394_v0 = vmul.f32 0.01, %v1316_v38  ;;  %v5840_v2 = vld [vmem:[#allocation3 + $0x2f8] sm:$0xff]  }
 0x399   :  { %5325 = vmatprep.subr.bf16.mxu1 %v5968_v1  ;;  %5459 = vmatprep.subr.bf16.mxu0 %v5968_v1 }
 0x39a   :  { %v1419_v3 = vsel %vm1369_vm14, %v1316_v38, %v1394_v0  ;;  %v5861_v38 = vld [vmem:[#allocation3 + $0x480] sm:$0xff]  }
 0x39b   :  { %5436 = vmatmul.mubr.bf16.vlgmr.msra.gmra.mxu0 %v2813_v6  ;;  %v5842_v6 = vld [vmem:[#allocation3 + $0x2f0] sm:$0xff]   ;;  %v5862_v0 = vld [vmem:[#allocation3 + $0x360] sm:$0xff]  }
 0x39c   :  { %5326 = vmatpush3.bf16.msra.mxu1 %v5814_v4  ;;  %5460 = vmatpush3.bf16.msra.mxu0 %v5815_v5  ;;  %v2489_v4 = vpack.c.bf16 %v1478_v63, %v1478_v63 }
 0x39d   :  { %5327 = vmatprep.subr.bf16.mxu1 %v5968_v1  ;;  %5461 = vmatprep.subr.bf16.mxu0 %v5968_v1 }
 0x39e   :  { %5475 = vmatprep.mubr.msk.bf16.mxu0 %vm5969_vm0, %v5968_v1 }
 0x3a0   :  { %5328 = vmatpush3.bf16.msra.mxu1 %v5816_v13  ;;  %5462 = vmatpush3.bf16.msra.mxu0 %v5817_v14  ;;  %v1452_v13 = vmul.f32 %v6672_v44, %v1419_v3 }
 0x3a1   :  { %5329 = vmatprep.subr.bf16.mxu1 %v5968_v1  ;;  %5463 = vmatprep.subr.bf16.mxu0 %v5968_v1 }
 0x3a2   :  { %v1485_v61 = vadd.f32 %v6678_v48, %v1452_v13 }
 0x3a4   :  { %5330 = vmatpush3.bf16.msra.mxu1 %v5818_v16  ;;  %5464 = vmatpush3.bf16.msra.mxu0 %v5819_v10  ;;  %v5844_v16 = vld [vmem:[#allocation3 + $0x2e8] sm:$0xff]   ;;  %v5845_v10 = vld [vmem:[#allocation3 + $0x400] sm:$0xff]   ;;  %v3245_v22 = vpack.c.bf16 %v1485_v61, %v1485_v61 }
 0x3a5   :  { %5331 = vmatprep.subr.bf16.mxu1 %v5968_v1  ;;  %5465 = vmatprep.subr.bf16.mxu0 %v5968_v1 }
 0x3a8   :  { %5332 = vmatpush3.bf16.msra.mxu1 %v5820_v20  ;;  %5466 = vmatpush3.bf16.msra.mxu0 %v5821_v28  ;;  %v5846_v28 = vld [vmem:[#allocation3 + $0x2e0] sm:$0xff]  }
 0x3a9   :  { %5333 = vmatprep.subr.bf16.mxu1 %v5968_v1  ;;  %5467 = vmatprep.subr.bf16.mxu0 %v5968_v1 }
 0x3ac   :  { %5334 = vmatpush3.bf16.msra.mxu1 %v5822_v23  ;;  %5468 = vmatpush3.bf16.msra.mxu0 %v5823_v18  ;;  %v1295_v23 = vadd.f32 %v6664_v37, %v6715_v19  ;;  %v5850_v19 = vld [vmem:[#allocation3 + $0x2d0] sm:$0xff]   ;;  %v1421_v37 = vsel %vm1371_vm1, %v1324_v34, %v1396_v39 }
 0x3ad   :  { %5359 = vmatprep.subr.bf16.mxu1 %v5968_v1  ;;  %5469 = vmatprep.subr.bf16.mxu0 %v5968_v1 }
 0x3ae   :  { %vm1364_vm15 = vcmp.gt.f32.partialorder %v1295_v23, 0.0 }
 0x3af   :  { %5336 = vmatmul.mubr.bf16.vlgmr.msra.gmra.mxu1 %v2273_v30 }
 0x3b0   :  { %5360 = vmatpush3.bf16.msra.mxu1 %v5824_v51  ;;  %5470 = vmatpush3.bf16.msra.mxu0 %v5825_v52  ;;  %v1389_v52 = vmul.f32 0.01, %v1295_v23 }
 0x3b1   :  { %5361 = vmatprep.subr.bf16.mxu1 %v5968_v1  ;;  %5471 = vmatprep.subr.bf16.mxu0 %v5968_v1 }
 0x3b2   :  { %5375 = vmatprep.mubr.msk.bf16.mxu1 %vm5969_vm0, %v5968_v1 }
 0x3b4   :  { %5362 = vmatpush3.bf16.msra.mxu1 %v5826_v31  ;;  %5472 = vmatpush3.bf16.msra.mxu0 %v5827_v7  ;;  %v1414_v7 = vsel %vm1364_vm15, %v1295_v23, %v1389_v52  ;;  %v5870_v23 = vld [vmem:[#allocation3 + $0x340] sm:$0xff]   ;;  %v5872_v52 = vld [vmem:[#allocation3 + $0x3f8] sm:$0xff]  }
 0x3b5   :  { %5363 = vmatprep.subr.bf16.mxu1 %v5968_v1  ;;  %5473 = vmatprep.subr.bf16.mxu0 %v5968_v1 }
 0x3b8   :  { %5364 = vmatpush3.bf16.msra.mxu1 %v5828_v32  ;;  %5474 = vmatpush3.bf16.msra.mxu0 %v5829_v33  ;;  %v5853_v32 = vld [vmem:[#allocation3 + $0x4a0] sm:$0xff]   ;;  %v1447_v33 = vmul.f32 %v6672_v44, %v1414_v7  ;;  %v5856_v44 = vld [vmem:[#allocation3 + $0x378] sm:$0xff]   ;;  %v5874_v7 = vld [vmem:[#allocation3 + $0x3f0] sm:$0xff]  }
 0x3b9   :  { %5365 = vmatprep.subr.bf16.mxu1 %v5968_v1  ;;  %5499 = vmatprep.subr.bf16.mxu0 %v5968_v1 }
 0x3bb   :  { %5476 = vmatmul.mubr.bf16.vlgmr.msra.gmra.mxu0 %v3029_v40  ;;  %v1480_v40 = vadd.f32 %v6678_v48, %v1447_v33  ;;  %v5858_v48 = vld [vmem:[#allocation3 + $0x370] sm:$0xff]  }
 0x3bc   :  { %5366 = vmatpush3.bf16.msra.mxu1 %v5830_v62  ;;  %5500 = vmatpush3.bf16.msra.mxu0 %v5831_v35  ;;  %v5854_v62 = vld [vmem:[#allocation3 + $0x2c0] sm:$0xff]   ;;  %v5855_v35 = vld [vmem:[#allocation3 + $0x498] sm:$0xff]  }
 0x3bd   :  { %5367 = vmatprep.subr.bf16.mxu1 %v5968_v1  ;;  %5501 = vmatprep.subr.bf16.mxu0 %v5968_v1 }
 0x3be   :  { %5515 = vmatprep.mubr.msk.bf16.mxu0 %vm5969_vm0, %v5968_v1 }
 0x3c0   :  { %5368 = vmatpush3.bf16.msra.mxu1 %v5832_v41  ;;  %5502 = vmatpush3.bf16.msra.mxu0 %v5833_v45  ;;  %v5857_v41 = vld [vmem:[#allocation3 + $0x490] sm:$0xff]   ;;  %v2705_v45 = vpack.c.bf16 %v1480_v40, %v1480_v40 }
 0x3c1   :  { %5369 = vmatprep.subr.bf16.mxu1 %v5968_v1  ;;  %5503 = vmatprep.subr.bf16.mxu0 %v5968_v1 }
 0x3c4   :  { %5370 = vmatpush3.bf16.msra.mxu1 %v5834_v50  ;;  %5504 = vmatpush3.bf16.msra.mxu0 %v5835_v8  ;;  %v5859_v50 = vld [vmem:[#allocation3 + $0x488] sm:$0xff]   ;;  %v6923_v8 = vld [vmem:[%s7152_s4 + $0x3] ss:$0 sm:$0xff] }
 0x3c5   :  { %5371 = vmatprep.subr.bf16.mxu1 %v5968_v1  ;;  %5505 = vmatprep.subr.bf16.mxu0 %v5968_v1  ;;  %v1454_v24 = vmul.f32 %v6923_v8, %v1421_v37 }
 0x3c8   :  { %5372 = vmatpush3.bf16.msra.mxu1 %v5836_v43  ;;  %5506 = vmatpush3.bf16.msra.mxu0 %v5837_v49 }
 0x3c9   :  { %5373 = vmatprep.subr.bf16.mxu1 %v5968_v1  ;;  %5507 = vmatprep.subr.bf16.mxu0 %v5968_v1 }
 0x3cc   :  { %5374 = vmatpush3.bf16.msra.mxu1 %v5838_v56  ;;  %5508 = vmatpush3.bf16.msra.mxu0 %v5839_v60  ;;  %v6933_v56 = vld [vmem:[%s7153_s5 + $0x3] ss:$0 sm:$0xff] }
 0x3cd   :  { %5399 = vmatprep.subr.bf16.mxu1 %v5968_v1  ;;  %5509 = vmatprep.subr.bf16.mxu0 %v5968_v1  ;;  %v1487_v60 = vadd.f32 %v6933_v56, %v1454_v24 }
 0x3cf   :  { %5376 = vmatmul.mubr.bf16.vlgmr.msra.gmra.mxu1 %v2489_v4  ;;  %v6885_v5 = vpop.f32.mrf.mxu1  ;;  %v6943_v4 = vld [vmem:[%s7151_s3 + $0x3] ss:$0 sm:$0xff] }
 0x3d0   :  { %5400 = vmatpush3.bf16.msra.mxu1 %v5840_v2  ;;  %5510 = vmatpush3.bf16.msra.mxu0 %v5841_v42  ;;  %v5863_v2 = vld [vmem:[#allocation3 + $0x538] sm:$0xff]   ;;  %v3461_v42 = vpack.c.bf16 %v1487_v60, %v1487_v60  ;;  %v1303_v3 = vadd.f32 %v6943_v4, %v6726_v58  ;;  %v5866_v58 = vld [vmem:[#allocation3 + $0x350] sm:$0xff]   ;;  %v1311_v37 = vadd.f32 %v6943_v4, %v6737_v57  ;;  %v5884_v60 = vld [vmem:[#allocation3 + $0x3c8] sm:$0xff]  }
 0x3d1   :  { %v5197_v14 = vpop.f32.mrf.mxu1  ;;  %5401 = vmatprep.subr.bf16.mxu1 %v5968_v1  ;;  %5511 = vmatprep.subr.bf16.mxu0 %v5968_v1  ;;  %v5882_v57 = vld [vmem:[#allocation3 + $0x3d0] sm:$0xff]  }
 0x3d2   :  { %5415 = vmatprep.mubr.msk.bf16.mxu1 %vm5969_vm0, %v5968_v1  ;;  %v1391_v14 = vmul.f32 0.01, %v1303_v3  ;;  %vm1366_vm2 = vcmp.gt.f32.partialorder %v1303_v3, 0.0  ;;  %v1393_v24 = vmul.f32 0.01, %v1311_v37  ;;  %vm1368_vm4 = vcmp.gt.f32.partialorder %v1311_v37, 0.0 }
 0x3d3   :  { %v1641_v15 = vpop.f32.mrf.mxu1 }
 0x3d4   :  { %5402 = vmatpush3.bf16.msra.mxu1 %v5842_v6  ;;  %5512 = vmatpush3.bf16.msra.mxu0 %v5843_v12  ;;  %v5864_v6 = vld [vmem:[#allocation3 + $0x358] sm:$0xff]   ;;  %v5865_v12 = vld [vmem:[#allocation3 + $0x530] sm:$0xff]   ;;  %v1416_v61 = vsel %vm1366_vm2, %v1303_v3, %v1391_v14 }
 0x3d5   :  { %v5198_v20 = vpop.f32.mrf.mxu1  ;;  %5403 = vmatprep.subr.bf16.mxu1 %v5968_v1  ;;  %5513 = vmatprep.subr.bf16.mxu0 %v5968_v1  ;;  %v5887_v3 = vld [vmem:[#allocation3 + $0x598] sm:$0xff]   ;;  %v5889_v14 = vld [vmem:[#allocation3 + $0x590] sm:$0xff]  }
 0x3d6   :  { %v5868_v20 = vld [vmem:[#allocation3 + $0x348] sm:$0xff]  }
 0x3d8   :  { %5404 = vmatpush3.bf16.msra.mxu1 %v5844_v16  ;;  %5514 = vmatpush3.bf16.msra.mxu0 %v5845_v10  ;;  %v5867_v16 = vld [vmem:[#allocation3 + $0x528] sm:$0xff]  }
 0x3d9   :  { %5405 = vmatprep.subr.bf16.mxu1 %v5968_v1  ;;  %5539 = vmatprep.subr.bf16.mxu0 %v5968_v1 }
 0x3db   :  { %5516 = vmatmul.mubr.bf16.vlgmr.msra.gmra.mxu0 %v3245_v22  ;;  %v6899_v18 = vpop.f32.mrf.mxu0  ;;  %v1332_v22 = vadd.f32 %v6943_v4, %v6763_v29 }
 0x3dc   :  { %5406 = vmatpush3.bf16.msra.mxu1 %v5846_v28  ;;  %5540 = vmatpush3.bf16.msra.mxu0 %v5847_v21  ;;  %v5869_v28 = vld [vmem:[#allocation3 + $0x520] sm:$0xff]   ;;  %v1449_v21 = vmul.f32 %v6923_v8, %v1416_v61  ;;  %v5891_v61 = vld [vmem:[#allocation3 + $0x588] sm:$0xff]  }
 0x3dd   :  { %v5277_v51 = vpop.f32.mrf.mxu0  ;;  %5407 = vmatprep.subr.bf16.mxu1 %v5968_v1  ;;  %5541 = vmatprep.subr.bf16.mxu0 %v5968_v1  ;;  %vm1373_vm3 = vcmp.gt.f32.partialorder %v1332_v22, 0.0 }
 0x3de   :  { %5555 = vmatprep.mubr.msk.bf16.mxu0 %vm5969_vm0, %v5968_v1  ;;  %v1398_v51 = vmul.f32 0.01, %v1332_v22 }
 0x3df   :  { %v2052_v30 = vpop.f32.mrf.mxu0 }
 0x3e0   :  { %5408 = vmatpush3.bf16.msra.mxu1 %v5848_v26  ;;  %5542 = vmatpush3.bf16.msra.mxu0 %v5849_v27  ;;  %v5871_v26 = vld [vmem:[#allocation3 + $0x518] sm:$0xff]   ;;  %v1482_v27 = vadd.f32 %v6933_v56, %v1449_v21  ;;  %v5873_v30 = vld [vmem:[#allocation3 + $0x510] sm:$0xff]   ;;  %v1423_v29 = vsel %vm1373_vm3, %v1332_v22, %v1398_v51  ;;  %v5892_v22 = vld [vmem:[#allocation3 + $0x468] sm:$0xff]  }
 0x3e1   :  { %v5278_v31 = vpop.f32.mrf.mxu0  ;;  %5409 = vmatprep.subr.bf16.mxu1 %v5968_v1  ;;  %5543 = vmatprep.subr.bf16.mxu0 %v5968_v1  ;;  %v5894_v51 = vld [vmem:[#allocation3 + $0x460] sm:$0xff]  }
 0x3e4   :  { %5410 = vmatpush3.bf16.msra.mxu1 %v5850_v19  ;;  %5544 = vmatpush3.bf16.msra.mxu0 %v5851_v53  ;;  %v2921_v19 = vpack.c.bf16 %v1482_v27, %v1482_v27 }
 0x3e5   :  { %5411 = vmatprep.subr.bf16.mxu1 %v5968_v1  ;;  %5545 = vmatprep.subr.bf16.mxu0 %v5968_v1 }
 0x3e8   :  { %5412 = vmatpush3.bf16.msra.mxu1 %v5852_v59  ;;  %5546 = vmatpush3.bf16.msra.mxu0 %v5853_v32  ;;  %v5875_v59 = vld [vmem:[#allocation3 + $0x508] sm:$0xff]   ;;  %v1456_v32 = vmul.f32 %v6923_v8, %v1423_v29 }
 0x3e9   :  { %5413 = vmatprep.subr.bf16.mxu1 %v5968_v1  ;;  %5547 = vmatprep.subr.bf16.mxu0 %v5968_v1 }
 0x3ea   :  { %v1489_v40 = vadd.f32 %v6933_v56, %v1456_v32 }
 0x3ec   :  { %5414 = vmatpush3.bf16.msra.mxu1 %v5854_v62  ;;  %5548 = vmatpush3.bf16.msra.mxu0 %v5855_v35  ;;  %v5876_v62 = vld [vmem:[#allocation3 + $0x3e8] sm:$0xff]   ;;  %v5877_v35 = vld [vmem:[#allocation3 + $0x500] sm:$0xff]  }
 0x3ed   :  { %5439 = vmatprep.subr.bf16.mxu1 %v5968_v1  ;;  %5549 = vmatprep.subr.bf16.mxu0 %v5968_v1 }
 0x3ef   :  { %v1726_v17 = vpop.f32.mrf.mxu1  ;;  %5416 = vmatmul.mubr.bf16.vlgmr.msra.gmra.mxu1 %v2705_v45  ;;  %v3677_v45 = vpack.c.bf16 %v1489_v40, %v1489_v40  ;;  %v5901_v40 = vld [vmem:[#allocation3 + $0x620] sm:$0xff]  }
 0x3f0   :  { %v6918_v46 = vadd.f32 %v1726_v17, %v6885_v5  ;;  %5440 = vmatpush3.bf16.msra.mxu1 %v5856_v44  ;;  %5550 = vmatpush3.bf16.msra.mxu0 %v5857_v41  ;;  %v5878_v44 = vld [vmem:[#allocation3 + $0x3e0] sm:$0xff]   ;;  %v5879_v41 = vld [vmem:[#allocation3 + $0x5b8] sm:$0xff]  }
 0x3f1   :  { %v5217_v43 = vpop.f32.mrf.mxu1  ;;  %5441 = vmatprep.subr.bf16.mxu1 %v5968_v1  ;;  %5551 = vmatprep.subr.bf16.mxu0 %v5968_v1 }
 0x3f2   :  { %5455 = vmatprep.mubr.msk.bf16.mxu1 %vm5969_vm0, %v5968_v1 }
 0x3f3   :  { %v1729_v49 = vpop.f32.mrf.mxu1 }
 0x3f4   :  { %5442 = vmatpush3.bf16.msra.mxu1 %v5858_v48  ;;  %5552 = vmatpush3.bf16.msra.mxu0 %v5859_v50  ;;  %v5881_v48 = vld [vmem:[#allocation3 + $0x5b0] sm:$0xff]   ;;  %v5883_v49 = vld [vmem:[#allocation3 + $0x5a8] sm:$0xff]  }
 0x3f5   :  { %v5218_v63 = vpop.f32.mrf.mxu1  ;;  %5443 = vmatprep.subr.bf16.mxu1 %v5968_v1  ;;  %5553 = vmatprep.subr.bf16.mxu0 %v5968_v1 }
 0x3f6   :  { %v5885_v63 = vld [vmem:[#allocation3 + $0x5a0] sm:$0xff]  }
 0x3f8   :  { %5444 = vmatpush3.bf16.msra.mxu1 %v5860_v54  ;;  %5554 = vmatpush3.bf16.msra.mxu0 %v5861_v38  ;;  %v1418_v38 = vsel %vm1368_vm4, %v1311_v37, %v1393_v24 }
 0x3f9   :  { %5445 = vmatprep.subr.bf16.mxu1 %v5968_v1  ;;  %5579 = vmatprep.subr.bf16.mxu0 %v5968_v1 }
 0x3fb   :  { %v6947_v5 = vpop.f32.mrf.mxu0  ;;  %5556 = vmatmul.mubr.bf16.vlgmr.msra.gmra.mxu0 %v3461_v42  ;;  %v5886_v42 = vld [vmem:[#allocation3 + $0x3c0] sm:$0xff]  }
 0x3fc   :  { %5446 = vmatpush3.bf16.msra.mxu1 %v5862_v0  ;;  %5580 = vmatpush3.bf16.msra.mxu0 %v5863_v2  ;;  %v1451_v0 = vmul.f32 %v6923_v8, %v1418_v38  ;;  %v1340_v2 = vadd.f32 %v6943_v4, %v6775_v36  ;;  %v5907_v38 = vld [vmem:[#allocation3 + $0x608] sm:$0xff]  }
 0x3fd   :  { %v5317_v13 = vpop.f32.mrf.mxu0  ;;  %5447 = vmatprep.subr.bf16.mxu1 %v5968_v1  ;;  %5581 = vmatprep.subr.bf16.mxu0 %v5968_v1 }
 0x3fe   :  { %5595 = vmatprep.mubr.msk.bf16.mxu0 %vm5969_vm0, %v5968_v1  ;;  %vm1375_vm5 = vcmp.gt.f32.partialorder %v1340_v2, 0.0  ;;  %v5888_v13 = vld [vmem:[#allocation3 + $0x478] sm:$0xff]  }
 0x3ff   :  { %v2268_v15 = vpop.f32.mrf.mxu0 }
 0x400   :  { %5448 = vmatpush3.bf16.msra.mxu1 %v5864_v6  ;;  %5582 = vmatpush3.bf16.msra.mxu0 %v5865_v12  ;;  %v1484_v6 = vadd.f32 %v6933_v56, %v1451_v0  ;;  %v1400_v12 = vmul.f32 0.01, %v1340_v2 }
 0x401   :  { %v5318_v10 = vpop.f32.mrf.mxu0  ;;  %5449 = vmatprep.subr.bf16.mxu1 %v5968_v1  ;;  %5583 = vmatprep.subr.bf16.mxu0 %v5968_v1 }
 0x402   :  { %v3137_v15 = vpack.c.bf16 %v1484_v6, %v1484_v6  ;;  %v1425_v36 = vsel %vm1375_vm5, %v1340_v2, %v1400_v12  ;;  %v5890_v10 = vld [vmem:[#allocation3 + $0x470] sm:$0xff]   ;;  %v5909_v2 = vld [vmem:[#allocation3 + $0x600] sm:$0xff]  }
 0x403   :  { %v5910_v6 = vld [vmem:[#allocation3 + $0x4e0] sm:$0xff]  }
 0x404   :  { %5450 = vmatpush3.bf16.msra.mxu1 %v5866_v58  ;;  %5584 = vmatpush3.bf16.msra.mxu0 %v5867_v16 }
 0x405   :  { %5451 = vmatprep.subr.bf16.mxu1 %v5968_v1  ;;  %5585 = vmatprep.subr.bf16.mxu0 %v5968_v1 }
 0x408   :  { %5452 = vmatpush3.bf16.msra.mxu1 %v5868_v20  ;;  %5586 = vmatpush3.bf16.msra.mxu0 %v5869_v28  ;;  %v1458_v20 = vmul.f32 %v6923_v8, %v1425_v36 }
 0x409   :  { %5453 = vmatprep.subr.bf16.mxu1 %v5968_v1  ;;  %5587 = vmatprep.subr.bf16.mxu0 %v5968_v1 }
 0x40c   :  { %5454 = vmatpush3.bf16.msra.mxu1 %v5870_v23  ;;  %5588 = vmatpush3.bf16.msra.mxu0 %v5871_v26  ;;  %v5893_v23 = vld [vmem:[#allocation3 + $0x580] sm:$0xff]   ;;  %v1491_v26 = vadd.f32 %v6933_v56, %v1458_v20 }
 0x40d   :  { %5479 = vmatprep.subr.bf16.mxu1 %v5968_v1  ;;  %5589 = vmatprep.subr.bf16.mxu0 %v5968_v1 }
 0x40f   :  { %v1833_v53 = vpop.f32.mrf.mxu1  ;;  %5456 = vmatmul.mubr.bf16.vlgmr.msra.gmra.mxu1 %v2921_v19  ;;  %v1319_v19 = vadd.f32 %v6943_v4, %v6747_v11  ;;  %v5898_v11 = vld [vmem:[#allocation3 + $0x450] sm:$0xff]  }
 0x410   :  { %v6966_v31 = vadd.f32 %v1833_v53, %v6918_v46  ;;  %5480 = vmatpush3.bf16.msra.mxu1 %v5872_v52  ;;  %5590 = vmatpush3.bf16.msra.mxu0 %v5873_v30  ;;  %v5880_v46 = vld [vmem:[#allocation3 + $0x3d8] sm:$0xff]   ;;  %v3893_v30 = vpack.c.bf16 %v1491_v26, %v1491_v26 }
 0x411   :  { %v5237_v33 = vpop.f32.mrf.mxu1  ;;  %5481 = vmatprep.subr.bf16.mxu1 %v5968_v1  ;;  %5591 = vmatprep.subr.bf16.mxu0 %v5968_v1  ;;  %v5895_v52 = vld [vmem:[#allocation3 + $0x638] sm:$0xff]   ;;  %vm1370_vm6 = vcmp.gt.f32.partialorder %v1319_v19, 0.0 }
 0x412   :  { %5495 = vmatprep.mubr.msk.bf16.mxu1 %vm5969_vm0, %v5968_v1  ;;  %v5896_v53 = vld [vmem:[#allocation3 + $0x458] sm:$0xff]   ;;  %v5899_v33 = vld [vmem:[#allocation3 + $0x628] sm:$0xff]  }
 0x413   :  { %v1836_v34 = vpop.f32.mrf.mxu1 }
 0x414   :  { %5482 = vmatpush3.bf16.msra.mxu1 %v5874_v7  ;;  %5592 = vmatpush3.bf16.msra.mxu0 %v5875_v59  ;;  %v1395_v59 = vmul.f32 0.01, %v1319_v19 }
 0x415   :  { %v5238_v39 = vpop.f32.mrf.mxu1  ;;  %5483 = vmatprep.subr.bf16.mxu1 %v5968_v1  ;;  %5593 = vmatprep.subr.bf16.mxu0 %v5968_v1 }
 0x418   :  { %5484 = vmatpush3.bf16.msra.mxu1 %v5876_v62  ;;  %5594 = vmatpush3.bf16.msra.mxu0 %v5877_v35  ;;  %v1420_v62 = vsel %vm1370_vm6, %v1319_v19, %v1395_v59  ;;  %v5900_v35 = vld [vmem:[#allocation3 + $0x448] sm:$0xff]   ;;  %v5918_v59 = vld [vmem:[#allocation3 + $0x560] sm:$0xff]  }
 0x419   :  { %5485 = vmatprep.subr.bf16.mxu1 %v5968_v1  ;;  %5619 = vmatprep.subr.bf16.mxu0 %v5968_v1  ;;  %v1453_v39 = vmul.f32 %v6923_v8, %v1420_v62 }
 0x41b   :  { %v6980_v17 = vpop.f32.mrf.mxu0  ;;  %5596 = vmatmul.mubr.bf16.vlgmr.msra.gmra.mxu0 %v3677_v45  ;;  %v5903_v45 = vld [vmem:[#allocation3 + $0x618] sm:$0xff]   ;;  %v1486_v37 = vadd.f32 %v6933_v56, %v1453_v39 }
 0x41c   :  { %5486 = vmatpush3.bf16.msra.mxu1 %v5878_v44  ;;  %5620 = vmatpush3.bf16.msra.mxu0 %v5879_v41  ;;  %v1348_v44 = vadd.f32 %v6943_v4, %v6787_v55  ;;  %v5902_v41 = vld [vmem:[#allocation3 + $0x440] sm:$0xff]  }
 0x41d   :  { %v5357_v50 = vpop.f32.mrf.mxu0  ;;  %5487 = vmatprep.subr.bf16.mxu1 %v5968_v1  ;;  %5621 = vmatprep.subr.bf16.mxu0 %v5968_v1  ;;  %v3353_v24 = vpack.c.bf16 %v1486_v37, %v1486_v37  ;;  %v5923_v37 = vld [vmem:[#allocation3 + $0x5f8] sm:$0xff]  }
 0x41e   :  { %5635 = vmatprep.mubr.msk.bf16.mxu0 %vm5969_vm0, %v5968_v1  ;;  %vm1377_vm7 = vcmp.gt.f32.partialorder %v1348_v44, 0.0  ;;  %v5905_v50 = vld [vmem:[#allocation3 + $0x610] sm:$0xff]  }
 0x41f   :  { %v2484_v43 = vpop.f32.mrf.mxu0 }
 0x420   :  { %5488 = vmatpush3.bf16.msra.mxu1 %v5880_v46  ;;  %5622 = vmatpush3.bf16.msra.mxu0 %v5881_v48  ;;  %v1402_v46 = vmul.f32 0.01, %v1348_v44  ;;  %v5904_v48 = vld [vmem:[#allocation3 + $0x4f8] sm:$0xff]  }
 0x421   :  { %v5358_v54 = vpop.f32.mrf.mxu0  ;;  %5489 = vmatprep.subr.bf16.mxu1 %v5968_v1  ;;  %5623 = vmatprep.subr.bf16.mxu0 %v5968_v1 }
 0x422   :  { %v1427_v55 = vsel %vm1377_vm7, %v1348_v44, %v1402_v46  ;;  %v5906_v54 = vld [vmem:[#allocation3 + $0x4f0] sm:$0xff]   ;;  %v5921_v44 = vld [vmem:[#allocation3 + $0x548] sm:$0xff]  }
 0x424   :  { %5490 = vmatpush3.bf16.msra.mxu1 %v5882_v57  ;;  %5624 = vmatpush3.bf16.msra.mxu0 %v5883_v49 }
 0x425   :  { %5491 = vmatprep.subr.bf16.mxu1 %v5968_v1  ;;  %5625 = vmatprep.subr.bf16.mxu0 %v5968_v1 }
 0x428   :  { %5492 = vmatpush3.bf16.msra.mxu1 %v5884_v60  ;;  %5626 = vmatpush3.bf16.msra.mxu0 %v5885_v63  ;;  %v1460_v60 = vmul.f32 %v6923_v8, %v1427_v55  ;;  %v5924_v55 = vld [vmem:[#allocation3 + $0x5f0] sm:$0xff]  }
 0x429   :  { %5493 = vmatprep.subr.bf16.mxu1 %v5968_v1  ;;  %5627 = vmatprep.subr.bf16.mxu0 %v5968_v1 }
 0x42c   :  { %5494 = vmatpush3.bf16.msra.mxu1 %v5886_v42  ;;  %5628 = vmatpush3.bf16.msra.mxu0 %v5887_v3  ;;  %v1493_v42 = vadd.f32 %v6933_v56, %v1460_v60 }
 0x42d   :  { %5519 = vmatprep.subr.bf16.mxu1 %v5968_v1  ;;  %5629 = vmatprep.subr.bf16.mxu0 %v5968_v1 }
 0x42e   :  { %v4109_v12 = vpack.c.bf16 %v1493_v42, %v1493_v42  ;;  %v5928_v42 = vld [vmem:[#allocation3 + $0x5d0] sm:$0xff]  }
 0x42f   :  { %v1941_v58 = vpop.f32.mrf.mxu1  ;;  %5496 = vmatmul.mubr.bf16.vlgmr.msra.gmra.mxu1 %v3137_v15  ;;  %v5911_v15 = vld [vmem:[#allocation3 + $0x4d8] sm:$0xff]  }
 0x430   :  { %v6999_v16 = vadd.f32 %v1941_v58, %v6966_v31  ;;  %5520 = vmatpush3.bf16.msra.mxu1 %v5888_v13  ;;  %5630 = vmatpush3.bf16.msra.mxu0 %v5889_v14  ;;  %v5897_v31 = vld [vmem:[#allocation3 + $0x630] sm:$0xff]   ;;  %v1327_v13 = vadd.f32 %v6943_v4, %v6759_v25 }
 0x431   :  { %v5257_v28 = vpop.f32.mrf.mxu1  ;;  %5521 = vmatprep.subr.bf16.mxu1 %v5968_v1  ;;  %5631 = vmatprep.subr.bf16.mxu0 %v5968_v1 }
 0x432   :  { %5535 = vmatprep.mubr.msk.bf16.mxu1 %vm5969_vm0, %v5968_v1  ;;  %v2055_v43 = vadd.f32 %v6899_v18, %v6999_v16  ;;  %v5908_v18 = vld [vmem:[#allocation3 + $0x4e8] sm:$0xff]   ;;  %v1397_v58 = vmul.f32 0.01, %v1327_v13  ;;  %vm1372_vm8 = vcmp.gt.f32.partialorder %v1327_v13, 0.0 }
 0x433   :  { %v1944_v21 = vpop.f32.mrf.mxu1  ;;  %v5913_v28 = vld [vmem:[#allocation3 + $0x4c8] sm:$0xff]  }
 0x434   :  { %5522 = vmatpush3.bf16.msra.mxu1 %v5890_v10  ;;  %5632 = vmatpush3.bf16.msra.mxu0 %v5891_v61  ;;  %v5912_v10 = vld [vmem:[#allocation3 + $0x4d0] sm:$0xff]   ;;  %v1422_v20 = vsel %vm1372_vm8, %v1327_v13, %v1397_v58  ;;  %v5914_v21 = vld [vmem:[#allocation3 + $0x4c0] sm:$0xff]  }
 0x435   :  { %v5258_v27 = vpop.f32.mrf.mxu1  ;;  %5523 = vmatprep.subr.bf16.mxu1 %v5968_v1  ;;  %5633 = vmatprep.subr.bf16.mxu0 %v5968_v1  ;;  %v1455_v25 = vmul.f32 %v6923_v8, %v1422_v20 }
 0x438   :  { %5524 = vmatpush3.bf16.msra.mxu1 %v5892_v22  ;;  %5634 = vmatpush3.bf16.msra.mxu0 %v5893_v23  ;;  %v1488_v22 = vadd.f32 %v6933_v56, %v1455_v25  ;;  %v5915_v23 = vld [vmem:[#allocation3 + $0x578] sm:$0xff]  }
 0x439   :  { %5525 = vmatprep.subr.bf16.mxu1 %v5968_v1  ;;  %5659 = vmatprep.subr.bf16.mxu0 %v5968_v1 }
 0x43a   :  { %v3569_v26 = vpack.c.bf16 %v1488_v22, %v1488_v22 }
 0x43b   :  { %v7013_v29 = vpop.f32.mrf.mxu0  ;;  %5636 = vmatmul.mubr.bf16.vlgmr.msra.gmra.mxu0 %v3893_v30  ;;  %v5916_v30 = vld [vmem:[#allocation3 + $0x570] sm:$0xff]  }
 0x43c   :  { %5526 = vmatpush3.bf16.msra.mxu1 %v5894_v51  ;;  %5660 = vmatpush3.bf16.msra.mxu0 %v5895_v52 }
 0x43d   :  { %v5397_v7 = vpop.f32.mrf.mxu0  ;;  %5527 = vmatprep.subr.bf16.mxu1 %v5968_v1  ;;  %5661 = vmatprep.subr.bf16.mxu0 %v5968_v1 }
 0x43e   :  { %5675 = vmatprep.mubr.msk.bf16.mxu0 %vm5969_vm0, %v5968_v1 }
 0x43f   :  { %v2700_v32 = vpop.f32.mrf.mxu0 }
 0x440   :  { %5528 = vmatpush3.bf16.msra.mxu1 %v5896_v53  ;;  %5662 = vmatpush3.bf16.msra.mxu0 %v5897_v31  ;;  %v5917_v31 = vld [vmem:[#allocation3 + $0x568] sm:$0xff]  }
 0x441   :  { %v5398_v34 = vpop.f32.mrf.mxu0  ;;  %5529 = vmatprep.subr.bf16.mxu1 %v5968_v1  ;;  %5663 = vmatprep.subr.bf16.mxu0 %v5968_v1 }
 0x444   :  { %5530 = vmatpush3.bf16.msra.mxu1 %v5898_v11  ;;  %5664 = vmatpush3.bf16.msra.mxu0 %v5899_v33  ;;  %v5919_v11 = vld [vmem:[#allocation3 + $0x558] sm:$0xff]  }
 0x445   :  { %5531 = vmatprep.subr.bf16.mxu1 %v5968_v1  ;;  %5665 = vmatprep.subr.bf16.mxu0 %v5968_v1 }
 0x448   :  { %5532 = vmatpush3.bf16.msra.mxu1 %v5900_v35  ;;  %5666 = vmatpush3.bf16.msra.mxu0 %v5901_v40  ;;  %v5920_v35 = vld [vmem:[#allocation3 + $0x550] sm:$0xff]  }
 0x449   :  { %5533 = vmatprep.subr.bf16.mxu1 %v5968_v1  ;;  %5667 = vmatprep.subr.bf16.mxu0 %v5968_v1 }
 0x44c   :  { %5534 = vmatpush3.bf16.msra.mxu1 %v5902_v41  ;;  %5668 = vmatpush3.bf16.msra.mxu0 %v5903_v45  ;;  %v5922_v41 = vld [vmem:[#allocation3 + $0x540] sm:$0xff]  }
 0x44d   :  { %5559 = vmatprep.subr.bf16.mxu1 %v5968_v1  ;;  %5669 = vmatprep.subr.bf16.mxu0 %v5968_v1 }
 0x44f   :  { %v2157_v57 = vpop.f32.mrf.mxu1  ;;  %5536 = vmatmul.mubr.bf16.vlgmr.msra.gmra.mxu1 %v3353_v24 }
 0x450   :  { %v2163_v49 = vadd.f32 %v2157_v57, %v2055_v43  ;;  %5560 = vmatpush3.bf16.msra.mxu1 %v5904_v48  ;;  %5670 = vmatpush3.bf16.msra.mxu0 %v5905_v50 }
 0x451   :  { %v5297_v63 = vpop.f32.mrf.mxu1  ;;  %5561 = vmatprep.subr.bf16.mxu1 %v5968_v1  ;;  %5671 = vmatprep.subr.bf16.mxu0 %v5968_v1 }
 0x452   :  { %5575 = vmatprep.mubr.msk.bf16.mxu1 %vm5969_vm0, %v5968_v1  ;;  %v2271_v27 = vadd.f32 %v6947_v5, %v2163_v49  ;;  %v1335_v5 = vadd.f32 %v6943_v4, %v6770_v9  ;;  %v5925_v49 = vld [vmem:[#allocation3 + $0x5e8] sm:$0xff]   ;;  %v5927_v63 = vld [vmem:[#allocation3 + $0x5d8] sm:$0xff]  }
 0x453   :  { %v2160_v0 = vpop.f32.mrf.mxu1 }
 0x454   :  { %5562 = vmatpush3.bf16.msra.mxu1 %v5906_v54  ;;  %5672 = vmatpush3.bf16.msra.mxu0 %v5907_v38  ;;  %v1399_v34 = vmul.f32 0.01, %v1335_v5  ;;  %vm1374_vm9 = vcmp.gt.f32.partialorder %v1335_v5, 0.0  ;;  %v5926_v38 = vld [vmem:[#allocation3 + $0x5e0] sm:$0xff]  }
 0x455   :  { %v5298_v3 = vpop.f32.mrf.mxu1  ;;  %5563 = vmatprep.subr.bf16.mxu1 %v5968_v1  ;;  %5673 = vmatprep.subr.bf16.mxu0 %v5968_v1 }
 0x456   :  { %v1424_v39 = vsel %vm1374_vm9, %v1335_v5, %v1399_v34  ;;  %v5935_v5 = vld [vmem:[%s7155_s7 + $0x18] sm:$0xff]  }
 0x457   :  { %v1457_v9 = vmul.f32 %v6923_v8, %v1424_v39  ;;  %v5938_v39 = vld [vmem:[%s7155_s7] sm:$0xff]  }
 0x458   :  { %5564 = vmatpush3.bf16.msra.mxu1 %v5908_v18  ;;  %5674 = vmatpush3.bf16.msra.mxu0 %v5909_v2 }
 0x459   :  { %5565 = vmatprep.subr.bf16.mxu1 %v5968_v1  ;;  %v1490_v45 = vadd.f32 %v6933_v56, %v1457_v9 }
 0x45b   :  { %v7044_v14 = vpop.f32.mrf.mxu0  ;;  %5676 = vmatmul.mubr.bf16.vlgmr.msra.gmra.mxu0 %v4109_v12  ;;  %v3785_v46 = vpack.c.bf16 %v1490_v45, %v1490_v45  ;;  %v5929_v12 = vld [vmem:[#allocation3 + $0x5c8] sm:$0xff]  }
 0x45c   :  { %5566 = vmatpush3.bf16.msra.mxu1 %v5910_v6 }
 0x45d   :  { %v5437_v36 = vpop.f32.mrf.mxu0  ;;  %5567 = vmatprep.subr.bf16.mxu1 %v5968_v1 }
 0x45f   :  { %v2916_v16 = vpop.f32.mrf.mxu0 }
 0x460   :  { %5568 = vmatpush3.bf16.msra.mxu1 %v5911_v15 }
 0x461   :  { %v5438_v61 = vpop.f32.mrf.mxu0  ;;  %5569 = vmatprep.subr.bf16.mxu1 %v5968_v1 }
 0x464   :  { %5570 = vmatpush3.bf16.msra.mxu1 %v5912_v10 }
 0x465   :  { %5571 = vmatprep.subr.bf16.mxu1 %v5968_v1 }
 0x468   :  { %5572 = vmatpush3.bf16.msra.mxu1 %v5913_v28 }
 0x469   :  { %5573 = vmatprep.subr.bf16.mxu1 %v5968_v1 }
 0x46c   :  { %5574 = vmatpush3.bf16.msra.mxu1 %v5914_v21 }
 0x46d   :  { %5599 = vmatprep.subr.bf16.mxu1 %v5968_v1 }
 0x46f   :  { %v2373_v51 = vpop.f32.mrf.mxu1  ;;  %5576 = vmatmul.mubr.bf16.vlgmr.msra.gmra.mxu1 %v3569_v26 }
 0x470   :  { %v2379_v52 = vadd.f32 %v2373_v51, %v2271_v27  ;;  %5600 = vmatpush3.bf16.msra.mxu1 %v5915_v23  ;;  %5615 = vmatprep.mubr.msk.bf16.mxu1 %vm5969_vm0, %v5968_v1  ;;  %v5931_v51 = vld [vmem:[%s7155_s7 + $0x38] sm:$0xff]  }
 0x471   :  { %v5337_v19 = vpop.f32.mrf.mxu1  ;;  %5601 = vmatprep.subr.bf16.mxu1 %v5968_v1 }
 0x472   :  { %v2487_v48 = vadd.f32 %v6980_v17, %v2379_v52  ;;  %v1343_v17 = vadd.f32 %v6943_v4, %v6781_v47  ;;  %v5930_v4 = vld [vmem:[#allocation3 + $0x5c0] sm:$0xff]   ;;  %v5932_v52 = vld [vmem:[%s7155_s7 + $0x30] sm:$0xff]  }
 0x473   :  { %v2376_v53 = vpop.f32.mrf.mxu1 }
 0x474   :  { %5602 = vmatpush3.bf16.msra.mxu1 %v5916_v30  ;;  %v1401_v18 = vmul.f32 0.01, %v1343_v17  ;;  %vm1376_vm10 = vcmp.gt.f32.partialorder %v1343_v17, 0.0 }
 0x475   :  { %v5338_v7 = vpop.f32.mrf.mxu1  ;;  %5603 = vmatprep.subr.bf16.mxu1 %v5968_v1 }
 0x476   :  { %v1426_v6 = vsel %vm1376_vm10, %v1343_v17, %v1401_v18 }
 0x477   :  { %v1459_v47 = vmul.f32 %v6923_v8, %v1426_v6 }
 0x478   :  { %5604 = vmatpush3.bf16.msra.mxu1 %v5917_v31  ;;  %v5934_v31 = vld [vmem:[%s7155_s7 + $0x20] sm:$0xff]  }
 0x479   :  { %5605 = vmatprep.subr.bf16.mxu1 %v5968_v1  ;;  %v1492_v13 = vadd.f32 %v6933_v56, %v1459_v47 }
 0x47b   :  { %v7061_v32 = vpop.f32.mrf.mxu0  ;;  %v4001_v15 = vpack.c.bf16 %v1492_v13, %v1492_v13 }
 0x47c   :  { %5606 = vmatpush3.bf16.msra.mxu1 %v5918_v59 }
 0x47d   :  { %v5477_v33 = vpop.f32.mrf.mxu0  ;;  %5607 = vmatprep.subr.bf16.mxu1 %v5968_v1 }
 0x47f   :  { %v3132_v62 = vpop.f32.mrf.mxu0 }
 0x480   :  { %5608 = vmatpush3.bf16.msra.mxu1 %v5919_v11  ;;  %v5936_v62 = vld [vmem:[%s7155_s7 + $0x10] sm:$0xff]  }
 0x481   :  { %v5478_v40 = vpop.f32.mrf.mxu0  ;;  %5609 = vmatprep.subr.bf16.mxu1 %v5968_v1 }
 0x484   :  { %5610 = vmatpush3.bf16.msra.mxu1 %v5920_v35 }
 0x485   :  { %5611 = vmatprep.subr.bf16.mxu1 %v5968_v1 }
 0x488   :  { %5612 = vmatpush3.bf16.msra.mxu1 %v5921_v44 }
 0x489   :  { %5613 = vmatprep.subr.bf16.mxu1 %v5968_v1 }
 0x48c   :  { %5614 = vmatpush3.bf16.msra.mxu1 %v5922_v41 }
 0x48d   :  { %5639 = vmatprep.subr.bf16.mxu1 %v5968_v1 }
 0x48f   :  { %v2589_v50 = vpop.f32.mrf.mxu1  ;;  %5616 = vmatmul.mubr.bf16.vlgmr.msra.gmra.mxu1 %v3785_v46 }
 0x490   :  { %v2595_v24 = vadd.f32 %v2589_v50, %v2487_v48  ;;  %5640 = vmatpush3.bf16.msra.mxu1 %v5923_v37  ;;  %5655 = vmatprep.mubr.msk.bf16.mxu1 %vm5969_vm0, %v5968_v1 }
 0x491   :  { %v5377_v43 = vpop.f32.mrf.mxu1  ;;  %5641 = vmatprep.subr.bf16.mxu1 %v5968_v1 }
 0x492   :  { %v2703_v36 = vadd.f32 %v7013_v29, %v2595_v24 }
 0x493   :  { %v2592_v57 = vpop.f32.mrf.mxu1 }
 0x494   :  { %5642 = vmatpush3.bf16.msra.mxu1 %v5924_v55 }
 0x495   :  { %v5378_v54 = vpop.f32.mrf.mxu1  ;;  %5643 = vmatprep.subr.bf16.mxu1 %v5968_v1 }
 0x498   :  { %5644 = vmatpush3.bf16.msra.mxu1 %v5925_v49 }
 0x499   :  { %5645 = vmatprep.subr.bf16.mxu1 %v5968_v1 }
 0x49b   :  { %v7078_v60 = vpop.f32.mrf.mxu0 }
 0x49c   :  { %5646 = vmatpush3.bf16.msra.mxu1 %v5926_v38 }
 0x49d   :  { %v5517_v0 = vpop.f32.mrf.mxu0  ;;  %5647 = vmatprep.subr.bf16.mxu1 %v5968_v1 }
 0x49f   :  { %v3348_v2 = vpop.f32.mrf.mxu0 }
 0x4a0   :  { %5648 = vmatpush3.bf16.msra.mxu1 %v5927_v63 }
 0x4a1   :  { %v5518_v3 = vpop.f32.mrf.mxu0  ;;  %5649 = vmatprep.subr.bf16.mxu1 %v5968_v1 }
 0x4a4   :  { %5650 = vmatpush3.bf16.msra.mxu1 %v5928_v42 }
 0x4a5   :  { %5651 = vmatprep.subr.bf16.mxu1 %v5968_v1 }
 0x4a8   :  { %5652 = vmatpush3.bf16.msra.mxu1 %v5929_v12 }
 0x4a9   :  { %5653 = vmatprep.subr.bf16.mxu1 %v5968_v1 }
 0x4ac   :  { %5654 = vmatpush3.bf16.msra.mxu1 %v5930_v4 }
 0x4ad   :  { %5679 = vmatprep.subr.bf16.mxu1 %v5968_v1 }
 0x4af   :  { %v2805_v58 = vpop.f32.mrf.mxu1  ;;  %5656 = vmatmul.mubr.bf16.vlgmr.msra.gmra.mxu1 %v4001_v15  ;;  %v4661_v15 = vld [vmem:[%s7156_s8] ss:$0 sm:$0xff] }
 0x4b0   :  { %v2811_v16 = vadd.f32 %v2805_v58, %v2703_v36  ;;  %5695 = vmatprep.mubr.msk.bf16.mxu1 %vm5969_vm0, %v5968_v1  ;;  %5680 = vmatpush3.bf16.msra.mxu1 %v5931_v51 }
 0x4b1   :  { %v5417_v8 = vpop.f32.mrf.mxu1  ;;  %5681 = vmatprep.subr.bf16.mxu1 %v5968_v1 }
 0x4b2   :  { %v2919_v21 = vadd.f32 %v7044_v14, %v2811_v16  ;;  %v5933_v14 = vld [vmem:[%s7155_s7 + $0x28] sm:$0xff]  }
 0x4b3   :  { %v2808_v10 = vpop.f32.mrf.mxu1 }
 0x4b4   :  { %5682 = vmatpush3.bf16.msra.mxu1 %v5932_v52  ;;  %v4675_v52 = vld [vmem:[%s7157_s9 + $0x1] ss:$0 sm:$0xff] }
 0x4b5   :  { %v5418_v61 = vpop.f32.mrf.mxu1  ;;  %5683 = vmatprep.subr.bf16.mxu1 %v5968_v1 }
 0x4b8   :  { %5684 = vmatpush3.bf16.msra.mxu1 %v5933_v14 }
 0x4b9   :  { %5685 = vmatprep.subr.bf16.mxu1 %v5968_v1 }
 0x4bb   :  { %v7090_v20 = vpop.f32.mrf.mxu0 }
 0x4bc   :  { %5686 = vmatpush3.bf16.msra.mxu1 %v5934_v31 }
 0x4bd   :  { %v5557_v28 = vpop.f32.mrf.mxu0  ;;  %5687 = vmatprep.subr.bf16.mxu1 %v5968_v1 }
 0x4bf   :  { %v3564_v25 = vpop.f32.mrf.mxu0 }
 0x4c0   :  { %5688 = vmatpush3.bf16.msra.mxu1 %v5935_v5  ;;  %v4663_v25 = vld [vmem:[%s7158_s10] ss:$0 sm:$0xff] }
 0x4c1   :  { %v5558_v56 = vpop.f32.mrf.mxu0  ;;  %5689 = vmatprep.subr.bf16.mxu1 %v5968_v1 }
 0x4c4   :  { %5690 = vmatpush3.bf16.msra.mxu1 %v5936_v62 }
 0x4c5   :  { %5691 = vmatprep.subr.bf16.mxu1 %v5968_v1 }
 0x4cf   :  { %v3021_v22 = vpop.f32.mrf.mxu1 }
 0x4d0   :  { %v3027_v23 = vadd.f32 %v3021_v22, %v2919_v21 }
 0x4d1   :  { %v5457_v26 = vpop.f32.mrf.mxu1 }
 0x4d2   :  { %v3135_v59 = vadd.f32 %v7061_v32, %v3027_v23  ;;  %v5937_v32 = vld [vmem:[%s7155_s7 + $0x8] sm:$0xff]   ;;  %v4665_v23 = vld [vmem:[%s7156_s8 + $0x1] ss:$0 sm:$0xff] }
 0x4d3   :  { %v3024_v29 = vpop.f32.mrf.mxu1  ;;  %5692 = vmatpush3.bf16.msra.mxu1 %v5937_v32 }
 0x4d4   :  { %5693 = vmatprep.subr.bf16.mxu1 %v5968_v1 }
 0x4d5   :  { %v5458_v27 = vpop.f32.mrf.mxu1 }
 0x4d7   :  { %5694 = vmatpush3.bf16.msra.mxu1 %v5938_v39 }
 0x4db   :  { %v3777_v30 = vpop.f32.mrf.mxu0 }
 0x4dd   :  { %v5597_v19 = vpop.f32.mrf.mxu0 }
 0x4de   :  { %v4677_v19 = vld [vmem:[%s7158_s10 + $0x1] ss:$0 sm:$0xff] }
 0x4df   :  { %v3780_v53 = vpop.f32.mrf.mxu0 }
 0x4e1   :  { %v5598_v7 = vpop.f32.mrf.mxu0 }
 0x4ef   :  { %v3237_v11 = vpop.f32.mrf.mxu1 }
 0x4f0   :  { %v3243_v33 = vadd.f32 %v3237_v11, %v3135_v59 }
 0x4f1   :  { %v5497_v34 = vpop.f32.mrf.mxu1 }
 0x4f2   :  { %v3351_v37 = vadd.f32 %v7078_v60, %v3243_v33 }
 0x4f3   :  { %v3240_v35 = vpop.f32.mrf.mxu1 }
 0x4f5   :  { %v5498_v40 = vpop.f32.mrf.mxu1 }
 0x4fb   :  { %v3993_v44 = vpop.f32.mrf.mxu0 }
 0x4fd   :  { %v5637_v9 = vpop.f32.mrf.mxu0 }
 0x4ff   :  { %v3996_v41 = vpop.f32.mrf.mxu0 }
 0x501   :  { %v5638_v45 = vpop.f32.mrf.mxu0 }
 0x50f   :  { %v3453_v46 = vpop.f32.mrf.mxu1 }
 0x510   :  { %v3459_v48 = vadd.f32 %v3453_v46, %v3351_v37 }
 0x511   :  { %v5537_v50 = vpop.f32.mrf.mxu1 }
 0x512   :  { %v3567_v3 = vadd.f32 %v7090_v20, %v3459_v48  ;;  %v4662_v20 = vld [vmem:[%s7157_s9] ss:$0 sm:$0xff] }
 0x513   :  { %v3456_v24 = vpop.f32.mrf.mxu1 }
 0x515   :  { %v5538_v55 = vpop.f32.mrf.mxu1 }
 0x51b   :  { %v4209_v43 = vpop.f32.mrf.mxu0 }
 0x51d   :  { %v5677_v57 = vpop.f32.mrf.mxu0 }
 0x51f   :  { %v4212_v49 = vpop.f32.mrf.mxu0 }
 0x521   :  { %v5678_v54 = vpop.f32.mrf.mxu0 }
 0x52f   :  { %v3669_v38 = vpop.f32.mrf.mxu1 }
 0x530   :  { %v3675_v60 = vadd.f32 %v3669_v38, %v3567_v3 }
 0x531   :  { %v5577_v17 = vpop.f32.mrf.mxu1 }
 0x532   :  { %v3783_v6 = vadd.f32 %v3777_v30, %v3675_v60 }
 0x533   :  { %v3672_v63 = vpop.f32.mrf.mxu1 }
 0x535   :  { %v5578_v1 = vpop.f32.mrf.mxu1 }
 0x54f   :  { %v3885_v0 = vpop.f32.mrf.mxu1 }
 0x550   :  { %v3891_v12 = vadd.f32 %v3885_v0, %v3783_v6 }
 0x551   :  { %v5617_v18 = vpop.f32.mrf.mxu1 }
 0x552   :  { %v3999_v47 = vadd.f32 %v3993_v44, %v3891_v12 }
 0x553   :  { %v3888_v2 = vpop.f32.mrf.mxu1 }
 0x555   :  { %v5618_v42 = vpop.f32.mrf.mxu1 }
 0x56f   :  { %v4101_v4 = vpop.f32.mrf.mxu1 }
 0x570   :  { %v4107_v13 = vadd.f32 %v4101_v4, %v3999_v47 }
 0x571   :  { %v5657_v36 = vpop.f32.mrf.mxu1 }
 0x572   :  { %v4215_v58 = vadd.f32 %v4209_v43, %v4107_v13 }
 0x573   :  { %v4104_v16 = vpop.f32.mrf.mxu1 }
 0x574   :  { %v4223_v8 = vadd.f32 %v4661_v15, %v4215_v58 }
 0x575   :  { %v5658_v10 = vpop.f32.mrf.mxu1 }
 0x576   :  { %vm4224_vm0 = vcmp.gt.f32.partialorder %v4223_v8, 0.0  ;;  %v4225_v61 = vmul.f32 0.01, %v4223_v8 }
 0x578   :  { %v4226_v28 = vsel %vm4224_vm0, %v4223_v8, %v4225_v61 }
 0x579   :  { %v4234_v56 = vmul.f32 %v4662_v20, %v4226_v28 }
 0x57b   :  { %v4242_v21 = vadd.f32 %v4663_v25, %v4234_v56 }
 0x57d   :  { %v4243_v22 = vpack.c.bf16 %v4242_v21, %v4242_v21 }
 0x57f   :  { %5696 = vmatmul.mubr.bf16.vlgmr.msra.gmra.mxu1 %v4243_v22 }
 0x63f   :  { %v4350_v26 = vpop.f32.mrf.mxu1 }
 0x640   :  { %v4351_v29 = vadd.f32 %v4665_v23, %v4350_v26 }
 0x641   :  { %v5697_v27 = vpop.f32.mrf.mxu1 }
 0x642   :  { %vm4356_vm11 = vcmp.gt.f32.partialorder %v4351_v29, 0.0  ;;  %v4357_v51 = vmul.f32 0.01, %v4351_v29 }
 0x643   :  { %v4353_v30 = vpop.f32.mrf.mxu1 }
 0x644   :  { %v4358_v14 = vsel %vm4356_vm11, %v4351_v29, %v4357_v51 }
 0x645   :  { %v4367_v53 = vmul.f32 %v4675_v52, %v4358_v14  ;;  %v5698_v31 = vpop.f32.mrf.mxu1 }
 0x647   :  { %v4376_v7 = vadd.f32 %v4677_v19, %v4367_v53 }
 0x649   :  { %4377 = vst [vmem:[%s7159_s11] sm:$0xff] %v4376_v7 }
 0x64a   :  { %4382 = vsyncpa [#allocation4], 1 }

</bundles_post_ra>
